<compile_context>
chip_gen: v5e
topology: v5e:2x2
jax: 0.10.0
libtpu: 0.0.40
codegen_flags: <defaults>
</compile_context>

<pallas_src>
import functools

import jax
import jax.numpy as jnp
from jax.experimental import pallas as pl
from jax.experimental.pallas import tpu as pltpu


def _vq_kernel(x_ref, w_ref, wsq_ref, q_ref, idx_ref, sq_ref, cnt_ref, *,
               t_total, matmul_dtype):
    x = x_ref[0]                      # (D, TT) f32 token slab (tokens on lanes)
    w = w_ref[...]                    # (K, D) f32 codebook (resident block)
    D, TT = x.shape
    K = w.shape[0]
    exact_f32 = jnp.dtype(matmul_dtype) == jnp.dtype(jnp.float32)

    # Validity mask for a possibly-partial last tile along T.
    t0 = pl.program_id(1) * TT
    lane = jax.lax.broadcasted_iota(jnp.int32, (1, TT), 1)
    valid = (t0 + lane) < t_total                                     # (1, TT)

    # Distances (transposed, shape (K, TT)).  ||x||^2 is a per-token constant
    # and argmin-invariant, so it is dropped.  ||w||^2 is precomputed in the
    # wrapper (hoisted out of the grid loop).  The x.w^T matmul runs on the
    # MXU in bf16 (f32 accumulation) by default; near-tie argmins can differ
    # from an f32 torch reference -- pass matmul_dtype=jnp.float32 for exact.
    xw = jax.lax.dot_general(
        w.astype(matmul_dtype), x.astype(matmul_dtype),
        (((1,), (0,)), ((), ())),
        preferred_element_type=jnp.float32)                           # (K, TT)
    dist = wsq_ref[...] - 2.0 * xw                                    # (K, TT)

    # First-occurrence argmin over the codebook (sublane) axis, like
    # torch.argmin.  (Kept as the known-good two-pass reduce; a fused
    # value+index single-pass min is a lower-priority follow-up.)
    min_d = jnp.min(dist, axis=0, keepdims=True)                      # (1, TT)
    row = jax.lax.broadcasted_iota(jnp.int32, (K, TT), 0)
    first_idx = jnp.min(jnp.where(dist <= min_d, row, K),
                        axis=0, keepdims=True)                        # (1, TT)
    enc = (row == first_idx).astype(matmul_dtype)                     # (K, TT) exact 0/1

    # quantized = codebook row-gather expressed as a one-hot matmul, written
    # straight back in (D, TT) layout.  The one-hot operand is exactly 0/1 in
    # bf16; the codebook is fed as a two-term bf16 split (w_hi + w_lo, summed
    # in f32) so the gather stays on the fast MXU path with ~f32 accuracy.
    if exact_f32:
        quant = jax.lax.dot_general(w, enc, (((0,), (0,)), ((), ())),
                                    preferred_element_type=jnp.float32)
    else:
        w_hi = w.astype(matmul_dtype)
        w_lo = (w - w_hi.astype(jnp.float32)).astype(matmul_dtype)
        quant = jax.lax.dot_general(w_hi, enc, (((0,), (0,)), ((), ())),
                                    preferred_element_type=jnp.float32)
        quant = quant + jax.lax.dot_general(
            w_lo, enc, (((0,), (0,)), ((), ())),
            preferred_element_type=jnp.float32)                       # (D, TT)

    q_ref[...] = quant.reshape(1, D, TT).astype(q_ref.dtype)
    idx_ref[...] = first_idx.reshape(1, 1, TT)

    # Per-tile partial sums (padded tail columns masked).  Final tiny
    # reductions for loss / perplexity run in the JAX wrapper so both grid
    # axes stay "parallel" (no cross-tile accumulator).
    diff = quant - x
    d2 = jnp.where(valid, diff * diff, 0.0)                           # (D, TT)
    sq = jnp.sum(jnp.sum(d2, axis=1, keepdims=True), axis=0, keepdims=True)
    sq_ref[...] = sq.reshape(1, 1, 1, 1)

    # Lane-dense (1, K) code counts straight off the MXU: the 0/1 validity row
    # contracted against enc over the token axis.  Exact (0/1 operands, f32
    # accumulation) and stores as an unmasked lane-dense vst.
    cnt = jax.lax.dot_general(valid.astype(matmul_dtype), enc,
                              (((1,), (1,)), ((), ())),
                              preferred_element_type=jnp.float32)     # (1, K)
    cnt_ref[...] = cnt.reshape(1, 1, 1, K)


def _pick_token_tile(T, K, D, token_tile, x_buffers, out_itemsize, budget):
    """Largest token tile (multiple of 128 unless it spans all of T) whose
    per-step VMEM footprint stays under `budget` (v7x-safe by default)."""
    def est(tt):
        x_b = max(x_buffers, 2) * D * tt * 4            # pipelined input blocks
        q_b = 2 * D * tt * out_itemsize                  # pipelined quant blocks
        idx_b = 2 * tt * 4
        temps = 4 * K * tt * 4 + 3 * D * tt * 4          # dist/xw/iota/enc + x/quant/diff
        fixed = 2 * K * D * 4 + 4 * K * 4 + (1 << 20)    # codebook, wsq/cnt, slack
        return x_b + q_b + idx_b + temps + fixed

    if T <= token_tile and est(T) <= budget:
        return T
    tt = max(128, (min(token_tile, T) // 128) * 128)
    while tt > 128 and est(tt) > budget:
        tt -= 128
    return min(tt, T)


def midi_vector_quantizer(x, codebook, commitment_cost=0.5, *,
                          token_tile=1024, matmul_dtype=jnp.bfloat16,
                          out_dtype=jnp.float32, x_buffers=2,
                          return_encodings=True, encodings_dtype=jnp.float32,
                          vmem_budget_bytes=24 * 1024 * 1024,
                          vmem_limit_bytes=48 * 1024 * 1024):
    """Forward pass of MIDIVectorQuantizer.

    x:        (B, 1, D, T) float32  (PyTorch input layout)
    codebook: (K, D)       float32  (nn.Embedding weight)
    returns:  (loss, quantized (B,1,D,T), perplexity, encodings (B*T, K) or None)
    """
    B, C, D, T = x.shape
    assert C == 1
    K, Dw = codebook.shape
    assert Dw == D

    x3 = x.reshape(B, D, T)          # drop dummy channel; no data movement
    N = B * T

    # ||w||^2 hoisted out of the kernel (re-used by every grid step).
    w_sq = jnp.sum(codebook * codebook, axis=1, keepdims=True)        # (K, 1)

    out_itemsize = jnp.dtype(out_dtype).itemsize
    tt = _pick_token_tile(T, K, D, token_tile, x_buffers, out_itemsize,
                          vmem_budget_bytes)
    n_t = pl.cdiv(T, tt)

    kernel = functools.partial(_vq_kernel, t_total=T, matmul_dtype=matmul_dtype)

    cost = pl.CostEstimate(
        flops=6 * N * K * D + 2 * N * K,               # dist + split gather + counts
        transcendentals=0,
        bytes_accessed=(4 * N * D + out_itemsize * N * D + 4 * K * D + 4 * N))

    # Input pipelining depth (review: sweep pl.Buffered(3) once DMA-bound).
    x_index_map = lambda b, t: (b, 0, t)
    x_spec = pl.BlockSpec((1, D, tt), x_index_map)
    if x_buffers is not None and x_buffers != 2:
        try:
            x_spec = pl.BlockSpec((1, D, tt), x_index_map,
                                  pipeline_mode=pl.Buffered(x_buffers))
        except (TypeError, AttributeError):
            x_spec = pl.BlockSpec((1, D, tt), x_index_map)

    quant3, idx, sq_part, cnt_part = pl.pallas_call(
        kernel,
        grid=(B, n_t),
        in_specs=[
            x_spec,                                              # x token tile
            pl.BlockSpec((K, D), lambda b, t: (0, 0)),           # resident codebook
            pl.BlockSpec((K, 1), lambda b, t: (0, 0)),           # resident ||w||^2
        ],
        out_specs=(
            pl.BlockSpec((1, D, tt), lambda b, t: (b, 0, t)),        # quantized
            pl.BlockSpec((1, 1, tt), lambda b, t: (b, 0, t)),        # indices
            pl.BlockSpec((1, 1, 1, 1), lambda b, t: (b, t, 0, 0)),   # sum(diff^2)
            pl.BlockSpec((1, 1, 1, K), lambda b, t: (b, t, 0, 0)),   # lane-dense counts
        ),
        out_shape=(
            jax.ShapeDtypeStruct((B, D, T), out_dtype),
            jax.ShapeDtypeStruct((B, 1, T), jnp.int32),
            jax.ShapeDtypeStruct((B, n_t, 1, 1), jnp.float32),
            jax.ShapeDtypeStruct((B, n_t, 1, K), jnp.float32),
        ),
        compiler_params=pltpu.CompilerParams(
            dimension_semantics=("parallel", "parallel"),
            vmem_limit_bytes=vmem_limit_bytes),
        cost_estimate=cost,
    )(x3, codebook, w_sq)

    # Tiny f32 epilogue reductions over the per-tile partials.
    mse = jnp.sum(sq_part) / jnp.float32(N * D)
    # Forward value: q_latent_loss + commitment_cost * e_latent_loss; both
    # terms equal mse in the forward pass (detach only changes gradients).
    loss = (1.0 + commitment_cost) * mse

    avg_probs = jnp.sum(cnt_part, axis=(0, 1, 2)) / jnp.float32(N)    # (K,)
    perplexity = jnp.exp(-jnp.sum(avg_probs * jnp.log(avg_probs + 1e-10)))

    # One-hot encodings materialized outside the kernel (exact); the kernel
    # only writes int32 indices, cutting its largest HBM write by ~K x.  Set
    # return_encodings=False when the one-hot is only used for statistics.
    encodings = None
    if return_encodings:
        idx_flat = idx.reshape(N)                                      # b-major, t-minor
        encodings = jax.nn.one_hot(idx_flat, K, dtype=encodings_dtype)

    # Straight-through estimator: forward value equals quantized.  Output is
    # already in (B, D, T) layout; just restore the dummy channel dim.
    quantized_out = quant3[:, None, :, :]                              # (B,1,D,T)

    # TODO(synk): detach()-based gradient structure (q/e latent split + straight
    # through estimator) is forward-only here; training would need a custom_vjp.
    return loss, quantized_out, perplexity, encodings


def _reference(x, codebook, commitment_cost):
    """Pure-JAX transcription of the PyTorch forward (for validation)."""
    B, _, D, T = x.shape
    inputs = jnp.transpose(x[:, 0], (0, 2, 1))                        # (B, T, D)
    flat = inputs.reshape(-1, D)
    d = (jnp.sum(flat * flat, axis=1, keepdims=True)
         + jnp.sum(codebook * codebook, axis=1)
         - 2.0 * flat @ codebook.T)
    idx = jnp.argmin(d, axis=1)
    enc = jax.nn.one_hot(idx, codebook.shape[0], dtype=jnp.float32)
    q = (enc @ codebook).reshape(inputs.shape)
    mse = jnp.mean((q - inputs) ** 2)
    loss = (1.0 + commitment_cost) * mse
    avg = jnp.mean(enc, axis=0)
    perp = jnp.exp(-jnp.sum(avg * jnp.log(avg + 1e-10)))
    q_out = jnp.transpose(q, (0, 2, 1))[:, None]
    return loss, q_out, perp, enc


if __name__ == "__main__":
    # Small, deterministic configuration consistent with the module.
    num_embeddings = 256   # K
    embedding_dim = 128    # D (lane-aligned)
    commitment_cost = 0.5
    B, T = 2, 512          # N = B*T = 1024 tokens; tt = T (single tile per batch)

    key = jax.random.PRNGKey(0)
    k_emb, k_x = jax.random.split(key)

    # nn.Embedding weight ~ U(-1/K, 1/K), deterministic from PRNGKey(0).
    codebook = jax.random.uniform(
        k_emb, (num_embeddings, embedding_dim), dtype=jnp.float32,
        minval=-1.0 / num_embeddings, maxval=1.0 / num_embeddings)

    # Input in the PyTorch layout (B, 1, D, T).
    x = jax.random.normal(k_x, (B, 1, embedding_dim, T), dtype=jnp.float32)

    # 1) Exact-path (f32 matmul) correctness check against a pure-JAX reference.
    exact_fwd = jax.jit(functools.partial(
        midi_vector_quantizer, commitment_cost=commitment_cost,
        matmul_dtype=jnp.float32))
    loss_x, quant_x, perp_x, enc_x = exact_fwd(x, codebook)
    jax.block_until_ready((loss_x, quant_x, perp_x, enc_x))
    loss_r, quant_r, perp_r, enc_r = _reference(x, codebook, commitment_cost)
    assert abs(float(loss_x) - float(loss_r)) <= 1e-5 * max(1.0, abs(float(loss_r)))
    assert abs(float(perp_x) - float(perp_r)) <= 1e-2 * max(1.0, float(perp_r))
    assert float(jnp.mean(jnp.abs(quant_x - quant_r))) <= 1e-4

    # 2) Default fast path (bf16 MXU distances + split-bf16 gather).
    fwd = jax.jit(functools.partial(
        midi_vector_quantizer, commitment_cost=commitment_cost))
    loss, quantized, perplexity, encodings = fwd(x, codebook)
    jax.block_until_ready((loss, quantized, perplexity, encodings))

    assert quantized.shape == (B, 1, embedding_dim, T)
    assert encodings.shape == (B * T, num_embeddings)
    assert bool(jnp.isfinite(loss)) and bool(jnp.isfinite(perplexity))
    assert abs(float(loss) - float(loss_r)) <= 1e-3 * max(1.0, abs(float(loss_r)))
    print("KERNEL_OK")
</pallas_src>

<mosaic_0001>
module attributes {stable_mosaic.version = 11 : i64} {
  func.func @_vq_kernel(%arg0: i32, %arg1: i32, %arg2: memref<1x128x512xf32, #tpu.memory_space<vmem>>, %arg3: memref<256x128xf32, #tpu.memory_space<vmem>>, %arg4: memref<256x1xf32, #tpu.memory_space<vmem>>, %arg5: memref<1x128x512xf32, #tpu.memory_space<vmem>>, %arg6: memref<1x1x512xi32, #tpu.memory_space<vmem>>, %arg7: memref<1x1x1x1xf32, #tpu.memory_space<vmem>>, %arg8: memref<1x1x1x256xf32, #tpu.memory_space<vmem>>) attributes {dimension_semantics = [#tpu.dimension_semantics<parallel>, #tpu.dimension_semantics<parallel>], iteration_bounds = array<i64: 2, 1>, scalar_prefetch = 0 : i64, scratch_operands = 0 : i64, tpu.core_type = #tpu.core_type<tc>, window_params = [{transform_indices = @transform_0, window_bounds = array<i64: 1, 128, 512>}, {pipeline_mode = #tpu.pipeline_mode<synchronous>, transform_indices = @transform_1, window_bounds = array<i64: 256, 128>}, {pipeline_mode = #tpu.pipeline_mode<synchronous>, transform_indices = @transform_2, window_bounds = array<i64: 256, 1>}, {transform_indices = @transform_3, window_bounds = array<i64: 1, 128, 512>}, {transform_indices = @transform_4, window_bounds = array<i64: 1, 1, 512>}, {transform_indices = @transform_5, window_bounds = array<i64: 1, 1, 1, 1>}, {transform_indices = @transform_6, window_bounds = array<i64: 1, 1, 1, 256>}]} {
    %c0 = arith.constant 0 : index
    %c0_0 = arith.constant 0 : index
    %c0_1 = arith.constant 0 : index
    %0 = vector.load %arg2[%c0, %c0_0, %c0_1] : memref<1x128x512xf32, #tpu.memory_space<vmem>>, vector<1x128x512xf32>
    %1 = vector.shape_cast %0 : vector<1x128x512xf32> to vector<128x512xf32>
    %c0_2 = arith.constant 0 : index
    %c0_3 = arith.constant 0 : index
    %2 = vector.load %arg3[%c0_2, %c0_3] : memref<256x128xf32, #tpu.memory_space<vmem>>, vector<256x128xf32>
    %c512_i32 = arith.constant 512 : i32
    %3 = arith.muli %arg1, %c512_i32 : i32
    %4 = tpu.iota {dimensions = array<i32: 1>} : vector<1x512xi32>
    %5 = vector.broadcast %3 : i32 to vector<1x512xi32>
    %6 = arith.addi %5, %4 : vector<1x512xi32>
    %c512_i32_4 = arith.constant 512 : i32
    %7 = vector.broadcast %c512_i32_4 : i32 to vector<1x512xi32>
    %8 = arith.cmpi slt, %6, %7 : vector<1x512xi32>
    %cst = arith.constant dense<0.000000e+00> : vector<256x512xf32>
    %9 = tpu.matmul %2, %1, %cst {dimension_numbers = #tpu.dot_dimension_numbers<[1], [0], [0], [1], [0, 0, 1, 1], [], []>} : vector<256x128xf32>, vector<128x512xf32>, vector<256x512xf32> -> vector<256x512xf32>
    %c0_5 = arith.constant 0 : index
    %c0_6 = arith.constant 0 : index
    %10 = vector.load %arg4[%c0_5, %c0_6] : memref<256x1xf32, #tpu.memory_space<vmem>>, vector<256x1xf32>
    %cst_7 = arith.constant 2.000000e+00 : f32
    %11 = vector.broadcast %cst_7 : f32 to vector<256x512xf32>
    %12 = arith.mulf %11, %9 : vector<256x512xf32>
    %13 = vector.broadcast %10 : vector<256x1xf32> to vector<256x512xf32>
    %14 = arith.subf %13, %12 : vector<256x512xf32>
    %cst_8 = arith.constant dense<0x7F800000> : vector<512xf32>
    %15 = vector.multi_reduction <minimumf>, %14, %cst_8 [0] : vector<256x512xf32> to vector<512xf32>
    %16 = vector.shape_cast %15 : vector<512xf32> to vector<1x512xf32>
    %17 = tpu.iota {dimensions = array<i32: 0>} : vector<256x512xi32>
    %18 = vector.broadcast %16 : vector<1x512xf32> to vector<256x512xf32>
    %19 = arith.cmpf ole, %14, %18 : vector<256x512xf32>
    %c256_i32 = arith.constant 256 : i32
    %20 = vector.broadcast %c256_i32 : i32 to vector<256x512xi32>
    %21 = arith.select %19, %17, %20 : vector<256x512xi1>, vector<256x512xi32>
    %cst_9 = arith.constant dense<2147483647> : vector<512xi32>
    %22 = vector.multi_reduction <minsi>, %21, %cst_9 [0] : vector<256x512xi32> to vector<512xi32>
    %23 = vector.shape_cast %22 : vector<512xi32> to vector<1x512xi32>
    %24 = vector.broadcast %23 : vector<1x512xi32> to vector<256x512xi32>
    %25 = arith.cmpi eq, %17, %24 : vector<256x512xi32>
    %26 = arith.extui %25 : vector<256x512xi1> to vector<256x512xi32>
    %27 = arith.sitofp %26 : vector<256x512xi32> to vector<256x512xf32>
    %cst_10 = arith.constant dense<0.000000e+00> : vector<128x512xf32>
    %28 = tpu.matmul %2, %27, %cst_10 {dimension_numbers = #tpu.dot_dimension_numbers<[0], [0], [1], [1], [0, 1, 1, 1], [], []>} : vector<256x128xf32>, vector<256x512xf32>, vector<128x512xf32> -> vector<128x512xf32>
    %29 = vector.shape_cast %28 : vector<128x512xf32> to vector<1x128x512xf32>
    %c0_11 = arith.constant 0 : index
    %c0_12 = arith.constant 0 : index
    %c0_13 = arith.constant 0 : index
    %30 = vector.load %arg5[%c0_11, %c0_12, %c0_13] : memref<1x128x512xf32, #tpu.memory_space<vmem>>, vector<1x128x512xf32>
    tpu.vector_store %arg5[%c0_11, %c0_12, %c0_13], %29 {strides = array<i32>} : memref<1x128x512xf32, #tpu.memory_space<vmem>>, vector<1x128x512xf32>,
    %31 = vector.shape_cast %23 : vector<1x512xi32> to vector<1x1x512xi32>
    %c0_14 = arith.constant 0 : index
    %c0_15 = arith.constant 0 : index
    %c0_16 = arith.constant 0 : index
    %32 = vector.load %arg6[%c0_14, %c0_15, %c0_16] : memref<1x1x512xi32, #tpu.memory_space<vmem>>, vector<1x1x512xi32>
    tpu.vector_store %arg6[%c0_14, %c0_15, %c0_16], %31 {strides = array<i32>} : memref<1x1x512xi32, #tpu.memory_space<vmem>>, vector<1x1x512xi32>,
    %33 = arith.subf %28, %1 : vector<128x512xf32>
    %34 = arith.mulf %33, %33 : vector<128x512xf32>
    %cst_17 = arith.constant 0.000000e+00 : f32
    %35 = vector.shape_cast %8 : vector<1x512xi1> to vector<1x512xi1>
    %36 = vector.broadcast %35 : vector<1x512xi1> to vector<128x512xi1>
    %37 = vector.broadcast %cst_17 : f32 to vector<128x512xf32>
    %38 = arith.select %36, %34, %37 : vector<128x512xi1>, vector<128x512xf32>
    %cst_18 = arith.constant dense<0.000000e+00> : vector<128xf32>
    %39 = vector.multi_reduction <add>, %38, %cst_18 [1] : vector<128x512xf32> to vector<128xf32>
    %40 = vector.shape_cast %39 : vector<128xf32> to vector<128x1xf32>
    %cst_19 = arith.constant dense<0.000000e+00> : vector<1xf32>
    %41 = vector.multi_reduction <add>, %40, %cst_19 [0] : vector<128x1xf32> to vector<1xf32>
    %42 = vector.shape_cast %41 : vector<1xf32> to vector<1x1xf32>
    %43 = vector.shape_cast %42 : vector<1x1xf32> to vector<1x1x1x1xf32>
    %c0_20 = arith.constant 0 : index
    %c0_21 = arith.constant 0 : index
    %c0_22 = arith.constant 0 : index
    %c0_23 = arith.constant 0 : index
    %44 = vector.load %arg7[%c0_20, %c0_21, %c0_22, %c0_23] : memref<1x1x1x1xf32, #tpu.memory_space<vmem>>, vector<1x1x1x1xf32>
    tpu.vector_store %arg7[%c0_20, %c0_21, %c0_22, %c0_23], %43 {strides = array<i32>} : memref<1x1x1x1xf32, #tpu.memory_space<vmem>>, vector<1x1x1x1xf32>,
    %45 = arith.extui %8 : vector<1x512xi1> to vector<1x512xi32>
    %46 = arith.sitofp %45 : vector<1x512xi32> to vector<1x512xf32>
    %cst_24 = arith.constant dense<0.000000e+00> : vector<1x256xf32>
    %47 = tpu.matmul %46, %27, %cst_24 {dimension_numbers = #tpu.dot_dimension_numbers<[1], [1], [0], [0], [0, 0, 1, 0], [], []>} : vector<1x512xf32>, vector<256x512xf32>, vector<1x256xf32> -> vector<1x256xf32>
    %48 = vector.shape_cast %47 : vector<1x256xf32> to vector<1x1x1x256xf32>
    %c0_25 = arith.constant 0 : index
    %c0_26 = arith.constant 0 : index
    %c0_27 = arith.constant 0 : index
    %c0_28 = arith.constant 0 : index
    %49 = vector.load %arg8[%c0_25, %c0_26, %c0_27, %c0_28] : memref<1x1x1x256xf32, #tpu.memory_space<vmem>>, vector<1x1x1x256xf32>
    tpu.vector_store %arg8[%c0_25, %c0_26, %c0_27, %c0_28], %48 {strides = array<i32>} : memref<1x1x1x256xf32, #tpu.memory_space<vmem>>, vector<1x1x1x256xf32>,
    return
  }
  func.func @transform_0(%arg0: i32, %arg1: i32) -> (i32, i32, i32) {
    %c0_i32 = arith.constant 0 : i32
    %c0_i32_0 = arith.constant 0 : i32
    return %arg0, %c0_i32, %arg1 : i32, i32, i32
  }
  func.func @transform_1(%arg0: i32, %arg1: i32) -> (i32, i32) {
    %c0_i32 = arith.constant 0 : i32
    %c0_i32_0 = arith.constant 0 : i32
    %c0_i32_1 = arith.constant 0 : i32
    return %c0_i32, %c0_i32_0 : i32, i32
  }
  func.func @transform_2(%arg0: i32, %arg1: i32) -> (i32, i32) {
    %c0_i32 = arith.constant 0 : i32
    %c0_i32_0 = arith.constant 0 : i32
    %c0_i32_1 = arith.constant 0 : i32
    return %c0_i32, %c0_i32_0 : i32, i32
  }
  func.func @transform_3(%arg0: i32, %arg1: i32) -> (i32, i32, i32) {
    %c0_i32 = arith.constant 0 : i32
    %c0_i32_0 = arith.constant 0 : i32
    return %arg0, %c0_i32, %arg1 : i32, i32, i32
  }
  func.func @transform_4(%arg0: i32, %arg1: i32) -> (i32, i32, i32) {
    %c0_i32 = arith.constant 0 : i32
    %c0_i32_0 = arith.constant 0 : i32
    return %arg0, %c0_i32, %arg1 : i32, i32, i32
  }
  func.func @transform_5(%arg0: i32, %arg1: i32) -> (i32, i32, i32, i32) {
    %c0_i32 = arith.constant 0 : i32
    %c0_i32_0 = arith.constant 0 : i32
    %c0_i32_1 = arith.constant 0 : i32
    return %arg0, %arg1, %c0_i32, %c0_i32_0 : i32, i32, i32, i32
  }
  func.func @transform_6(%arg0: i32, %arg1: i32) -> (i32, i32, i32, i32) {
    %c0_i32 = arith.constant 0 : i32
    %c0_i32_0 = arith.constant 0 : i32
    %c0_i32_1 = arith.constant 0 : i32
    return %arg0, %arg1, %c0_i32, %c0_i32_0 : i32, i32, i32, i32
  }
}

</mosaic_0001>

<bundles_post_ra>
// kernel: midi_vector_quantizer.1
= control target key start
LH: loop header
LB: loop body
LE: loop exit
PB: predicated region body
PF: predicated region fallthrough
CT: control target
= control target key end

     0   :  { %s8382_s0 = inlined_call_operand.hbm [shape: f32[2,128,512], index: 0, kind: input, shape index: {}]   ;;  %s8383_s1 = inlined_call_operand.vmem [shape: f32[256,128], index: 1, kind: input, shape index: {}]   ;;  %s8384_s2 = inlined_call_operand.vmem [shape: f32[256,1], index: 2, kind: input, shape index: {}]   ;;  %s8385_s3 = inlined_call_operand.hbm [shape: f32[2,128,512], index: 3, kind: output, shape index: {0}]   ;;  %s8386_s4 = inlined_call_operand.vmem [shape: s32[2,1,512], index: 4, kind: output, shape index: {1}]   ;;  %s8387_s5 = inlined_call_operand.vmem [shape: f32[2,1,1,1], index: 5, kind: output, shape index: {2}]   ;;  %s8388_s6 = inlined_call_operand.vmem [shape: f32[2,1,1,256], index: 6, kind: output, shape index: {3}]  }
   0x1   :  { %8679 = sst [smem:[#allocation128_spill]] %s8382_s0 }
   0x2   :  { %12 = vsyncpa [#allocation3], 0 }
   0x3   :  { %14 = vsyncpa [#allocation3 + $0x1], 0 }
   0x4   :  { %15 = vsyncpa [#allocation4], 0 }
   0x5   :  { %17 = vsyncpa [#allocation4 + $0x1], 0  ;;  %s4751_s21 = smov 0   ;;  %s4753_s22 = smov 0  }
   0x6   :  { %s4755_s23 = smov 0   ;;  %s4757_s24 = smov 0  }
   0x7   :  { %s4759_s25 = smov 0   ;;  %s4761_s26 = smov 0  }
   0x8 LB: > { %s3834_s27 = sadd.s32 4294967295, %s4704_s26   ;;  %s3835_s28 = sadd.s32 4294967294, %s4704_s26   ;;  %s4704_s26 = sphi %s4761_s26, %s23_s26   ;;  %s4700_s25 = sphi %s4759_s25, %s9153_s25   ;;  %s4696_s24 = sphi %s4757_s24, %s9152_s24   ;;  %s4692_s23 = sphi %s4755_s23, %s9151_s23   ;;  %s4688_s22 = sphi %s4753_s22, %s9150_s22   ;;  %s4684_s21 = sphi %s4751_s21, %s9149_s21  }
   0x9   : > { %s35_s29 = sadd.s32 1, %s4700_s25  ;;  %s44_s30 = sadd.s32 1, %s4692_s23 }
   0xa   : > { %p37_p0 = scmp.ge.s32.totalorder %s35_s29, 2  ;;  %p51_p1 = scmp.ne.s32.totalorder %s4692_s23, %s4688_s22 }
   0xb   : > { %p52_p2 = scmp.eq.s32.totalorder %s4704_s26, 0  ;;  %p57_p3 = scmp.ne.s32.totalorder %s4688_s22, %s4684_s21 }
   0xc   : > { %s9155_s29 = smov (%p37_p0, %s35_s29), 0  ;;  %p58_p5 = scmp.eq.s32.totalorder %s3834_s27, 0 }
   0xd   : > { %8680 = sst [smem:[#allocation8_spill]] %s9155_s29  ;;  %p4792_p4 = por %p52_p2, %p51_p1 }
   0xe   : > { %s39_s8 = ssub.s32 %s4700_s25, %s9155_s29  ;;  %p125_p6 = scmp.eq.s32.totalorder %s3834_s27, 1 }
   0xf   : > { %p42_p7 = scmp.eq.s32.totalorder %s39_s8, 0  ;;  %p4798_p8 = por %p58_p5, %p57_p3 }
  0x10   : > { %p4802_p9 = por %p125_p6, %p51_p1  ;;  %p131_p10 = scmp.eq.s32.totalorder %s3835_s28, 1 }
  0x11   : > { %s4807_s11 = scalar_select %p42_p7, %s4692_s23, %s44_s30  }
  0x12   : > { %p4809_p11 = por %p131_p10, %p57_p3  ;;  %p3837_p12 = scmp.ge.s32.totalorder %s4704_s26, 2 }
  0x13   : > { %p4469_p13 = scmp.lt.s32.totalorder %s4704_s26, 2  ;;  %s241_s13 = sand.u32 1, %s4692_s23  }
  0x14   : > { %s3838_s14 = sshll.u32 %s241_s13, 9  ;;  %s4235_s15 = sshll.u32 %s4700_s25, 9 }
  0x15   : > { %s8685_s0 = sld [smem:[#allocation128_spill]]  ;;  %s245_s19 = scalar_lea.vmem [#allocation2], %s3838_s14 }
  0x16   : > { %s255_s20 = sshll.u32 %s245_s19, 4  ;;  %p4462_p0 = pnand %p4469_p13, %p4792_p4  ;;  %s256_s20 = int_to_ptr.vmem [resolvable:$true] %s255_s20 }
  0x17   : > { %p3841_p1 = scmp.ge.s32.totalorder %s4704_s26, 1  ;;  %s242_s28 = scalar_lea.sflag [#allocation3], %s241_s13 }
  0x18   : > { %s4706_s30 = smov 512   ;;  %s4707_s8 = smov 32  }
  0x19   : > { %p263_p2 = scmp.lt.s32.totalorder %s4704_s26, 3 }
  0x1b   : > { %s252_s18 = scalar_lea.hbm %s8685_s0, %s4235_s15  ;;  %p264_p3 = pnand %p3841_p1, %p263_p2 }
  0x1c   : > { %s253_s27 = sshll.u32 %s252_s18, 4  ;;  %s254_s27 = int_to_ptr.hbm [resolvable:$true] %s253_s27 }
  0x1d   : > { %4464 = dma.hbm_to_vmem [thread:$0]  (!%p4462_p0), %s254_s27, 8192, %s256_s20, %s242_s28, %s4706_s30, %s4706_s30, %s4707_s8  }
  0x1e   : > { %267 = sbr.rel (%p264_p3) target bundleno = 1188 (0x4a4), region = 32 }
  0x23   : > { %s4825_s29 = sand.u32 1, %s4688_s22  }
  0x24   : > { %s3842_s14 = sshll.u32 %s4825_s29, 9  ;;  %s270_s15 = scalar_lea.sflag [#allocation3], %s4825_s29 }
  0x25   : > { %s4831_s7 = scalar_lea.vmem [#allocation2], %s3842_s14 }
  0x26   : > { %4675 = dma.done.wait (%p4798_p8), %s270_s15, 8192  }
  0x27   : > { %4677 = vsyncadd (%p4798_p8), %s270_s15, 4294959104  ;;  %v410_v0 = vld [vmem:[%s4831_s7 + $0x1e0] sm:$0xff]  ;;  %v411_v1 = vld [vmem:[%s4831_s7 + $0x1e8] sm:$0xff]  ;;  %p328_p4 = scmp.lt.s32.totalorder %s4696_s24, 1  ;;  %s7635_s13 = scalar_lea.vmem [#allocation5], %s3842_s14 }
  0x28   : > { %v412_v2 = vld [vmem:[%s4831_s7 + $0x1f0] sm:$0xff]  ;;  %461 = vmatpush.msra.mxu0 %v410_v0  ;;  %574 = vmatpush.msra.mxu1 %v411_v1  ;;  %v413_v3 = vld [vmem:[%s4831_s7 + $0x1f8] sm:$0xff]  ;;  %v406_v4 = vld [vmem:[%s4831_s7 + $0x1c0] sm:$0xff]  ;;  %s4236_s14 = sshll.u32 %s4696_s24, 9  ;;  %s3640_s19 = sshll.u32 %s7635_s13, 4  ;;  %s3641_s19 = int_to_ptr.vmem [resolvable:$true] %s3640_s19 }
  0x29   : > { %v407_v5 = vld [vmem:[%s4831_s7 + $0x1c8] sm:$0xff]  ;;  %687 = vmatpush.msra.mxu2 %v412_v2  ;;  %800 = vmatpush.msra.mxu3 %v413_v3  ;;  %v408_v6 = vld [vmem:[%s4831_s7 + $0x1d0] sm:$0xff]  ;;  %v409_v7 = vld [vmem:[%s4831_s7 + $0x1d8] sm:$0xff]  ;;  %v4708_v3 = vmov 0   ;;  %s7319_s28 = scalar_select %p328_p4, %s4696_s24, 1 }
  0x2a   : > { %v402_v8 = vld [vmem:[%s4831_s7 + $0x1a0] sm:$0xff]  ;;  %462 = vmatpush.msra.mxu0 %v406_v4  ;;  %575 = vmatpush.msra.mxu1 %v407_v5  ;;  %v403_v9 = vld [vmem:[%s4831_s7 + $0x1a8] sm:$0xff]  ;;  %v404_v10 = vld [vmem:[%s4831_s7 + $0x1b0] sm:$0xff]  ;;  %s3639_s18 = scalar_lea.hbm %s8385_s3, %s4236_s14  ;;  %s3604_s27 = scalar_lea.sflag [#allocation4], %s4825_s29 }
  0x2b   : > { %v405_v11 = vld [vmem:[%s4831_s7 + $0x1b8] sm:$0xff]  ;;  %688 = vmatpush.msra.mxu2 %v408_v6  ;;  %801 = vmatpush.msra.mxu3 %v409_v7  ;;  %v398_v12 = vld [vmem:[%s4831_s7 + $0x180] sm:$0xff]  ;;  %v399_v13 = vld [vmem:[%s4831_s7 + $0x188] sm:$0xff]  ;;  %s3844_s30 = sshll.u32 %s7319_s28, 2  ;;  %s3642_s20 = sshll.u32 %s3639_s18, 4  ;;  %s3643_s20 = int_to_ptr.hbm [resolvable:$true] %s3642_s20 }
  0x2c   : > { %463 = vmatpush.msra.mxu0 %v402_v8  ;;  %576 = vmatpush.msra.mxu1 %v403_v9  ;;  %v400_v14 = vld [vmem:[%s4831_s7 + $0x190] sm:$0xff]  ;;  %v401_v15 = vld [vmem:[%s4831_s7 + $0x198] sm:$0xff]  ;;  %v394_v16 = vld [vmem:[%s4831_s7 + $0x160] sm:$0xff]  ;;  %s334_s9 = scalar_lea.vmem %s8386_s4, %s3844_s30  ;;  %s4636_s30 = sshra.s32 %s3643_s20, 4  ;;  %s4637_s30 = int_to_ptr.hbm [resolvable:$true] %s4636_s30 }
  0x2d   : > { %689 = vmatpush.msra.mxu2 %v404_v10  ;;  %802 = vmatpush.msra.mxu3 %v405_v11  ;;  %v395_v17 = vld [vmem:[%s4831_s7 + $0x168] sm:$0xff]  ;;  %v396_v18 = vld [vmem:[%s4831_s7 + $0x170] sm:$0xff]  ;;  %v397_v19 = vld [vmem:[%s4831_s7 + $0x178] sm:$0xff]  ;;  %s4642_s24 = scalar_lea.hbm %s8385_s3, 1024  ;;  %p4643_p8 = scmp.lt.s32.totalorder %s4637_s30, %s8385_s3 }
  0x2e   : > { %464 = vmatpush.msra.mxu0 %v398_v12  ;;  %577 = vmatpush.msra.mxu1 %v399_v13  ;;  %v390_v20 = vld [vmem:[%s4831_s7 + $0x140] sm:$0xff]  ;;  %v391_v21 = vld [vmem:[%s4831_s7 + $0x148] sm:$0xff]  ;;  %v392_v22 = vld [vmem:[%s4831_s7 + $0x150] sm:$0xff] }
  0x2f   : > { %690 = vmatpush.msra.mxu2 %v400_v14  ;;  %803 = vmatpush.msra.mxu3 %v401_v15  ;;  %v393_v23 = vld [vmem:[%s4831_s7 + $0x158] sm:$0xff]  ;;  %v386_v24 = vld [vmem:[%s4831_s7 + $0x120] sm:$0xff]  ;;  %v387_v25 = vld [vmem:[%s4831_s7 + $0x128] sm:$0xff] }
  0x30   : > { %465 = vmatpush.msra.mxu0 %v394_v16  ;;  %578 = vmatpush.msra.mxu1 %v395_v17  ;;  %v388_v26 = vld [vmem:[%s4831_s7 + $0x130] sm:$0xff]  ;;  %v389_v27 = vld [vmem:[%s4831_s7 + $0x138] sm:$0xff]  ;;  %v382_v28 = vld [vmem:[%s4831_s7 + $0x100] sm:$0xff] }
  0x31   : > { %691 = vmatpush.msra.mxu2 %v396_v18  ;;  %804 = vmatpush.msra.mxu3 %v397_v19  ;;  %v383_v29 = vld [vmem:[%s4831_s7 + $0x108] sm:$0xff]  ;;  %v384_v30 = vld [vmem:[%s4831_s7 + $0x110] sm:$0xff]  ;;  %v385_v31 = vld [vmem:[%s4831_s7 + $0x118] sm:$0xff] }
  0x32   : > { %466 = vmatpush.msra.mxu0 %v390_v20  ;;  %579 = vmatpush.msra.mxu1 %v391_v21  ;;  %v378_v32 = vld [vmem:[%s4831_s7 + $0xe0] sm:$0xff]  ;;  %v379_v33 = vld [vmem:[%s4831_s7 + $0xe8] sm:$0xff]  ;;  %v380_v34 = vld [vmem:[%s4831_s7 + $0xf0] sm:$0xff] }
  0x33   : > { %692 = vmatpush.msra.mxu2 %v392_v22  ;;  %805 = vmatpush.msra.mxu3 %v393_v23  ;;  %v381_v35 = vld [vmem:[%s4831_s7 + $0xf8] sm:$0xff]  ;;  %v374_v36 = vld [vmem:[%s4831_s7 + $0xc0] sm:$0xff]  ;;  %v375_v37 = vld [vmem:[%s4831_s7 + $0xc8] sm:$0xff] }
  0x34   : > { %467 = vmatpush.msra.mxu0 %v386_v24  ;;  %580 = vmatpush.msra.mxu1 %v387_v25  ;;  %v376_v38 = vld [vmem:[%s4831_s7 + $0xd0] sm:$0xff]  ;;  %v377_v39 = vld [vmem:[%s4831_s7 + $0xd8] sm:$0xff]  ;;  %v370_v40 = vld [vmem:[%s4831_s7 + $0xa0] sm:$0xff] }
  0x35   : > { %693 = vmatpush.msra.mxu2 %v388_v26  ;;  %806 = vmatpush.msra.mxu3 %v389_v27  ;;  %v371_v41 = vld [vmem:[%s4831_s7 + $0xa8] sm:$0xff]  ;;  %v372_v42 = vld [vmem:[%s4831_s7 + $0xb0] sm:$0xff]  ;;  %v373_v43 = vld [vmem:[%s4831_s7 + $0xb8] sm:$0xff] }
  0x36   : > { %468 = vmatpush.msra.mxu0 %v382_v28  ;;  %581 = vmatpush.msra.mxu1 %v383_v29  ;;  %v366_v44 = vld [vmem:[%s4831_s7 + $0x80] sm:$0xff]  ;;  %v367_v45 = vld [vmem:[%s4831_s7 + $0x88] sm:$0xff]  ;;  %v368_v46 = vld [vmem:[%s4831_s7 + $0x90] sm:$0xff] }
  0x37   : > { %694 = vmatpush.msra.mxu2 %v384_v30  ;;  %807 = vmatpush.msra.mxu3 %v385_v31  ;;  %v369_v47 = vld [vmem:[%s4831_s7 + $0x98] sm:$0xff]  ;;  %v362_v48 = vld [vmem:[%s4831_s7 + $0x60] sm:$0xff]  ;;  %v363_v49 = vld [vmem:[%s4831_s7 + $0x68] sm:$0xff] }
  0x38   : > { %469 = vmatpush.msra.mxu0 %v378_v32  ;;  %582 = vmatpush.msra.mxu1 %v379_v33  ;;  %v364_v50 = vld [vmem:[%s4831_s7 + $0x70] sm:$0xff]  ;;  %v365_v51 = vld [vmem:[%s4831_s7 + $0x78] sm:$0xff]  ;;  %v358_v52 = vld [vmem:[%s4831_s7 + $0x40] sm:$0xff] }
  0x39   : > { %695 = vmatpush.msra.mxu2 %v380_v34  ;;  %808 = vmatpush.msra.mxu3 %v381_v35  ;;  %v359_v53 = vld [vmem:[%s4831_s7 + $0x48] sm:$0xff]  ;;  %v360_v54 = vld [vmem:[%s4831_s7 + $0x50] sm:$0xff]  ;;  %v361_v55 = vld [vmem:[%s4831_s7 + $0x58] sm:$0xff] }
  0x3a   : > { %470 = vmatpush.msra.mxu0 %v374_v36  ;;  %583 = vmatpush.msra.mxu1 %v375_v37  ;;  %v354_v56 = vld [vmem:[%s4831_s7 + $0x20] sm:$0xff]  ;;  %v355_v57 = vld [vmem:[%s4831_s7 + $0x28] sm:$0xff]  ;;  %v356_v58 = vld [vmem:[%s4831_s7 + $0x30] sm:$0xff] }
  0x3b   : > { %696 = vmatpush.msra.mxu2 %v376_v38  ;;  %809 = vmatpush.msra.mxu3 %v377_v39  ;;  %v357_v59 = vld [vmem:[%s4831_s7 + $0x38] sm:$0xff]  ;;  %v350_v60 = vld [vmem:[%s4831_s7] sm:$0xff]  ;;  %v351_v61 = vld [vmem:[%s4831_s7 + $0x8] sm:$0xff] }
  0x3c   : > { %471 = vmatpush.msra.mxu0 %v370_v40  ;;  %584 = vmatpush.msra.mxu1 %v371_v41  ;;  %v352_v62 = vld [vmem:[%s4831_s7 + $0x10] sm:$0xff]  ;;  %v353_v63 = vld [vmem:[%s4831_s7 + $0x18] sm:$0xff]  ;;  %v4904_v0 = vld [vmem:[%s8383_s1] sm:$0xff] }
  0x3d   : > { %697 = vmatpush.msra.mxu2 %v372_v42  ;;  %810 = vmatpush.msra.mxu3 %v373_v43  ;;  %v913_v1 = vld [vmem:[%s8384_s2] sm:$0xff]  ;;  %v915_v2 = vld [vmem:[%s8384_s2 + $0x10] sm:$0xff]  ;;  %v4919_v4 = vld [vmem:[%s8383_s1 + $0x8] sm:$0xff] }
  0x3e   : > { %472 = vmatpush.msra.mxu0 %v366_v44  ;;  %585 = vmatpush.msra.mxu1 %v367_v45  ;;  %v914_v5 = vld [vmem:[%s8384_s2 + $0x8] sm:$0xff]  ;;  %v916_v6 = vld [vmem:[%s8384_s2 + $0x18] sm:$0xff]  ;;  %v4934_v7 = vld [vmem:[%s8383_s1 + $0x10] sm:$0xff] }
  0x3f   : > { %698 = vmatpush.msra.mxu2 %v368_v46  ;;  %811 = vmatpush.msra.mxu3 %v369_v47  ;;  %v4943_v8 = vld [vmem:[%s8383_s1 + $0x18] sm:$0xff]  ;;  %v919_v9 = vld [vmem:[%s8384_s2 + $0x30] sm:$0xff]  ;;  %v4955_v10 = vld [vmem:[%s8383_s1 + $0x20] sm:$0xff] }
  0x40   : > { %473 = vmatpush.msra.mxu0 %v362_v48  ;;  %586 = vmatpush.msra.mxu1 %v363_v49  ;;  %v917_v11 = vld [vmem:[%s8384_s2 + $0x20] sm:$0xff]  ;;  %v920_v12 = vld [vmem:[%s8384_s2 + $0x38] sm:$0xff]  ;;  %v4970_v13 = vld [vmem:[%s8383_s1 + $0x28] sm:$0xff] }
  0x41   : > { %699 = vmatpush.msra.mxu2 %v364_v50  ;;  %812 = vmatpush.msra.mxu3 %v365_v51  ;;  %v918_v14 = vld [vmem:[%s8384_s2 + $0x28] sm:$0xff]  ;;  %v4982_v15 = vld [vmem:[%s8383_s1 + $0x30] sm:$0xff]  ;;  %v421_v17 = vld [vmem:[%s8383_s1 + $0x38] sm:$0xff] }
  0x42   : > { %474 = vmatpush.msra.mxu0 %v358_v52  ;;  %587 = vmatpush.msra.mxu1 %v359_v53  ;;  %v922_v16 = vld [vmem:[%s8384_s2 + $0x48] sm:$0xff]  ;;  %v923_v18 = vld [vmem:[%s8384_s2 + $0x50] sm:$0xff]  ;;  %v422_v19 = vld [vmem:[%s8383_s1 + $0x40] sm:$0xff] }
  0x43   : > { %700 = vmatpush.msra.mxu2 %v360_v54  ;;  %813 = vmatpush.msra.mxu3 %v361_v55  ;;  %v921_v20 = vld [vmem:[%s8384_s2 + $0x40] sm:$0xff]  ;;  %v423_v21 = vld [vmem:[%s8383_s1 + $0x48] sm:$0xff]  ;;  %v424_v23 = vld [vmem:[%s8383_s1 + $0x50] sm:$0xff] }
  0x44   : > { %475 = vmatpush.msra.mxu0 %v354_v56  ;;  %588 = vmatpush.msra.mxu1 %v355_v57  ;;  %v925_v22 = vld [vmem:[%s8384_s2 + $0x60] sm:$0xff]  ;;  %v926_v24 = vld [vmem:[%s8384_s2 + $0x68] sm:$0xff]  ;;  %v5018_v25 = vld [vmem:[%s8383_s1 + $0x78] sm:$0xff] }
  0x45   : > { %701 = vmatpush.msra.mxu2 %v356_v58  ;;  %814 = vmatpush.msra.mxu3 %v357_v59  ;;  %v428_v26 = vld [vmem:[%s8383_s1 + $0x70] sm:$0xff]  ;;  %v425_v27 = vld [vmem:[%s8383_s1 + $0x58] sm:$0xff]  ;;  %v427_v28 = vld [vmem:[%s8383_s1 + $0x68] sm:$0xff] }
  0x46   : > { %476 = vmatpush.msra.mxu0 %v350_v60  ;;  %589 = vmatpush.msra.mxu1 %v351_v61  ;;  %v426_v29 = vld [vmem:[%s8383_s1 + $0x60] sm:$0xff]  ;;  %v924_v30 = vld [vmem:[%s8384_s2 + $0x58] sm:$0xff]  ;;  %v931_v33 = vld [vmem:[%s8384_s2 + $0x90] sm:$0xff] }
  0x47   : > { %702 = vmatpush.msra.mxu2 %v352_v62  ;;  %815 = vmatpush.msra.mxu3 %v353_v63  ;;  %v928_v31 = vld [vmem:[%s8384_s2 + $0x78] sm:$0xff]  ;;  %v929_v32 = vld [vmem:[%s8384_s2 + $0x80] sm:$0xff]  ;;  %v927_v34 = vld [vmem:[%s8384_s2 + $0x70] sm:$0xff] }
  0x48   : > { %477 = vmatmul.f32.vlgmr.msra.gmra.mxu0 %v4904_v0  ;;  %590 = vmatmul.f32.vlgmr.msra.gmra.mxu1 %v4904_v0  ;;  %v932_v35 = vld [vmem:[%s8384_s2 + $0x98] sm:$0xff]  ;;  %v934_v36 = vld [vmem:[%s8384_s2 + $0xa8] sm:$0xff]  ;;  %v5080_v39 = vld [vmem:[%s8383_s1 + $0x80] sm:$0xff] }
  0x49   : > { %703 = vmatmul.f32.vlgmr.msra.gmra.mxu2 %v4904_v0  ;;  %816 = vmatmul.f32.vlgmr.msra.gmra.mxu3 %v4904_v0  ;;  %v935_v40 = vld [vmem:[%s8384_s2 + $0xb0] sm:$0xff]  ;;  %v937_v41 = vld [vmem:[%s8384_s2 + $0xc0] sm:$0xff]  ;;  %v5103_v46 = vld [vmem:[%s8383_s1 + $0x88] sm:$0xff] }
  0x4a   : > { %4525 = vset.pattern.permute.xlu0 %v4708_v3  ;;  %4526 = vset.pattern.permute.xlu1 %v4708_v3  ;;  %v938_v47 = vld [vmem:[%s8384_s2 + $0xc8] sm:$0xff]  ;;  %v940_v48 = vld [vmem:[%s8384_s2 + $0xd8] sm:$0xff]  ;;  %v5126_v53 = vld [vmem:[%s8383_s1 + $0x90] sm:$0xff] }
  0x4b   : > { %1075 = vperm.xlu0 %4525, %v913_v1   ;;  %1085 = vperm.xlu1 %4526, %v915_v2   ;;  %v930_v54 = vld [vmem:[%s8384_s2 + $0x88] sm:$0xff]  ;;  %v941_v55 = vld [vmem:[%s8384_s2 + $0xe0] sm:$0xff]  ;;  %v943_v56 = vld [vmem:[%s8384_s2 + $0xf0] sm:$0xff] }
  0x4c   : > { %4527 = vset.pattern.permute.xlu2 %v4708_v3  ;;  %4243 = vmatpush.lsf.msrb.mxu0 %v5018_v25  ;;  %v5152_v61 = vld [vmem:[%s8383_s1 + $0x98] sm:$0xff]  ;;  %v933_v63 = vld [vmem:[%s8384_s2 + $0xa0] sm:$0xff] }
  0x4d   : > { %1095 = vperm.xlu2 %4527, %v917_v11   ;;  %4353 = vmatpush.lsf.msrb.mxu2 %v5018_v25  ;;  %v944_v62 = vld [vmem:[%s8384_s2 + $0xf8] sm:$0xff]  ;;  %v939_v11 = vld [vmem:[%s8384_s2 + $0xd0] sm:$0xff] }
  0x4e   : > { %4244 = vmatpush.lsf.msrb.mxu0 %v428_v26 }
  0x4f   : > { %4354 = vmatpush.lsf.msrb.mxu2 %v428_v26 }
  0x50   : > { %480 = vmatmul.f32.gmra.mxu0 %v4919_v4  ;;  %593 = vmatmul.f32.gmra.mxu1 %v4919_v4 }
  0x51   : > { %706 = vmatmul.f32.gmra.mxu2 %v4919_v4  ;;  %819 = vmatmul.f32.gmra.mxu3 %v4919_v4 }
  0x52   : > { %4245 = vmatpush.lsf.msrb.mxu0 %v427_v28  ;;  %4355 = vmatpush.lsf.msrb.mxu2 %v427_v28 }
  0x53   : > { %1080 = vperm.xlu0 %4525, %v914_v5   ;;  %1090 = vperm.xlu1 %4526, %v916_v6   ;;  %v936_v5 = vld [vmem:[%s8384_s2 + $0xb8] sm:$0xff] }
  0x54   : > { %4246 = vmatpush.lsf.msrb.mxu0 %v426_v29  ;;  %4356 = vmatpush.lsf.msrb.mxu2 %v426_v29 }
  0x55   : > { %1100 = vperm.xlu2 %4527, %v918_v14  }
  0x56   : > { %4247 = vmatpush.lsf.msrb.mxu0 %v425_v27  ;;  %4357 = vmatpush.lsf.msrb.mxu2 %v425_v27 }
  0x58   : > { %483 = vmatmul.f32.gmra.mxu0 %v4934_v7  ;;  %596 = vmatmul.f32.gmra.mxu1 %v4934_v7 }
  0x59   : > { %709 = vmatmul.f32.gmra.mxu2 %v4934_v7  ;;  %822 = vmatmul.f32.gmra.mxu3 %v4934_v7 }
  0x5a   : > { %4248 = vmatpush.lsf.msrb.mxu0 %v424_v23  ;;  %4358 = vmatpush.lsf.msrb.mxu2 %v424_v23 }
  0x5b   : > { %1105 = vperm.xlu0 %4525, %v919_v9   ;;  %1110 = vperm.xlu1 %4526, %v920_v12  }
  0x5c   : > { %4249 = vmatpush.lsf.msrb.mxu0 %v423_v21  ;;  %4359 = vmatpush.lsf.msrb.mxu2 %v423_v21 }
  0x5d   : > { %1115 = vperm.xlu2 %4527, %v921_v20  }
  0x5e   : > { %4250 = vmatpush.lsf.msrb.mxu0 %v422_v19  ;;  %4360 = vmatpush.lsf.msrb.mxu2 %v422_v19 }
  0x60   : > { %486 = vmatmul.f32.gmra.mxu0 %v4943_v8  ;;  %599 = vmatmul.f32.gmra.mxu1 %v4943_v8 }
  0x61   : > { %712 = vmatmul.f32.gmra.mxu2 %v4943_v8  ;;  %825 = vmatmul.f32.gmra.mxu3 %v4943_v8 }
  0x62   : > { %4251 = vmatpush.lsf.msrb.mxu0 %v421_v17  ;;  %4361 = vmatpush.lsf.msrb.mxu2 %v421_v17 }
  0x63   : > { %1120 = vperm.xlu0 %4525, %v922_v16   ;;  %1125 = vperm.xlu1 %4526, %v923_v18   ;;  %v5215_v16 = vld [vmem:[%s8383_s1 + $0xb0] sm:$0xff] }
  0x64   : > { %4252 = vmatpush.lsf.msrb.mxu0 %v4982_v15  ;;  %4362 = vmatpush.lsf.msrb.mxu2 %v4982_v15 }
  0x65   : > { %1130 = vperm.xlu2 %4527, %v924_v30  }
  0x66   : > { %4253 = vmatpush.lsf.msrb.mxu0 %v4970_v13  ;;  %4363 = vmatpush.lsf.msrb.mxu2 %v4970_v13 }
  0x68   : > { %489 = vmatmul.f32.gmra.mxu0 %v4955_v10  ;;  %602 = vmatmul.f32.gmra.mxu1 %v4955_v10 }
  0x69   : > { %715 = vmatmul.f32.gmra.mxu2 %v4955_v10  ;;  %828 = vmatmul.f32.gmra.mxu3 %v4955_v10 }
  0x6a   : > { %4254 = vmatpush.lsf.msrb.mxu0 %v4955_v10  ;;  %4364 = vmatpush.lsf.msrb.mxu2 %v4955_v10  ;;  %v5195_v10 = vld [vmem:[%s8383_s1 + $0xa8] sm:$0xff] }
  0x6b   : > { %1135 = vperm.xlu0 %4525, %v925_v22   ;;  %1140 = vperm.xlu1 %4526, %v926_v24   ;;  %v5235_v22 = vld [vmem:[%s8383_s1 + $0xb8] sm:$0xff] }
  0x6c   : > { %4255 = vmatpush.lsf.msrb.mxu0 %v4943_v8  ;;  %4365 = vmatpush.lsf.msrb.mxu2 %v4943_v8 }
  0x6d   : > { %1145 = vperm.xlu2 %4527, %v927_v34  }
  0x6e   : > { %4256 = vmatpush.lsf.msrb.mxu0 %v4934_v7  ;;  %4366 = vmatpush.lsf.msrb.mxu2 %v4934_v7 }
  0x70   : > { %492 = vmatmul.f32.gmra.mxu0 %v4970_v13  ;;  %605 = vmatmul.f32.gmra.mxu1 %v4970_v13 }
  0x71   : > { %718 = vmatmul.f32.gmra.mxu2 %v4970_v13  ;;  %831 = vmatmul.f32.gmra.mxu3 %v4970_v13 }
  0x72   : > { %4257 = vmatpush.lsf.msrb.mxu0 %v4919_v4  ;;  %4367 = vmatpush.lsf.msrb.mxu2 %v4919_v4  ;;  %v5175_v4 = vld [vmem:[%s8383_s1 + $0xa0] sm:$0xff] }
  0x73   : > { %1150 = vperm.xlu0 %4525, %v928_v31   ;;  %1155 = vperm.xlu1 %4526, %v929_v32   ;;  %v439_v32 = vld [vmem:[%s8383_s1 + $0xc8] sm:$0xff] }
  0x74   : > { %4258 = vmatpush.lsf.msrb.mxu0 %v4904_v0  ;;  %4368 = vmatpush.lsf.msrb.mxu2 %v4904_v0 }
  0x75   : > { %1160 = vperm.xlu2 %4527, %v930_v54  }
  0x78   : > { %495 = vmatmul.f32.gmra.mxu0 %v4982_v15  ;;  %608 = vmatmul.f32.gmra.mxu1 %v4982_v15 }
  0x79   : > { %721 = vmatmul.f32.gmra.mxu2 %v4982_v15  ;;  %834 = vmatmul.f32.gmra.mxu3 %v4982_v15 }
  0x7b   : > { %1165 = vperm.xlu0 %4525, %v931_v33   ;;  %1170 = vperm.xlu1 %4526, %v932_v35  }
  0x7d   : > { %1175 = vperm.xlu2 %4527, %v933_v63  }
  0x80   : > { %498 = vmatmul.f32.gmra.mxu0 %v421_v17  ;;  %611 = vmatmul.f32.gmra.mxu1 %v421_v17 }
  0x81   : > { %724 = vmatmul.f32.gmra.mxu2 %v421_v17  ;;  %837 = vmatmul.f32.gmra.mxu3 %v421_v17  ;;  %v942_v17 = vld [vmem:[%s8384_s2 + $0xe8] sm:$0xff] }
  0x83   : > { %1180 = vperm.xlu0 %4525, %v934_v36   ;;  %1185 = vperm.xlu1 %4526, %v935_v40   ;;  %v440_v40 = vld [vmem:[%s8383_s1 + $0xd0] sm:$0xff] }
  0x85   : > { %1190 = vperm.xlu2 %4527, %v936_v5  }
  0x88   : > { %501 = vmatmul.f32.gmra.mxu0 %v422_v19  ;;  %614 = vmatmul.f32.gmra.mxu1 %v422_v19 }
  0x89   : > { %727 = vmatmul.f32.gmra.mxu2 %v422_v19  ;;  %840 = vmatmul.f32.gmra.mxu3 %v422_v19 }
  0x8b   : > { %1195 = vperm.xlu0 %4525, %v937_v41   ;;  %1200 = vperm.xlu1 %4526, %v938_v47  }
  0x8d   : > { %1205 = vperm.xlu2 %4527, %v939_v11  }
  0x90   : > { %504 = vmatmul.f32.gmra.mxu0 %v423_v21  ;;  %617 = vmatmul.f32.gmra.mxu1 %v423_v21 }
  0x91   : > { %730 = vmatmul.f32.gmra.mxu2 %v423_v21  ;;  %843 = vmatmul.f32.gmra.mxu3 %v423_v21 }
  0x93   : > { %1210 = vperm.xlu0 %4525, %v940_v48   ;;  %1215 = vperm.xlu1 %4526, %v941_v55   ;;  %v441_v55 = vld [vmem:[%s8383_s1 + $0xd8] sm:$0xff] }
  0x95   : > { %1220 = vperm.xlu2 %4527, %v942_v17   ;;  %v442_v17 = vld [vmem:[%s8383_s1 + $0xe0] sm:$0xff] }
  0x98   : > { %507 = vmatmul.f32.gmra.mxu0 %v424_v23  ;;  %620 = vmatmul.f32.gmra.mxu1 %v424_v23 }
  0x99   : > { %733 = vmatmul.f32.gmra.mxu2 %v424_v23  ;;  %846 = vmatmul.f32.gmra.mxu3 %v424_v23 }
  0x9b   : > { %1225 = vperm.xlu0 %4525, %v943_v56   ;;  %1230 = vperm.xlu1 %4526, %v944_v62   ;;  %v445_v56 = vld [vmem:[%s8383_s1 + $0xf8] sm:$0xff]  ;;  %v444_v62 = vld [vmem:[%s8383_s1 + $0xf0] sm:$0xff] }
  0x9c   : > { %4298 = vmatpush.lsf.msrb.mxu1 %v445_v56  ;;  %4408 = vmatpush.lsf.msrb.mxu3 %v445_v56 }
  0x9e   : > { %4299 = vmatpush.lsf.msrb.mxu1 %v444_v62  ;;  %4409 = vmatpush.lsf.msrb.mxu3 %v444_v62 }
  0xa0   : > { %510 = vmatmul.f32.gmra.mxu0 %v425_v27  ;;  %623 = vmatmul.f32.gmra.mxu1 %v425_v27 }
  0xa1   : > { %736 = vmatmul.f32.gmra.mxu2 %v425_v27  ;;  %849 = vmatmul.f32.gmra.mxu3 %v425_v27  ;;  %v5252_v27 = vld [vmem:[%s8383_s1 + $0xc0] sm:$0xff] }
  0xa8   : > { %513 = vmatmul.f32.gmra.mxu0 %v426_v29  ;;  %626 = vmatmul.f32.gmra.mxu1 %v426_v29 }
  0xa9   : > { %739 = vmatmul.f32.gmra.mxu2 %v426_v29  ;;  %852 = vmatmul.f32.gmra.mxu3 %v426_v29 }
  0xb0   : > { %516 = vmatmul.f32.gmra.mxu0 %v427_v28  ;;  %629 = vmatmul.f32.gmra.mxu1 %v427_v28 }
  0xb1   : > { %742 = vmatmul.f32.gmra.mxu2 %v427_v28  ;;  %855 = vmatmul.f32.gmra.mxu3 %v427_v28 }
  0xb8   : > { %519 = vmatmul.f32.gmra.mxu0 %v428_v26  ;;  %632 = vmatmul.f32.gmra.mxu1 %v428_v26 }
  0xb9   : > { %745 = vmatmul.f32.gmra.mxu2 %v428_v26  ;;  %858 = vmatmul.f32.gmra.mxu3 %v428_v26 }
  0xc0   : > { %522 = vmatmul.f32.gmra.mxu0 %v5018_v25  ;;  %635 = vmatmul.f32.gmra.mxu1 %v5018_v25 }
  0xc1   : > { %748 = vmatmul.f32.gmra.mxu2 %v5018_v25  ;;  %861 = vmatmul.f32.gmra.mxu3 %v5018_v25 }
  0xc5   : > { %v5073_v37 = vpop.f32.mrf.mxu0  ;;  %v5075_v38 = vpop.f32.mrf.mxu1 }
  0xc7   : > { %4259 = vllmr.16.mxu0 }
  0xc8   : > { %4369 = vllmr.16.mxu2  ;;  %525 = vmatmul.f32.gmra.mxu0 %v5080_v39 }
  0xc9   : > { %638 = vmatmul.f32.gmra.mxu1 %v5080_v39  ;;  %751 = vmatmul.f32.gmra.mxu2 %v5080_v39 }
  0xca   : > { %864 = vmatmul.f32.gmra.mxu3 %v5080_v39 }
  0xcc   : > { %v5092_v42 = vpop.f32.mrf.mxu2  ;;  %v5094_v43 = vpop.f32.mrf.mxu3 }
  0xcd   : > { %v5096_v44 = vpop.f32.mrf.mxu0  ;;  %v5098_v45 = vpop.f32.mrf.mxu1 }
  0xd0   : > { %528 = vmatmul.f32.gmra.mxu0 %v5103_v46 }
  0xd1   : > { %641 = vmatmul.f32.gmra.mxu1 %v5103_v46  ;;  %754 = vmatmul.f32.gmra.mxu2 %v5103_v46 }
  0xd2   : > { %867 = vmatmul.f32.gmra.mxu3 %v5103_v46 }
  0xd4   : > { %v5115_v49 = vpop.f32.mrf.mxu2  ;;  %v5117_v50 = vpop.f32.mrf.mxu3 }
  0xd5   : > { %v5119_v51 = vpop.f32.mrf.mxu0  ;;  %v5121_v52 = vpop.f32.mrf.mxu1 }
  0xd8   : > { %531 = vmatmul.f32.gmra.mxu0 %v5126_v53 }
  0xd9   : > { %644 = vmatmul.f32.gmra.mxu1 %v5126_v53  ;;  %757 = vmatmul.f32.gmra.mxu2 %v5126_v53 }
  0xda   : > { %870 = vmatmul.f32.gmra.mxu3 %v5126_v53 }
  0xdc   : > { %v5141_v57 = vpop.f32.mrf.mxu2  ;;  %v5143_v58 = vpop.f32.mrf.mxu3 }
  0xdd   : > { %v5145_v59 = vpop.f32.mrf.mxu0  ;;  %v5147_v60 = vpop.f32.mrf.mxu1 }
  0xe0   : > { %534 = vmatmul.f32.gmra.mxu0 %v5152_v61 }
  0xe1   : > { %647 = vmatmul.f32.gmra.mxu1 %v5152_v61  ;;  %760 = vmatmul.f32.gmra.mxu2 %v5152_v61 }
  0xe2   : > { %873 = vmatmul.f32.gmra.mxu3 %v5152_v61 }
  0xe4   : > { %v5164_v0 = vpop.f32.mrf.mxu2  ;;  %v5166_v1 = vpop.f32.mrf.mxu3 }
  0xe5   : > { %v5168_v2 = vpop.f32.mrf.mxu0  ;;  %v5170_v3 = vpop.f32.mrf.mxu1 }
  0xe8   : > { %537 = vmatmul.f32.gmra.mxu0 %v5175_v4 }
  0xe9   : > { %650 = vmatmul.f32.gmra.mxu1 %v5175_v4  ;;  %763 = vmatmul.f32.gmra.mxu2 %v5175_v4 }
  0xea   : > { %876 = vmatmul.f32.gmra.mxu3 %v5175_v4 }
  0xec   : > { %v5184_v6 = vpop.f32.mrf.mxu2  ;;  %v5186_v7 = vpop.f32.mrf.mxu3 }
  0xed   : > { %v5188_v8 = vpop.f32.mrf.mxu0  ;;  %v5190_v9 = vpop.f32.mrf.mxu1 }
  0xf0   : > { %540 = vmatmul.f32.gmra.mxu0 %v5195_v10 }
  0xf1   : > { %653 = vmatmul.f32.gmra.mxu1 %v5195_v10  ;;  %766 = vmatmul.f32.gmra.mxu2 %v5195_v10 }
  0xf2   : > { %879 = vmatmul.f32.gmra.mxu3 %v5195_v10 }
  0xf4   : > { %v5204_v12 = vpop.f32.mrf.mxu2  ;;  %v5206_v13 = vpop.f32.mrf.mxu3 }
  0xf5   : > { %v5208_v14 = vpop.f32.mrf.mxu0  ;;  %v5210_v15 = vpop.f32.mrf.mxu1 }
  0xf8   : > { %543 = vmatmul.f32.gmra.mxu0 %v5215_v16 }
  0xf9   : > { %656 = vmatmul.f32.gmra.mxu1 %v5215_v16  ;;  %769 = vmatmul.f32.gmra.mxu2 %v5215_v16 }
  0xfa   : > { %882 = vmatmul.f32.gmra.mxu3 %v5215_v16 }
  0xfc   : > { %v5224_v18 = vpop.f32.mrf.mxu2  ;;  %v5226_v19 = vpop.f32.mrf.mxu3 }
  0xfd   : > { %v5228_v20 = vpop.f32.mrf.mxu0  ;;  %v5230_v21 = vpop.f32.mrf.mxu1 }
 0x100   : > { %546 = vmatmul.f32.gmra.mxu0 %v5235_v22 }
 0x101   : > { %659 = vmatmul.f32.gmra.mxu1 %v5235_v22  ;;  %772 = vmatmul.f32.gmra.mxu2 %v5235_v22 }
 0x102   : > { %885 = vmatmul.f32.gmra.mxu3 %v5235_v22 }
 0x104   : > { %v5241_v23 = vpop.f32.mrf.mxu2  ;;  %v5243_v24 = vpop.f32.mrf.mxu3 }
 0x105   : > { %v5245_v25 = vpop.f32.mrf.mxu0  ;;  %v5247_v26 = vpop.f32.mrf.mxu1 }
 0x108   : > { %549 = vmatmul.f32.gmra.mxu0 %v5252_v27 }
 0x109   : > { %662 = vmatmul.f32.gmra.mxu1 %v5252_v27  ;;  %775 = vmatmul.f32.gmra.mxu2 %v5252_v27 }
 0x10a   : > { %888 = vmatmul.f32.gmra.mxu3 %v5252_v27 }
 0x10c   : > { %v5258_v28 = vpop.f32.mrf.mxu2  ;;  %v5260_v29 = vpop.f32.mrf.mxu3 }
 0x10d   : > { %v5262_v30 = vpop.f32.mrf.mxu0  ;;  %v5264_v31 = vpop.f32.mrf.mxu1 }
 0x110   : > { %552 = vmatmul.f32.gmra.mxu0 %v439_v32 }
 0x111   : > { %665 = vmatmul.f32.gmra.mxu1 %v439_v32  ;;  %778 = vmatmul.f32.gmra.mxu2 %v439_v32 }
 0x112   : > { %891 = vmatmul.f32.gmra.mxu3 %v439_v32 }
 0x114   : > { %v5269_v33 = vpop.f32.mrf.mxu2  ;;  %v5271_v34 = vpop.f32.mrf.mxu3 }
 0x115   : > { %8686 = vst [vmem:[#allocation9_spill] sm:$0xff] %v5271_v34  ;;  %v5273_v35 = vpop.f32.mrf.mxu0  ;;  %v5275_v36 = vpop.f32.mrf.mxu1 }
 0x116   : > { %8687 = vst [vmem:[#allocation10_spill] sm:$0xff] %v5275_v36 }
 0x118   : > { %555 = vmatmul.f32.gmra.mxu0 %v440_v40 }
 0x119   : > { %668 = vmatmul.f32.gmra.mxu1 %v440_v40  ;;  %781 = vmatmul.f32.gmra.mxu2 %v440_v40 }
 0x11a   : > { %894 = vmatmul.f32.gmra.mxu3 %v440_v40 }
 0x11c   : > { %v5280_v41 = vpop.f32.mrf.mxu2  ;;  %v5282_v47 = vpop.f32.mrf.mxu3 }
 0x11d   : > { %8688 = vst [vmem:[#allocation11_spill] sm:$0xff] %v5280_v41  ;;  %v5284_v48 = vpop.f32.mrf.mxu0  ;;  %v5286_v54 = vpop.f32.mrf.mxu1 }
 0x11e   : > { %8689 = vst [vmem:[#allocation12_spill] sm:$0xff] %v5282_v47 }
 0x11f   : > { %8690 = vst [vmem:[#allocation13_spill] sm:$0xff] %v5286_v54  ;;  %v443_v54 = vld [vmem:[%s8383_s1 + $0xe8] sm:$0xff] }
 0x120   : > { %558 = vmatmul.f32.gmra.mxu0 %v441_v55  ;;  %4300 = vmatpush.lsf.msrb.mxu1 %v443_v54 }
 0x121   : > { %671 = vmatmul.f32.gmra.mxu1 %v441_v55  ;;  %784 = vmatmul.f32.gmra.mxu2 %v441_v55 }
 0x122   : > { %897 = vmatmul.f32.gmra.mxu3 %v441_v55  ;;  %4301 = vmatpush.lsf.msrb.mxu1 %v442_v17 }
 0x123   : > { %4410 = vmatpush.lsf.msrb.mxu3 %v443_v54 }
 0x124   : > { %v5297_v63 = vpop.f32.mrf.mxu2  ;;  %v5309_v47 = vpop.f32.mrf.mxu3  ;;  %4302 = vmatpush.lsf.msrb.mxu1 %v441_v55 }
 0x125   : > { %8691 = vst [vmem:[#allocation14_spill] sm:$0xff] %v5297_v63  ;;  %v5299_v5 = vpop.f32.mrf.mxu0  ;;  %v5301_v11 = vpop.f32.mrf.mxu1  ;;  %4411 = vmatpush.lsf.msrb.mxu3 %v442_v17 }
 0x126   : > { %8692 = vst [vmem:[#allocation15_spill] sm:$0xff] %v5301_v11  ;;  %4303 = vmatpush.lsf.msrb.mxu1 %v440_v40 }
 0x127   : > { %8693 = vst [vmem:[#allocation16_spill] sm:$0xff] %v5309_v47  ;;  %4412 = vmatpush.lsf.msrb.mxu3 %v441_v55 }
 0x128   : > { %561 = vmatmul.f32.gmra.mxu0 %v442_v17  ;;  %4304 = vmatpush.lsf.msrb.mxu1 %v439_v32 }
 0x129   : > { %674 = vmatmul.f32.gmra.mxu1 %v442_v17  ;;  %787 = vmatmul.f32.gmra.mxu2 %v442_v17 }
 0x12a   : > { %900 = vmatmul.f32.gmra.mxu3 %v442_v17  ;;  %4305 = vmatpush.lsf.msrb.mxu1 %v5252_v27 }
 0x12b   : > { %4413 = vmatpush.lsf.msrb.mxu3 %v440_v40 }
 0x12c   : > { %v5311_v63 = vpop.f32.mrf.mxu2  ;;  %v5317_v41 = vpop.f32.mrf.mxu3  ;;  %4306 = vmatpush.lsf.msrb.mxu1 %v5235_v22 }
 0x12d   : > { %8694 = vst [vmem:[#allocation17_spill] sm:$0xff] %v5311_v63  ;;  %v5313_v11 = vpop.f32.mrf.mxu0  ;;  %v5315_v36 = vpop.f32.mrf.mxu1  ;;  %4414 = vmatpush.lsf.msrb.mxu3 %v439_v32 }
 0x12e   : > { %8695 = vst [vmem:[#allocation18_spill] sm:$0xff] %v5315_v36  ;;  %4307 = vmatpush.lsf.msrb.mxu1 %v5215_v16 }
 0x12f   : > { %8696 = vst [vmem:[#allocation19_spill] sm:$0xff] %v5317_v41  ;;  %4415 = vmatpush.lsf.msrb.mxu3 %v5252_v27 }
 0x130   : > { %564 = vmatmul.f32.gmra.mxu0 %v443_v54  ;;  %4308 = vmatpush.lsf.msrb.mxu1 %v5195_v10 }
 0x131   : > { %677 = vmatmul.f32.gmra.mxu1 %v443_v54  ;;  %790 = vmatmul.f32.gmra.mxu2 %v443_v54 }
 0x132   : > { %903 = vmatmul.f32.gmra.mxu3 %v443_v54  ;;  %4309 = vmatpush.lsf.msrb.mxu1 %v5175_v4 }
 0x133   : > { %4416 = vmatpush.lsf.msrb.mxu3 %v5235_v22 }
 0x134   : > { %v5319_v47 = vpop.f32.mrf.mxu2  ;;  %v5329_v40 = vpop.f32.mrf.mxu3  ;;  %4310 = vmatpush.lsf.msrb.mxu1 %v5152_v61 }
 0x135   : > { %8697 = vst [vmem:[#allocation20_spill] sm:$0xff] %v5319_v47  ;;  %v5323_v55 = vpop.f32.mrf.mxu0  ;;  %v5325_v17 = vpop.f32.mrf.mxu1  ;;  %4417 = vmatpush.lsf.msrb.mxu3 %v5215_v16 }
 0x136   : > { %8698 = vst [vmem:[#allocation21_spill] sm:$0xff] %v5325_v17  ;;  %4311 = vmatpush.lsf.msrb.mxu1 %v5126_v53  ;;  %v5383_v17 = vpop.permute.xlu1 %1085 }
 0x137   : > { %8699 = vst [vmem:[#allocation22_spill] sm:$0xff] %v5329_v40  ;;  %4418 = vmatpush.lsf.msrb.mxu3 %v5195_v10 }
 0x138   : > { %567 = vmatmul.f32.gmra.mxu0 %v444_v62  ;;  %4312 = vmatpush.lsf.msrb.mxu1 %v5103_v46 }
 0x139   : > { %680 = vmatmul.f32.gmra.mxu1 %v444_v62  ;;  %793 = vmatmul.f32.gmra.mxu2 %v444_v62 }
 0x13a   : > { %906 = vmatmul.f32.gmra.mxu3 %v444_v62  ;;  %4313 = vmatpush.lsf.msrb.mxu1 %v5080_v39 }
 0x13b   : > { %4419 = vmatpush.lsf.msrb.mxu3 %v5175_v4 }
 0x13c   : > { %v5333_v32 = vpop.f32.mrf.mxu2  ;;  %v5345_v16 = vpop.f32.mrf.mxu3 }
 0x13d   : > { %8700 = vst [vmem:[#allocation23_spill] sm:$0xff] %v5333_v32  ;;  %v5337_v27 = vpop.f32.mrf.mxu0  ;;  %v5339_v54 = vpop.f32.mrf.mxu1  ;;  %4420 = vmatpush.lsf.msrb.mxu3 %v5152_v61 }
 0x13e   : > { %8701 = vst [vmem:[#allocation24_spill] sm:$0xff] %v5337_v27  ;;  %v5395_v47 = vpop.permute.xlu1 %1090 }
 0x13f   : > { %8702 = vst [vmem:[#allocation25_spill] sm:$0xff] %v5339_v54  ;;  %4421 = vmatpush.lsf.msrb.mxu3 %v5126_v53 }
 0x140   : > { %570 = vmatmul.f32.gmra.mxu0 %v445_v56  ;;  %8703 = vst [vmem:[#allocation26_spill] sm:$0xff] %v5345_v16 }
 0x141   : > { %683 = vmatmul.f32.gmra.mxu1 %v445_v56  ;;  %796 = vmatmul.f32.gmra.mxu2 %v445_v56 }
 0x142   : > { %909 = vmatmul.f32.gmra.mxu3 %v445_v56 }
 0x143   : > { %4422 = vmatpush.lsf.msrb.mxu3 %v5103_v46 }
 0x144   : > { %v5347_v22 = vpop.f32.mrf.mxu2  ;;  %v5365_v53 = vpop.f32.mrf.mxu3 }
 0x145   : > { %8704 = vst [vmem:[#allocation27_spill] sm:$0xff] %v5347_v22  ;;  %v5351_v10 = vpop.f32.mrf.mxu0  ;;  %4423 = vmatpush.lsf.msrb.mxu3 %v5080_v39 }
 0x146   : > { %8705 = vst [vmem:[#allocation28_spill] sm:$0xff] %v5351_v10  ;;  %v5353_v62 = vpop.f32.mrf.mxu1 }
 0x147   : > { %8706 = vst [vmem:[#allocation29_spill] sm:$0xff] %v5353_v62 }
 0x148   : > { %4314 = vllmr.16.mxu1  ;;  %8710 = vst [vmem:[#allocation33_spill] sm:$0xff] %v5365_v53 }
 0x149   : > { %4424 = vllmr.16.mxu3 }
 0x14c   : > { %v5359_v61 = vpop.f32.mrf.mxu2 }
 0x14d   : > { %8707 = vst [vmem:[#allocation30_spill] sm:$0xff] %v5359_v61  ;;  %v5361_v4 = vpop.f32.mrf.mxu0  ;;  %v5373_v46 = vpop.f32.mrf.mxu3 }
 0x14e   : > { %8708 = vst [vmem:[#allocation31_spill] sm:$0xff] %v5361_v4  ;;  %v5363_v56 = vpop.f32.mrf.mxu1  ;;  %v5381_v61 = vpop.permute.xlu0 %1075 }
 0x14f   : > { %8709 = vst [vmem:[#allocation32_spill] sm:$0xff] %v5363_v56 }
 0x150   : > { %8714 = vst [vmem:[#allocation37_spill] sm:$0xff] %v5373_v46 }
 0x154   : > { %v5371_v32 = vpop.f32.mrf.mxu2 }
 0x155   : > { %v5367_v22 = vpop.f32.mrf.mxu0  ;;  %8713 = vst [vmem:[#allocation36_spill] sm:$0xff] %v5371_v32  ;;  %v5385_v56 = vpop.f32.mrf.mxu3 }
 0x156   : > { %8711 = vst [vmem:[#allocation34_spill] sm:$0xff] %v5367_v22  ;;  %v5369_v16 = vpop.f32.mrf.mxu1  ;;  %v1081_v46 = vpop.permute.xlu0 %1080 }
 0x157   : > { %8712 = vst [vmem:[#allocation35_spill] sm:$0xff] %v5369_v16  ;;  %v5391_v16 = vpop.permute.xlu2 %1095 }
 0x158   : > { %8718 = vst [vmem:[#allocation41_spill] sm:$0xff] %v5385_v56 }
 0x15c   : > { %v5379_v54 = vpop.f32.mrf.mxu2 }
 0x15d   : > { %v5375_v62 = vpop.f32.mrf.mxu0  ;;  %8717 = vst [vmem:[#allocation40_spill] sm:$0xff] %v5379_v54 }
 0x15e   : > { %8715 = vst [vmem:[#allocation38_spill] sm:$0xff] %v5375_v62  ;;  %v5377_v39 = vpop.f32.mrf.mxu1  ;;  %v5405_v56 = vpop.permute.xlu0 %1105  ;;  %v947_v62 = vmul.f32 2.0, %v5092_v42 }
 0x15f   : > { %8716 = vst [vmem:[#allocation39_spill] sm:$0xff] %v5377_v39  ;;  %v5397_v39 = vpop.f32.mrf.mxu3  ;;  %v5403_v41 = vpop.permute.xlu2 %1100 }
 0x160   : > { %8722 = vst [vmem:[#allocation45_spill] sm:$0xff] %v5397_v39  ;;  %v951_v39 = vmul.f32 2.0, %v5115_v49  ;;  %v5424_v10 = vsub.f32 %v5381_v61, %v947_v62  ;;  %v949_v62 = vmul.f32 2.0, %v5096_v44 }
 0x162   : > { %8729 = vst [vmem:[#allocation52_spill] sm:$0xff] %v5424_v10 }
 0x164   : > { %v5393_v32 = vpop.f32.mrf.mxu2 }
 0x165   : > { %v5387_v53 = vpop.f32.mrf.mxu0  ;;  %8721 = vst [vmem:[#allocation44_spill] sm:$0xff] %v5393_v32 }
 0x166   : > { %8719 = vst [vmem:[#allocation42_spill] sm:$0xff] %v5387_v53  ;;  %v5389_v40 = vpop.f32.mrf.mxu1  ;;  %v5407_v53 = vpop.permute.xlu1 %1110 }
 0x167   : > { %8720 = vst [vmem:[#allocation43_spill] sm:$0xff] %v5389_v40  ;;  %v5417_v22 = vpop.f32.mrf.mxu3  ;;  %v5421_v4 = vpop.permute.xlu2 %1115 }
 0x168   : > { %8728 = vst [vmem:[#allocation51_spill] sm:$0xff] %v5417_v22 }
 0x16c   : > { %v5409_v40 = vpop.f32.mrf.mxu2 }
 0x16d   : > { %v5399_v54 = vpop.f32.mrf.mxu0  ;;  %8725 = vst [vmem:[#allocation48_spill] sm:$0xff] %v5409_v40  ;;  %v5426_v40 = vsub.f32 %v1081_v46, %v951_v39 }
 0x16e   : > { %8723 = vst [vmem:[#allocation46_spill] sm:$0xff] %v5399_v54  ;;  %v5401_v36 = vpop.f32.mrf.mxu1  ;;  %v952_v54 = vmul.f32 2.0, %v5117_v50  ;;  %v5431_v42 = vpop.permute.xlu1 %1125 }
 0x16f   : > { %8724 = vst [vmem:[#allocation47_spill] sm:$0xff] %v5401_v36  ;;  %v948_v36 = vmul.f32 2.0, %v5094_v43  ;;  %v956_v43 = vmul.f32 2.0, %v5143_v58  ;;  %v953_v58 = vmul.f32 2.0, %v5119_v51  ;;  %v946_v51 = vmul.f32 2.0, %v5075_v38 }
 0x170   : > { %8730 = vst [vmem:[#allocation53_spill] sm:$0xff] %v5426_v40  ;;  %v5436_v22 = vsub.f32 %v1081_v46, %v952_v54  ;;  %v945_v54 = vmul.f32 2.0, %v5073_v37  ;;  %v5466_v37 = vpop.permute.xlu2 %1130 }
 0x171   : > { %v5434_v49 = vsub.f32 %v5381_v61, %v948_v36  ;;  %v959_v36 = vmul.f32 2.0, %v5164_v0  ;;  %v5458_v44 = vsub.f32 %v5383_v17, %v956_v43  ;;  %v957_v0 = vmul.f32 2.0, %v5145_v59 }
 0x172   : > { %8732 = vst [vmem:[#allocation55_spill] sm:$0xff] %v5436_v22  ;;  %v963_v43 = vmul.f32 2.0, %v5184_v6  ;;  %v5481_v59 = vsub.f32 %v5383_v17, %v953_v58 }
 0x173   : > { %8731 = vst [vmem:[#allocation54_spill] sm:$0xff] %v5434_v49  ;;  %v5501_v58 = vsub.f32 %v5395_v47, %v957_v0 }
 0x174   : > { %v5444_v39 = vpop.f32.mrf.mxu2  ;;  %8737 = vst [vmem:[#allocation60_spill] sm:$0xff] %v5458_v44 }
 0x175   : > { %v5411_v63 = vpop.f32.mrf.mxu0  ;;  %8735 = vst [vmem:[#allocation58_spill] sm:$0xff] %v5444_v39  ;;  %v960_v39 = vmul.f32 2.0, %v5166_v1  ;;  %v5477_v1 = vsub.f32 %v5381_v61, %v945_v54 }
 0x176   : > { %8726 = vst [vmem:[#allocation49_spill] sm:$0xff] %v5411_v63  ;;  %v5413_v32 = vpop.f32.mrf.mxu1  ;;  %v955_v63 = vmul.f32 2.0, %v5141_v57  ;;  %v1435_v57 = vmin.f32 %v5424_v10, %v5426_v40  ;;  %v5461_v40 = vpop.f32.mrf.mxu3  ;;  %v5463_v10 = vsub.f32 %v1081_v46, %v949_v62  ;;  %v954_v62 = vmul.f32 2.0, %v5121_v52 }
 0x177   : > { %8727 = vst [vmem:[#allocation50_spill] sm:$0xff] %v5413_v32  ;;  %v5429_v32 = vpop.permute.xlu0 %1120  ;;  %v5484_v38 = vpop.permute.xlu1 %1140  ;;  %v5490_v6 = vsub.f32 %v5395_v47, %v960_v39  ;;  %v967_v39 = vmul.f32 2.0, %v5204_v12  ;;  %v968_v12 = vmul.f32 2.0, %v5206_v13  ;;  %v971_v13 = vmul.f32 2.0, %v5224_v18 }
 0x178   : > { %v5449_v34 = vsub.f32 %v5383_v17, %v955_v63  ;;  %8738 = vst [vmem:[#allocation61_spill] sm:$0xff] %v5461_v40  ;;  %v961_v63 = vmul.f32 2.0, %v5168_v2  ;;  %v1361_v52 = vmin.f32 %v5477_v1, %v5463_v10  ;;  %v958_v2 = vmul.f32 2.0, %v5147_v60 }
 0x179   : > { %8739 = vst [vmem:[#allocation62_spill] sm:$0xff] %v5463_v10  ;;  %v5560_v18 = vsub.f32 %v5403_v41, %v968_v12 }
 0x17a   : > { %8736 = vst [vmem:[#allocation59_spill] sm:$0xff] %v5449_v34  ;;  %v1362_v60 = vmin.f32 %v1361_v52, %v5481_v59  ;;  %v5517_v0 = vsub.f32 %v5391_v16, %v961_v63  ;;  %v962_v52 = vmul.f32 2.0, %v5170_v3  ;;  %v977_v3 = vmul.f32 2.0, %v5245_v25 }
 0x17b   : > { %8742 = vst [vmem:[#allocation65_spill] sm:$0xff] %v5490_v6 }
 0x17c   : > { %v5520_v10 = vpop.f32.mrf.mxu2  ;;  %v1363_v63 = vmin.f32 %v1362_v60, %v5501_v58  ;;  %8751 = vst [vmem:[#allocation74_spill] sm:$0xff] %v5560_v18 }
 0x17d   : > { %v5439_v50 = vpop.f32.mrf.mxu0 }
 0x17e   : > { %8733 = vst [vmem:[#allocation56_spill] sm:$0xff] %v5439_v50  ;;  %v5441_v27 = vpop.f32.mrf.mxu1  ;;  %v950_v50 = vmul.f32 2.0, %v5098_v45  ;;  %v1436_v45 = vmin.f32 %v1435_v57, %v5449_v34  ;;  %v964_v34 = vmul.f32 2.0, %v5186_v7  ;;  %v5509_v7 = vsub.f32 %v5391_v16, %v963_v43 }
 0x17f   : > { %8734 = vst [vmem:[#allocation57_spill] sm:$0xff] %v5441_v27  ;;  %v1472_v27 = vmin.f32 %v5434_v49, %v5436_v22  ;;  %v5471_v22 = vsub.f32 %v5395_v47, %v959_v36  ;;  %v5474_v49 = vpop.permute.xlu0 %1135  ;;  %v1364_v60 = vmin.f32 %v1363_v63, %v5517_v0 }
 0x180   : > { %v5486_v57 = vsub.f32 %v1081_v46, %v950_v50  ;;  %v965_v46 = vmul.f32 2.0, %v5188_v8  ;;  %8744 = vst [vmem:[#allocation67_spill] sm:$0xff] %v5509_v7  ;;  %v969_v8 = vmul.f32 2.0, %v5208_v14  ;;  %v973_v14 = vmul.f32 2.0, %v5228_v20 }
 0x181   : > { %8740 = vst [vmem:[#allocation63_spill] sm:$0xff] %v5471_v22  ;;  %v1473_v36 = vmin.f32 %v1472_v27, %v5458_v44  ;;  %v5505_v27 = vsub.f32 %v5381_v61, %v946_v51  ;;  %v1437_v50 = vmin.f32 %v1436_v45, %v5471_v22  ;;  %v5513_v44 = vsub.f32 %v5383_v17, %v954_v62  ;;  %v5537_v62 = vpop.permute.xlu2 %1145 }
 0x182   : > { %8741 = vst [vmem:[#allocation64_spill] sm:$0xff] %v5486_v57  ;;  %v5526_v45 = vsub.f32 %v5391_v16, %v964_v34  ;;  %v5530_v17 = vsub.f32 %v5395_v47, %v958_v2  ;;  %v5534_v43 = vsub.f32 %v5403_v41, %v965_v46  ;;  %v5542_v34 = vsub.f32 %v5403_v41, %v967_v39  ;;  %v5547_v2 = vpop.f32.mrf.mxu3 }
 0x183   : > { %8743 = vst [vmem:[#allocation66_spill] sm:$0xff] %v5505_v27  ;;  %v1398_v61 = vmin.f32 %v5505_v27, %v5486_v57  ;;  %v1474_v51 = vmin.f32 %v1473_v36, %v5490_v6  ;;  %v1438_v36 = vmin.f32 %v1437_v50, %v5509_v7  ;;  %v5552_v20 = vsub.f32 %v5405_v56, %v969_v8  ;;  %v5555_v6 = vpop.permute.xlu1 %1155 }
 0x184   : > { %8745 = vst [vmem:[#allocation68_spill] sm:$0xff] %v5513_v44  ;;  %v966_v39 = vmul.f32 2.0, %v5190_v9  ;;  %v972_v7 = vmul.f32 2.0, %v5226_v19  ;;  %v1365_v63 = vmin.f32 %v1364_v60, %v5534_v43  ;;  %v5570_v25 = vsub.f32 %v5407_v53, %v973_v14 }
 0x185   : > { %v5493_v54 = vpop.f32.mrf.mxu0  ;;  %8746 = vst [vmem:[#allocation69_spill] sm:$0xff] %v5526_v45  ;;  %v1399_v46 = vmin.f32 %v1398_v61, %v5513_v44  ;;  %v1475_v50 = vmin.f32 %v1474_v51, %v5526_v45  ;;  %v981_v51 = vmul.f32 2.0, %v5262_v30  ;;  %v5574_v9 = vsub.f32 %v5391_v16, %v962_v52 }
 0x186   : > { %v5495_v40 = vpop.f32.mrf.mxu1  ;;  %8747 = vst [vmem:[#allocation70_spill] sm:$0xff] %v5530_v17  ;;  %v1439_v12 = vmin.f32 %v1438_v36, %v5542_v34  ;;  %v5578_v19 = vsub.f32 %v5405_v56, %v971_v13  ;;  %v975_v45 = vmul.f32 2.0, %v5241_v23  ;;  %v970_v44 = vmul.f32 2.0, %v5210_v15 }
 0x187   : > { %8748 = vst [vmem:[#allocation71_spill] sm:$0xff] %v5534_v43  ;;  %v5545_v47 = vpop.permute.xlu0 %1150  ;;  %v1400_v8 = vmin.f32 %v1399_v46, %v5530_v17  ;;  %v1366_v46 = vmin.f32 %v1365_v63, %v5552_v20  ;;  %v5584_v60 = vsub.f32 %v5421_v4, %v977_v3  ;;  %v985_v14 = vmul.f32 2.0, %v5273_v35  ;;  %v5601_v35 = vpop.f32.mrf.mxu2 }
 0x188   : > { %8749 = vst [vmem:[#allocation72_spill] sm:$0xff] %v5542_v34  ;;  %v5588_v30 = vsub.f32 %v5403_v41, %v966_v39  ;;  %v1476_v16 = vmin.f32 %v1475_v50, %v5560_v18  ;;  %v5592_v52 = vsub.f32 %v5405_v56, %v972_v7  ;;  %v976_v36 = vmul.f32 2.0, %v5243_v24 }
 0x189   : > { %8750 = vst [vmem:[#allocation73_spill] sm:$0xff] %v5552_v20  ;;  %v974_v23 = vmul.f32 2.0, %v5230_v21  ;;  %v1367_v15 = vmin.f32 %v1366_v46, %v5570_v25  ;;  %v5598_v13 = vsub.f32 %v5429_v32, %v981_v51  ;;  %v989_v3 = vmul.f32 2.0, %v5284_v48  ;;  %v5611_v21 = vpop.permute.xlu2 %1160 }
 0x18a   : > { %8752 = vst [vmem:[#allocation75_spill] sm:$0xff] %v5570_v25  ;;  %v1401_v41 = vmin.f32 %v1400_v8, %v5574_v9  ;;  %v1440_v50 = vmin.f32 %v1439_v12, %v5578_v19  ;;  %v5606_v7 = vsub.f32 %v5407_v53, %v975_v45  ;;  %v979_v24 = vmul.f32 2.0, %v5258_v28  ;;  %v5627_v18 = vpop.f32.mrf.mxu3 }
 0x18b   : > { %8753 = vst [vmem:[#allocation76_spill] sm:$0xff] %v5574_v9  ;;  %v5614_v63 = vsub.f32 %v5405_v56, %v970_v44  ;;  %v1368_v48 = vmin.f32 %v1367_v15, %v5584_v60  ;;  %v5618_v51 = vsub.f32 %v5431_v42, %v985_v14  ;;  %v993_v8 = vmul.f32 2.0, %v5299_v5 }
 0x18c   : > { %8754 = vst [vmem:[#allocation77_spill] sm:$0xff] %v5578_v19  ;;  %v1402_v12 = vmin.f32 %v1401_v41, %v5588_v30  ;;  %v1477_v45 = vmin.f32 %v1476_v16, %v5592_v52  ;;  %v5624_v28 = vsub.f32 %v5407_v53, %v976_v36  ;;  %v980_v46 = vmul.f32 2.0, %v5260_v29 }
 0x18d   : > { %v5563_v22 = vpop.f32.mrf.mxu0  ;;  %8755 = vst [vmem:[#allocation78_spill] sm:$0xff] %v5584_v60  ;;  %v5632_v44 = vsub.f32 %v5407_v53, %v974_v23  ;;  %v1369_v14 = vmin.f32 %v1368_v48, %v5598_v13  ;;  %v5636_v5 = vsub.f32 %v5466_v37, %v989_v3  ;;  %v997_v15 = vmul.f32 2.0, %v5313_v11  ;;  %v5647_v53 = vpop.permute.xlu1 %1170 }
 0x18e   : > { %v5565_v61 = vpop.f32.mrf.mxu1  ;;  %8756 = vst [vmem:[#allocation79_spill] sm:$0xff] %v5588_v30  ;;  %v1441_v36 = vmin.f32 %v1440_v50, %v5606_v7  ;;  %v978_v29 = vmul.f32 2.0, %v5247_v26  ;;  %v5644_v41 = vsub.f32 %v5421_v4, %v979_v24  ;;  %v1403_v23 = vmin.f32 %v1402_v12, %v5614_v63 }
 0x18f   : > { %8757 = vst [vmem:[#allocation80_spill] sm:$0xff] %v5592_v52  ;;  %v5609_v39 = vpop.permute.xlu0 %1165  ;;  %v983_v52 = vmul.f32 2.0, %v5269_v33  ;;  %v1370_v3 = vmin.f32 %v1369_v14, %v5618_v51  ;;  %v5652_v48 = vsub.f32 %v5474_v49, %v993_v8  ;;  %v1001_v11 = vmul.f32 2.0, %v5323_v55  ;;  %v8770_v8 = vld [vmem:[#allocation24_spill] sm:$0xff] }
 0x190   : > { %8758 = vst [vmem:[#allocation81_spill] sm:$0xff] %v5598_v13  ;;  %v1478_v50 = vmin.f32 %v1477_v45, %v5624_v28  ;;  %v5657_v26 = vsub.f32 %v5421_v4, %v980_v46  ;;  %v982_v24 = vmul.f32 2.0, %v5264_v31  ;;  %v1404_v19 = vmin.f32 %v1403_v23, %v5632_v44  ;;  %v8773_v31 = vld [vmem:[#allocation11_spill] sm:$0xff]  ;;  %v8774_v23 = vld [vmem:[#allocation10_spill] sm:$0xff] }
 0x191   : > { %8759 = vst [vmem:[#allocation82_spill] sm:$0xff] %v5606_v7  ;;  %v8768_v7 = vld [vmem:[#allocation9_spill] sm:$0xff]  ;;  %v1371_v12 = vmin.f32 %v1370_v3, %v5636_v5  ;;  %v5664_v14 = vsub.f32 %v5484_v38, %v997_v15  ;;  %v1005_v34 = vmul.f32 2.0, %v8770_v8  ;;  %v5668_v55 = vsub.f32 %v5421_v4, %v978_v29  ;;  %v8776_v8 = vld [vmem:[#allocation28_spill] sm:$0xff]  ;;  %v5683_v4 = vpop.f32.mrf.mxu2 }
 0x192   : > { %8760 = vst [vmem:[#allocation83_spill] sm:$0xff] %v5614_v63  ;;  %v984_v33 = vmul.f32 2.0, %v8768_v7  ;;  %v1442_v45 = vmin.f32 %v1441_v36, %v5644_v41  ;;  %v5672_v46 = vsub.f32 %v5429_v32, %v983_v52  ;;  %v5675_v7 = vpop.permute.xlu2 %1175  ;;  %v5680_v15 = vsub.f32 %v5537_v62, %v1001_v11  ;;  %v8780_v11 = vld [vmem:[#allocation13_spill] sm:$0xff] }
 0x193   : > { %8761 = vst [vmem:[#allocation84_spill] sm:$0xff] %v5618_v51  ;;  %v1372_v3 = vmin.f32 %v1371_v12, %v5652_v48  ;;  %v1009_v63 = vmul.f32 2.0, %v8776_v8  ;;  %v1479_v36 = vmin.f32 %v1478_v50, %v5657_v26  ;;  %v5687_v52 = vsub.f32 %v5429_v32, %v982_v24  ;;  %v8782_v50 = vld [vmem:[#allocation31_spill] sm:$0xff]  ;;  %v8811_v51 = vld [vmem:[#allocation21_spill] sm:$0xff] }
 0x194   : > { %8762 = vst [vmem:[#allocation85_spill] sm:$0xff] %v5624_v28  ;;  %v987_v28 = vmul.f32 2.0, %v8773_v31  ;;  %v5690_v29 = vsub.f32 %v5429_v32, %v984_v33  ;;  %v8779_v31 = vld [vmem:[#allocation12_spill] sm:$0xff]  ;;  %v990_v30 = vmul.f32 2.0, %v8780_v11  ;;  %v5700_v9 = vsub.f32 %v5545_v47, %v1005_v34 }
 0x195   : > { %v5629_v56 = vpop.f32.mrf.mxu0  ;;  %8763 = vst [vmem:[#allocation86_spill] sm:$0xff] %v5632_v44  ;;  %v986_v44 = vmul.f32 2.0, %v8774_v23  ;;  %v1373_v8 = vmin.f32 %v1372_v3, %v5664_v14  ;;  %v1405_v24 = vmin.f32 %v1404_v19, %v5668_v55  ;;  %v1443_v32 = vmin.f32 %v1442_v45, %v5672_v46 }
 0x196   : > { %8764 = vst [vmem:[#allocation87_spill] sm:$0xff] %v5636_v5  ;;  %v5639_v16 = vpop.f32.mrf.mxu1  ;;  %v5706_v33 = vsub.f32 %v5431_v42, %v987_v28  ;;  %v5716_v34 = vsub.f32 %v5555_v6, %v1009_v63  ;;  %v1480_v28 = vmin.f32 %v1479_v36, %v5690_v29  ;;  %v8798_v57 = vlaneseq }
 0x197   : > { %8765 = vst [vmem:[#allocation88_spill] sm:$0xff] %v5644_v41  ;;  %v988_v41 = vmul.f32 2.0, %v8779_v31  ;;  %v5693_v23 = vpop.permute.xlu0 %1180  ;;  %v8784_v31 = vld [vmem:[#allocation14_spill] sm:$0xff]  ;;  %v5712_v11 = vsub.f32 %v5431_v42, %v986_v44  ;;  %v1374_v3 = vmin.f32 %v1373_v8, %v5680_v15  ;;  %v1406_v45 = vmin.f32 %v1405_v24, %v5687_v52  ;;  %v5727_v44 = vpop.permute.xlu1 %1185 }
 0x198   : > { %8766 = vst [vmem:[#allocation89_spill] sm:$0xff] %v5652_v48  ;;  %v991_v17 = vmul.f32 2.0, %v8784_v31  ;;  %v5709_v48 = vpop.f32.mrf.mxu3  ;;  %v5730_v8 = vsub.f32 %v5466_v37, %v990_v30  ;;  %v1444_v24 = vmin.f32 %v1443_v32, %v5706_v33 }
 0x199   : > { %8767 = vst [vmem:[#allocation90_spill] sm:$0xff] %v5657_v26  ;;  %v1013_v26 = vmul.f32 2.0, %v8782_v50  ;;  %v8787_v50 = vld [vmem:[#allocation34_spill] sm:$0xff]  ;;  %v5724_v31 = vsub.f32 %v5431_v42, %v988_v41  ;;  %v1375_v63 = vmin.f32 %v1374_v3, %v5700_v9  ;;  %v8794_v42 = vld [vmem:[#allocation15_spill] sm:$0xff] }
 0x19a   : > { %8769 = vst [vmem:[#allocation9_spill] sm:$0xff] %v5664_v14  ;;  %v1017_v14 = vmul.f32 2.0, %v8787_v50  ;;  %v5739_v36 = vsub.f32 %v5466_v37, %v991_v17  ;;  %v994_v41 = vmul.f32 2.0, %v8794_v42  ;;  %v8800_v42 = vld [vmem:[#allocation19_spill] sm:$0xff] }
 0x19b   : > { %8771 = vst [vmem:[#allocation24_spill] sm:$0xff] %v5668_v55  ;;  %v5734_v50 = vsub.f32 %v5611_v21, %v1013_v26  ;;  %v1376_v30 = vmin.f32 %v1375_v63, %v5716_v34  ;;  %v8797_v26 = vld [vmem:[#allocation42_spill] sm:$0xff]  ;;  %v1481_v32 = vmin.f32 %v1480_v28, %v5724_v31 }
 0x19c   : > { %8772 = vst [vmem:[#allocation91_spill] sm:$0xff] %v5672_v46  ;;  %v8789_v46 = vld [vmem:[#allocation16_spill] sm:$0xff]  ;;  %v5746_v3 = vsub.f32 %v5609_v39, %v1017_v14 }
 0x19d   : > { %8775 = vst [vmem:[#allocation11_spill] sm:$0xff] %v5680_v15  ;;  %v5695_v12 = vpop.f32.mrf.mxu0  ;;  %v992_v55 = vmul.f32 2.0, %v8789_v46  ;;  %v8792_v15 = vld [vmem:[#allocation38_spill] sm:$0xff]  ;;  %v8795_v46 = vld [vmem:[#allocation17_spill] sm:$0xff]  ;;  %v1377_v14 = vmin.f32 %v1376_v30, %v5734_v50  ;;  %v8806_v30 = vld [vmem:[#allocation20_spill] sm:$0xff] }
 0x19e   : > { %8777 = vst [vmem:[#allocation10_spill] sm:$0xff] %v5687_v52  ;;  %v5719_v19 = vpop.f32.mrf.mxu1  ;;  %v1021_v5 = vmul.f32 2.0, %v8792_v15  ;;  %v1407_v52 = vmin.f32 %v1406_v45, %v5712_v11  ;;  %v5750_v15 = vshrl.u32 %v8798_v57, 7  ;;  %v8802_v57 = vld [vmem:[#allocation46_spill] sm:$0xff] }
 0x19f   : > { %8778 = vst [vmem:[#allocation28_spill] sm:$0xff] %v5690_v29  ;;  %v995_v29 = vmul.f32 2.0, %v8795_v46  ;;  %v5754_v17 = vsub.f32 %v5466_v37, %v992_v55  ;;  %v5757_v46 = vpop.permute.xlu2 %1190  ;;  %v1445_v37 = vmin.f32 %v1444_v24, %v5739_v36  ;;  %v5771_v55 = vsub.f32 %v5474_v49, %v994_v41  ;;  %v5809_v60 = vpop.permute.xlu1 %1200 }
 0x1a0   : > { %8781 = vst [vmem:[#allocation12_spill] sm:$0xff] %v5700_v9  ;;  %v1025_v9 = vmul.f32 2.0, %v8797_v26  ;;  %v1408_v63 = vmin.f32 %v1407_v52, %v5730_v8  ;;  %v5764_v26 = vsub.f32 %v5647_v53, %v1021_v5  ;;  %v5777_v52 = vpop.permute.xlu0 %1195  ;;  %v1378_v5 = vmin.f32 %v1377_v14, %v5746_v3  ;;  %v5791_v13 = vpop.f32.mrf.mxu3 }
 0x1a1   : > { %8783 = vst [vmem:[#allocation13_spill] sm:$0xff] %v5706_v33  ;;  %v996_v33 = vmul.f32 2.0, %v8800_v42  ;;  %v5774_v28 = vsub.f32 %v5474_v49, %v995_v29  ;;  %v8805_v42 = vld [vmem:[#allocation18_spill] sm:$0xff]  ;;  %v1482_v24 = vmin.f32 %v1481_v32, %v5754_v17 }
 0x1a2   : > { %8785 = vst [vmem:[#allocation31_spill] sm:$0xff] %v5712_v11  ;;  %v1029_v11 = vmul.f32 2.0, %v8802_v57  ;;  %v5782_v57 = vsub.f32 %v5675_v7, %v1025_v9  ;;  %v8810_v29 = vld [vmem:[#allocation22_spill] sm:$0xff]  ;;  %v1379_v14 = vmin.f32 %v1378_v5, %v5764_v26 }
 0x1a3   : > { %8786 = vst [vmem:[#allocation14_spill] sm:$0xff] %v5716_v34  ;;  %v5767_v34 = vpop.f32.mrf.mxu2  ;;  %v5787_v41 = vsub.f32 %v5474_v49, %v996_v33  ;;  %v1409_v49 = vmin.f32 %v1408_v63, %v5771_v55  ;;  %v1446_v33 = vmin.f32 %v1445_v37, %v5774_v28 }
 0x1a4   : > { %8788 = vst [vmem:[#allocation34_spill] sm:$0xff] %v5724_v31  ;;  %v998_v31 = vmul.f32 2.0, %v8805_v42  ;;  %v1002_v42 = vmul.f32 2.0, %v8811_v51  ;;  %v5798_v9 = vsub.f32 %v5693_v23, %v1029_v11  ;;  %v1380_v11 = vmin.f32 %v1379_v14, %v5782_v57 }
 0x1a5   : > { %8790 = vst [vmem:[#allocation16_spill] sm:$0xff] %v5730_v8  ;;  %v5759_v45 = vpop.f32.mrf.mxu0  ;;  %v999_v8 = vmul.f32 2.0, %v8806_v30  ;;  %v5794_v30 = vadd.s32 8, %v5750_v15  ;;  %v1483_v63 = vmin.f32 %v1482_v24, %v5787_v41 }
 0x1a6   : > { %8791 = vst [vmem:[#allocation92_spill] sm:$0xff] %v5734_v50  ;;  %v8808_v50 = vld [vmem:[#allocation49_spill] sm:$0xff]  ;;  %v5801_v32 = vpop.f32.mrf.mxu1  ;;  %v5806_v51 = vsub.f32 %v5484_v38, %v998_v31  ;;  %v5824_v31 = vsub.f32 %v5537_v62, %v1002_v42  ;;  %v1381_v14 = vmin.f32 %v1380_v11, %v5798_v9  ;;  %v8825_v42 = vld [vmem:[#allocation32_spill] sm:$0xff] }
 0x1a7   : > { %8793 = vst [vmem:[#allocation38_spill] sm:$0xff] %v5739_v36  ;;  %v1033_v27 = vmul.f32 2.0, %v8808_v50  ;;  %v1000_v36 = vmul.f32 2.0, %v8810_v29  ;;  %v8813_v50 = vld [vmem:[#allocation56_spill] sm:$0xff]  ;;  %v8815_v29 = vld [vmem:[#allocation25_spill] sm:$0xff]  ;;  %v5812_v5 = vsub.f32 %v5484_v38, %v999_v8  ;;  %v8821_v8 = vld [vmem:[#allocation23_spill] sm:$0xff] }
 0x1a8   : > { %8796 = vst [vmem:[#allocation15_spill] sm:$0xff] %v5746_v3  ;;  %v1037_v3 = vmul.f32 2.0, %v8813_v50  ;;  %v1003_v25 = vmul.f32 2.0, %v8821_v8  ;;  %v1410_v24 = vmin.f32 %v1409_v49, %v5806_v51  ;;  %v5855_v20 = vpop.permute.xlu0 %1210 }
 0x1a9   : > { %8799 = vst [vmem:[#allocation17_spill] sm:$0xff] %v5754_v17  ;;  %v1006_v17 = vmul.f32 2.0, %v8815_v29  ;;  %v5816_v50 = vsub.f32 %v5727_v44, %v1033_v27  ;;  %v5821_v37 = vsub.f32 %v5484_v38, %v1000_v36  ;;  %v8820_v29 = vld [vmem:[#allocation29_spill] sm:$0xff]  ;;  %v1447_v8 = vmin.f32 %v1446_v33, %v5812_v5 }
 0x1aa   : > { %8801 = vst [vmem:[#allocation42_spill] sm:$0xff] %v5764_v26  ;;  %v1041_v26 = vmul.f32 2.0, %v5493_v54  ;;  %v5830_v27 = vsub.f32 %v5757_v46, %v1037_v3  ;;  %v1045_v54 = vmul.f32 2.0, %v5563_v22  ;;  %v1049_v22 = vmul.f32 2.0, %v5629_v56 }
 0x1ab   : > { %8803 = vst [vmem:[#allocation19_spill] sm:$0xff] %v5771_v55  ;;  %v5836_v36 = vsub.f32 %v5545_v47, %v1006_v17  ;;  %v1382_v11 = vmin.f32 %v1381_v14, %v5816_v50  ;;  %v1411_v17 = vmin.f32 %v1410_v24, %v5824_v31  ;;  %v5858_v33 = vsub.f32 %v5537_v62, %v1003_v25  ;;  %v8834_v25 = vld [vmem:[#allocation27_spill] sm:$0xff] }
 0x1ac   : > { %8804 = vst [vmem:[#allocation46_spill] sm:$0xff] %v5774_v28  ;;  %v1010_v28 = vmul.f32 2.0, %v8820_v29  ;;  %v5839_v29 = vpop.permute.xlu2 %1205  ;;  %v5844_v3 = vsub.f32 %v5777_v52, %v1041_v26  ;;  %v5862_v56 = vsub.f32 %v5809_v60, %v1045_v54  ;;  %v1053_v14 = vmul.f32 2.0, %v5695_v12 }
 0x1ad   : > { %8807 = vst [vmem:[#allocation18_spill] sm:$0xff] %v5782_v57  ;;  %v565_v55 = vpop.f32.mrf.mxu0  ;;  %v1014_v57 = vmul.f32 2.0, %v8825_v42  ;;  %v8828_v42 = vld [vmem:[#allocation35_spill] sm:$0xff]  ;;  %v1383_v26 = vmin.f32 %v1382_v11, %v5830_v27  ;;  %v5878_v54 = vsub.f32 %v5839_v29, %v1049_v22  ;;  %v1057_v12 = vmul.f32 2.0, %v5759_v45 }
 0x1ae   : > { %8809 = vst [vmem:[#allocation20_spill] sm:$0xff] %v5787_v41  ;;  %v8823_v41 = vld [vmem:[#allocation26_spill] sm:$0xff]  ;;  %v5852_v49 = vsub.f32 %v5555_v6, %v1010_v28  ;;  %v1412_v28 = vmin.f32 %v1411_v17, %v5836_v36  ;;  %v5894_v45 = vsub.f32 %v5855_v20, %v1053_v14 }
 0x1af   : > { %8812 = vst [vmem:[#allocation49_spill] sm:$0xff] %v5798_v9  ;;  %v1004_v38 = vmul.f32 2.0, %v8823_v41  ;;  %v5847_v9 = vpop.f32.mrf.mxu2  ;;  %v1484_v41 = vmin.f32 %v1483_v63, %v5821_v37  ;;  %v5870_v24 = vsub.f32 %v5611_v21, %v1014_v57  ;;  %v1384_v11 = vmin.f32 %v1383_v26, %v5844_v3 }
 0x1b0   : > { %8814 = vst [vmem:[#allocation22_spill] sm:$0xff] %v5806_v51  ;;  %v1018_v51 = vmul.f32 2.0, %v8828_v42  ;;  %v8833_v42 = vld [vmem:[#allocation39_spill] sm:$0xff]  ;;  %v1413_v57 = vmin.f32 %v1412_v28, %v5852_v49  ;;  %v1448_v26 = vmin.f32 %v1447_v8, %v5858_v33 }
 0x1b1   : > { %8816 = vst [vmem:[#allocation21_spill] sm:$0xff] %v5812_v5  ;;  %v5866_v63 = vsub.f32 %v5537_v62, %v1004_v38  ;;  %v5873_v5 = vpop.f32.mrf.mxu3  ;;  %v5881_v62 = vpop.f32.mrf.mxu1  ;;  %v8836_v38 = vld [vmem:[#allocation33_spill] sm:$0xff]  ;;  %v1385_v22 = vmin.f32 %v1384_v11, %v5862_v56 }
 0x1b2   : > { %8817 = vst [vmem:[#allocation56_spill] sm:$0xff] %v5816_v50  ;;  %v1008_v17 = vmul.f32 2.0, %v8836_v38  ;;  %v5889_v50 = vpop.permute.xlu1 %1215  ;;  %v1414_v28 = vmin.f32 %v1413_v57, %v5870_v24 }
 0x1b3   : > { %8818 = vst [vmem:[#allocation25_spill] sm:$0xff] %v5821_v37  ;;  %v1022_v37 = vmul.f32 2.0, %v8833_v42  ;;  %v8838_v42 = vld [vmem:[#allocation43_spill] sm:$0xff]  ;;  %v1485_v38 = vmin.f32 %v1484_v41, %v5866_v63  ;;  %v1386_v8 = vmin.f32 %v1385_v22, %v5878_v54  ;;  %v5907_v11 = vsub.f32 %v5889_v50, %v1057_v12 }
 0x1b4   : > { %8819 = vst [vmem:[#allocation93_spill] sm:$0xff] %v5824_v31  ;;  %v1007_v31 = vmul.f32 2.0, %v8834_v25 }
 0x1b5   : > { %8822 = vst [vmem:[#allocation29_spill] sm:$0xff] %v5830_v27  ;;  %v1026_v27 = vmul.f32 2.0, %v8838_v42  ;;  %v568_v25 = vpop.f32.mrf.mxu0  ;;  %v1387_v12 = vmin.f32 %v1386_v8, %v5894_v45 }
 0x1b6   : > { %8824 = vst [vmem:[#allocation23_spill] sm:$0xff] %v5836_v36  ;;  %v5886_v36 = vsub.f32 %v5609_v39, %v1018_v51  ;;  %v5899_v51 = vsub.f32 %v5647_v53, %v1022_v37  ;;  %v5903_v43 = vsub.f32 %v5545_v47, %v1007_v31  ;;  %v1065_v14 = vmul.f32 2.0, %v568_v25  ;;  %v5916_v37 = vpop.permute.xlu2 %1220  ;;  %v8847_v31 = vld [vmem:[#allocation30_spill] sm:$0xff]  ;;  %v5931_v25 = vpop.permute.xlu0 %1225 }
 0x1b7   : > { %8826 = vst [vmem:[#allocation26_spill] sm:$0xff] %v5844_v3  ;;  %v1061_v3 = vmul.f32 2.0, %v565_v55  ;;  %v5910_v55 = vsub.f32 %v5545_v47, %v1008_v17  ;;  %v5914_v57 = vsub.f32 %v5675_v7, %v1026_v27  ;;  %v5928_v17 = vadd.s32 16, %v5750_v15 }
 0x1b8   : > { %8827 = vst [vmem:[#allocation32_spill] sm:$0xff] %v5852_v49  ;;  %v8841_v49 = vld [vmem:[#allocation47_spill] sm:$0xff]  ;;  %v1415_v41 = vmin.f32 %v1414_v28, %v5886_v36  ;;  %v1449_v8 = vmin.f32 %v1448_v26, %v5903_v43 }
 0x1b9   : > { %8829 = vst [vmem:[#allocation35_spill] sm:$0xff] %v5858_v33  ;;  %v1030_v42 = vmul.f32 2.0, %v8841_v49  ;;  %v8846_v49 = vld [vmem:[#allocation50_spill] sm:$0xff]  ;;  %v1011_v33 = vmul.f32 2.0, %v8847_v31  ;;  %v5925_v47 = vsub.f32 %v5916_v37, %v1061_v3  ;;  %v1388_v3 = vmin.f32 %v1387_v12, %v5907_v11  ;;  %v681_v12 = vpop.f32.mrf.mxu1 }
 0x1ba   : > { %8830 = vst [vmem:[#allocation94_spill] sm:$0xff] %v5862_v56  ;;  %v1416_v27 = vmin.f32 %v1415_v41, %v5899_v51 }
 0x1bb   : > { %8831 = vst [vmem:[#allocation95_spill] sm:$0xff] %v5866_v63  ;;  %v1034_v63 = vmul.f32 2.0, %v8846_v49  ;;  %v5934_v28 = vsub.f32 %v5693_v23, %v1030_v42  ;;  %v8851_v49 = vld [vmem:[#allocation57_spill] sm:$0xff]  ;;  %v1042_v42 = vmul.f32 2.0, %v5495_v40 }
 0x1bc   : > { %8832 = vst [vmem:[#allocation96_spill] sm:$0xff] %v5870_v24  ;;  %v8848_v24 = vld [vmem:[#allocation37_spill] sm:$0xff]  ;;  %v1038_v31 = vmul.f32 2.0, %v8851_v49  ;;  %v1417_v41 = vmin.f32 %v1416_v27, %v5914_v57  ;;  %v5951_v49 = vpop.f32.mrf.mxu3 }
 0x1bd   : > { %8835 = vst [vmem:[#allocation39_spill] sm:$0xff] %v5878_v54  ;;  %v1012_v22 = vmul.f32 2.0, %v8848_v24  ;;  %v5922_v54 = vpop.f32.mrf.mxu2  ;;  %v5938_v24 = vadd.s32 24, %v5750_v15  ;;  %v571_v56 = vpop.f32.mrf.mxu0 }
 0x1be   : > { %8837 = vst [vmem:[#allocation27_spill] sm:$0xff] %v5886_v36  ;;  %v5943_v36 = vsub.f32 %v5931_v25, %v1065_v14  ;;  %v1389_v14 = vmin.f32 %v1388_v3, %v5925_v47  ;;  %v5965_v40 = vsub.f32 %v5757_v46, %v1038_v31  ;;  %v5981_v31 = vsub.f32 %v5777_v52, %v1042_v42 }
 0x1bf   : > { %8839 = vst [vmem:[#allocation33_spill] sm:$0xff] %v5894_v45  ;;  %v1486_v45 = vmin.f32 %v1485_v38, %v5910_v55  ;;  %v5957_v26 = vsub.f32 %v5555_v6, %v1012_v22  ;;  %v1069_v38 = vmul.f32 2.0, %v571_v56  ;;  %v1054_v42 = vmul.f32 2.0, %v5719_v19 }
 0x1c0   : > { %8840 = vst [vmem:[#allocation43_spill] sm:$0xff] %v5899_v51  ;;  %v5948_v51 = vsub.f32 %v5727_v44, %v1034_v63  ;;  %v1418_v63 = vmin.f32 %v1417_v41, %v5934_v28  ;;  %v1390_v3 = vmin.f32 %v1389_v14, %v5943_v36  ;;  %v1058_v19 = vmul.f32 2.0, %v5801_v32 }
 0x1c1   : > { %8842 = vst [vmem:[#allocation47_spill] sm:$0xff] %v5903_v43  ;;  %v5962_v43 = vpop.permute.xlu1 %1230  ;;  %v1487_v14 = vmin.f32 %v1486_v45, %v5957_v26  ;;  %v1062_v32 = vmul.f32 2.0, %v5881_v62  ;;  %v6044_v62 = vadd.s32 88, %v5750_v15 }
 0x1c2   : > { %8843 = vst [vmem:[#allocation97_spill] sm:$0xff] %v5907_v11  ;;  %v5974_v56 = vsub.f32 %v5962_v43, %v1069_v38  ;;  %v1419_v41 = vmin.f32 %v1418_v63, %v5948_v51 }
 0x1c3   : > { %8844 = vst [vmem:[#allocation98_spill] sm:$0xff] %v5910_v55  ;;  %v8857_v55 = vld [vmem:[#allocation36_spill] sm:$0xff] }
 0x1c4   : > { %8845 = vst [vmem:[#allocation99_spill] sm:$0xff] %v5914_v57  ;;  %v1015_v27 = vmul.f32 2.0, %v8857_v55  ;;  %v1046_v57 = vmul.f32 2.0, %v5565_v61  ;;  %v5977_v55 = vadd.s32 40, %v5750_v15  ;;  %v1050_v61 = vmul.f32 2.0, %v5639_v16 }
 0x1c5   : > { %8849 = vst [vmem:[#allocation50_spill] sm:$0xff] %v5925_v47  ;;  %v1391_v38 = vmin.f32 %v1390_v3, %v5974_v56  ;;  %v1420_v47 = vmin.f32 %v1419_v41, %v5965_v40  ;;  %v6003_v45 = vpop.f32.mrf.mxu2 }
 0x1c6   : > { %8850 = vst [vmem:[#allocation30_spill] sm:$0xff] %v5934_v28  ;;  %v5985_v28 = vadd.s32 48, %v5750_v15  ;;  %v5995_v63 = vsub.f32 %v5809_v60, %v1046_v57  ;;  %v6010_v57 = vsub.f32 %v5839_v29, %v1050_v61  ;;  %v6027_v61 = vpop.f32.mrf.mxu3 }
 0x1c7   : > { %8852 = vst [vmem:[#allocation37_spill] sm:$0xff] %v5938_v24  ;;  %v5954_v24 = vsub.f32 %v5555_v6, %v1011_v33  ;;  %v5969_v33 = vadd.s32 32, %v5750_v15  ;;  %v8859_v6 = vld [vmem:[#allocation41_spill] sm:$0xff]  ;;  %v1392_v3 = vrot.slane %v1391_v38, 4  ;;  %v1421_v41 = vmin.f32 %v1420_v47, %v5981_v31 }
 0x1c8   : > { %8853 = vst [vmem:[#allocation57_spill] sm:$0xff] %v5943_v36  ;;  %v1016_v22 = vmul.f32 2.0, %v8859_v6  ;;  %v5991_v36 = vsub.f32 %v5611_v21, %v1015_v27  ;;  %v6006_v27 = vadd.s32 56, %v5750_v15  ;;  %v6025_v47 = vsub.f32 %v5855_v20, %v1054_v42 }
 0x1c9   : > { %8854 = vst [vmem:[#allocation100_spill] sm:$0xff] %v5948_v51  ;;  %v1450_v6 = vmin.f32 %v1449_v8, %v5954_v24  ;;  %v8865_v51 = vld [vmem:[#allocation40_spill] sm:$0xff]  ;;  %v8866_v8 = vld [vmem:[#allocation45_spill] sm:$0xff] }
 0x1ca   : > { %8855 = vst [vmem:[#allocation101_spill] sm:$0xff] %v5954_v24  ;;  %v5999_v16 = vsub.f32 %v5611_v21, %v1016_v22  ;;  %v1019_v11 = vmul.f32 2.0, %v8865_v51  ;;  %v1020_v24 = vmul.f32 2.0, %v8866_v8  ;;  %v6014_v21 = vadd.s32 64, %v5750_v15 }
 0x1cb   : > { %8856 = vst [vmem:[#allocation102_spill] sm:$0xff] %v5957_v26  ;;  %v6017_v51 = vadd.s32 72, %v5750_v15  ;;  %v6020_v22 = vadd.s32 80, %v5750_v15  ;;  %v1393_v8 = vmin.f32 %v1391_v38, %v1392_v3  ;;  %v1451_v26 = vmin.f32 %v1450_v6, %v5991_v36  ;;  %v8872_v38 = vld [vmem:[#allocation44_spill] sm:$0xff]  ;;  %v684_v6 = vpop.f32.mrf.mxu1 }
 0x1cc   : > { %8858 = vst [vmem:[#allocation36_spill] sm:$0xff] %v5965_v40  ;;  %v1422_v40 = vmin.f32 %v1421_v41, %v5995_v63  ;;  %v1023_v3 = vmul.f32 2.0, %v8872_v38 }
 0x1cd   : > { %8860 = vst [vmem:[#allocation41_spill] sm:$0xff] %v5974_v56  ;;  %v6032_v56 = vsub.f32 %v5609_v39, %v1019_v11  ;;  %v6047_v11 = vadd.s32 96, %v5750_v15 }
 0x1ce   : > { %8861 = vst [vmem:[#allocation103_spill] sm:$0xff] %v5981_v31  ;;  %v1488_v31 = vmin.f32 %v1487_v14, %v5999_v16  ;;  %v1423_v42 = vmin.f32 %v1422_v40, %v6010_v57  ;;  %v6053_v14 = vadd.s32 112, %v5750_v15  ;;  %v6057_v40 = vsub.f32 %v5916_v37, %v1062_v32 }
 0x1cf   : > { %8862 = vst [vmem:[#allocation104_spill] sm:$0xff] %v5991_v36  ;;  %v8873_v36 = vld [vmem:[#allocation51_spill] sm:$0xff] }
 0x1d0   : > { %8863 = vst [vmem:[#allocation105_spill] sm:$0xff] %v5995_v63  ;;  %v1024_v41 = vmul.f32 2.0, %v8873_v36  ;;  %v6041_v63 = vsub.f32 %v5889_v50, %v1058_v19  ;;  %v1424_v36 = vmin.f32 %v1423_v42, %v6025_v47  ;;  %v1070_v19 = vmul.f32 2.0, %v684_v6 }
 0x1d1   : > { %8864 = vst [vmem:[#allocation106_spill] sm:$0xff] %v5999_v16  ;;  %v6062_v16 = vsub.f32 %v5647_v53, %v1023_v3  ;;  %v6074_v6 = vadd.s32 120, %v5750_v15 }
 0x1d2   : > { %8867 = vst [vmem:[#allocation40_spill] sm:$0xff] %v6010_v57  ;;  %v8881_v57 = vld [vmem:[#allocation48_spill] sm:$0xff]  ;;  %v1425_v42 = vmin.f32 %v1424_v36, %v6041_v63  ;;  %v6091_v36 = vadd.s32 144, %v5750_v15 }
 0x1d3   : > { %8868 = vst [vmem:[#allocation45_spill] sm:$0xff] %v6017_v51  ;;  %v6035_v51 = vsub.f32 %v5609_v39, %v1020_v24  ;;  %v6050_v39 = vadd.s32 104, %v5750_v15  ;;  %v1394_v24 = vrot.slane %v1393_v8, 2 }
 0x1d4   : > { %8869 = vst [vmem:[#allocation107_spill] sm:$0xff] %v6020_v22  ;;  %v1066_v22 = vmul.f32 2.0, %v681_v12  ;;  %v1452_v12 = vmin.f32 %v1451_v26, %v6032_v56  ;;  %v6077_v26 = vadd.s32 128, %v5750_v15 }
 0x1d5   : > { %8870 = vst [vmem:[#allocation108_spill] sm:$0xff] %v6032_v56  ;;  %v1489_v38 = vmin.f32 %v1488_v31, %v6035_v51  ;;  %v8885_v31 = vld [vmem:[#allocation58_spill] sm:$0xff] }
 0x1d6   : > { %8871 = vst [vmem:[#allocation109_spill] sm:$0xff] %v6035_v51  ;;  %v6071_v32 = vsub.f32 %v5931_v25, %v1066_v22  ;;  %v1031_v3 = vmul.f32 2.0, %v8885_v31  ;;  %v6080_v51 = vpop.f32.mrf.mxu2  ;;  %v6088_v22 = vsub.f32 %v5962_v43, %v1070_v19  ;;  %v1453_v56 = vmin.f32 %v1452_v12, %v6062_v16 }
 0x1d7   : > { %8874 = vst [vmem:[#allocation44_spill] sm:$0xff] %v6041_v63 }
 0x1d8   : > { %8875 = vst [vmem:[#allocation51_spill] sm:$0xff] %v6044_v62  ;;  %v8883_v62 = vld [vmem:[#allocation61_spill] sm:$0xff]  ;;  %v6110_v12 = vsub.f32 %v5693_v23, %v1031_v3 }
 0x1d9   : > { %8876 = vst [vmem:[#allocation110_spill] sm:$0xff] %v6047_v11  ;;  %v1027_v11 = vmul.f32 2.0, %v8881_v57  ;;  %v1395_v57 = vmin.f32 %v1393_v8, %v1394_v24  ;;  %v1035_v8 = vmul.f32 2.0, %v5520_v10 }
 0x1da   : > { %8877 = vst [vmem:[#allocation111_spill] sm:$0xff] %v6050_v39  ;;  %v6066_v39 = vsub.f32 %v5647_v53, %v1024_v41  ;;  %v6083_v53 = vadd.s32 136, %v5750_v15  ;;  %v1032_v41 = vmul.f32 2.0, %v5547_v2  ;;  %v1036_v2 = vmul.f32 2.0, %v5627_v18 }
 0x1db   : > { %8878 = vst [vmem:[#allocation112_spill] sm:$0xff] %v6053_v14  ;;  %v1028_v14 = vmul.f32 2.0, %v8883_v62  ;;  %v1426_v62 = vmin.f32 %v1425_v42, %v6057_v40  ;;  %v6095_v31 = vsub.f32 %v5675_v7, %v1027_v11  ;;  %v6103_v42 = vpop.f32.mrf.mxu3  ;;  %v1039_v11 = vmul.f32 2.0, %v5601_v35 }
 0x1dc   : > { %8879 = vst [vmem:[#allocation113_spill] sm:$0xff] %v6057_v40  ;;  %v1490_v24 = vmin.f32 %v1489_v38, %v6066_v39  ;;  %v6107_v40 = vadd.s32 152, %v5750_v15  ;;  %v1396_v10 = vrot.slane %v1395_v57, 1  ;;  %v6114_v38 = vadd.s32 160, %v5750_v15 }
 0x1dd   : > { %8880 = vst [vmem:[#allocation114_spill] sm:$0xff] %v6062_v16  ;;  %v6100_v63 = vsub.f32 %v5675_v7, %v1028_v14  ;;  %v1427_v19 = vmin.f32 %v1426_v62, %v6071_v32  ;;  %v6117_v7 = vsub.f32 %v5693_v23, %v1032_v41  ;;  %v1040_v18 = vmul.f32 2.0, %v5709_v48 }
 0x1de   : > { %8882 = vst [vmem:[#allocation48_spill] sm:$0xff] %v6066_v39  ;;  %v1454_v62 = vmin.f32 %v1453_v56, %v6095_v31  ;;  %v6123_v39 = vadd.s32 168, %v5750_v15  ;;  %v6126_v3 = vsub.f32 %v5727_v44, %v1035_v8  ;;  %v1043_v35 = vmul.f32 2.0, %v5683_v4 }
 0x1df   : > { %8884 = vst [vmem:[#allocation61_spill] sm:$0xff] %v6071_v32  ;;  %v1428_v14 = vmin.f32 %v1427_v19, %v6088_v22  ;;  %v1491_v16 = vmin.f32 %v1490_v24, %v6100_v63  ;;  %v6131_v32 = vadd.s32 176, %v5750_v15  ;;  %v6134_v23 = vsub.f32 %v5727_v44, %v1036_v2 }
 0x1e0   : > { %8886 = vst [vmem:[#allocation58_spill] sm:$0xff] %v6100_v63  ;;  %v1044_v48 = vmul.f32 2.0, %v5791_v13  ;;  %v1455_v56 = vmin.f32 %v1454_v62, %v6110_v12  ;;  %v6139_v41 = vsub.f32 %v5757_v46, %v1039_v11  ;;  %v1047_v8 = vmul.f32 2.0, %v5767_v34 }
 0x1e1   : > { %8887 = vst [vmem:[#allocation115_spill] sm:$0xff] %v6117_v7  ;;  %v6142_v19 = vmin.f32 %v1395_v57, %v1396_v10  ;;  %v1492_v4 = vmin.f32 %v1491_v16, %v6117_v7  ;;  %v6146_v24 = vsub.f32 %v5757_v46, %v1040_v18  ;;  %v1048_v63 = vmul.f32 2.0, %v5873_v5  ;;  %v794_v57 = vpop.f32.mrf.mxu2 }
 0x1e2   : > { %8888 = vst [vmem:[#allocation116_spill] sm:$0xff] %v6134_v23  ;;  %v1429_v44 = vrot.slane %v1428_v14, 4  ;;  %v1456_v2 = vmin.f32 %v1455_v56, %v6126_v3  ;;  %v6151_v13 = vadd.s32 184, %v5750_v15  ;;  %v6154_v11 = vsub.f32 %v5777_v52, %v1043_v35 }
 0x1e3   : > { %8889 = vst [vmem:[#allocation117_spill] sm:$0xff] %v6139_v41  ;;  %v1051_v34 = vmul.f32 2.0, %v5847_v9  ;;  %v1493_v10 = vmin.f32 %v1492_v4, %v6134_v23  ;;  %v6159_v16 = vadd.s32 192, %v5750_v15  ;;  %v6162_v46 = vsub.f32 %v5777_v52, %v1044_v48  ;;  %v8894_v9 = vld [vmem:[#allocation62_spill] sm:$0xff] }
 0x1e4   : > { %8890 = vst [vmem:[#allocation118_spill] sm:$0xff] %v6146_v24  ;;  %v1052_v5 = vmul.f32 2.0, %v5951_v49  ;;  %v1457_v18 = vmin.f32 %v1456_v2, %v6139_v41  ;;  %v6167_v62 = vsub.f32 %v5809_v60, %v1047_v8  ;;  %vm1542_vm0 = vcmp.le.f32.partialorder %v5477_v1, %v6142_v19  ;;  %v904_v49 = vpop.f32.mrf.mxu3  ;;  %v8952_v41 = vld [vmem:[#allocation57_spill] sm:$0xff] }
 0x1e5   : > { %8891 = vst [vmem:[#allocation119_spill] sm:$0xff] %v6154_v11  ;;  %vm1546_vm1 = vcmp.le.f32.partialorder %v8894_v9, %v6142_v19  ;;  %v1494_v35 = vmin.f32 %v1493_v10, %v6146_v24  ;;  %v6175_v56 = vadd.s32 200, %v5750_v15  ;;  %v6178_v52 = vsub.f32 %v5809_v60, %v1048_v63 }
 0x1e6   : > { %8892 = vst [vmem:[#allocation120_spill] sm:$0xff] %v6162_v46  ;;  %v1430_v48 = vmin.f32 %v1428_v14, %v1429_v44  ;;  %v1458_v4 = vmin.f32 %v1457_v18, %v6154_v11  ;;  %v6182_v8 = vadd.s32 208, %v5750_v15  ;;  %v6185_v1 = vsub.f32 %v5839_v29, %v1051_v34  ;;  %v8946_v11 = vld [vmem:[#allocation33_spill] sm:$0xff] }
 0x1e7   : > { %8893 = vst [vmem:[#allocation121_spill] sm:$0xff] %v6167_v62  ;;  %v1055_v2 = vmul.f32 2.0, %v5922_v54  ;;  %v1495_v10 = vmin.f32 %v1494_v35, %v6162_v46  ;;  %v6190_v9 = vsub.f32 %v5839_v29, %v1052_v5  ;;  %v1670_v60 = vsel %vm1542_vm0, %v5750_v15, 256 }
 0x1e8   : > { %8895 = vst [vmem:[#allocation62_spill] sm:$0xff] %v6178_v52  ;;  %v1674_v63 = vsel %vm1546_vm1, %v5794_v30, 256  ;;  %v1459_v14 = vmin.f32 %v1458_v4, %v6167_v62  ;;  %v1056_v44 = vmul.f32 2.0, %v6027_v61  ;;  %v1059_v18 = vmul.f32 2.0, %v6003_v45  ;;  %v8941_v62 = vld [vmem:[#allocation26_spill] sm:$0xff] }
 0x1e9   : > { %8896 = vst [vmem:[#allocation122_spill] sm:$0xff] %v6185_v1  ;;  %vm1550_vm2 = vcmp.le.f32.partialorder %v5481_v59, %v6142_v19  ;;  %v1496_v54 = vmin.f32 %v1495_v10, %v6178_v52  ;;  %v6201_v34 = vadd.s32 216, %v5750_v15  ;;  %v6204_v29 = vadd.s32 224, %v5750_v15 }
 0x1ea   : > { %8897 = vst [vmem:[#allocation123_spill] sm:$0xff] %v6190_v9  ;;  %v1431_v5 = vrot.slane %v1430_v48, 2  ;;  %v1460_v35 = vmin.f32 %v1459_v14, %v6185_v1  ;;  %v6208_v4 = vsub.f32 %v5855_v20, %v1055_v2  ;;  %vm1554_vm3 = vcmp.le.f32.partialorder %v5501_v58, %v6142_v19  ;;  %v797_v2 = vpop.f32.mrf.mxu2  ;;  %v8901_v14 = vld [vmem:[#allocation37_spill] sm:$0xff] }
 0x1eb   : > { %vm1798_vm4 = vcmp.lt.s32.totalorder %v1670_v60, %v1674_v63  ;;  %v1497_v59 = vmin.f32 %v1496_v54, %v6190_v9  ;;  %v1063_v45 = vmul.f32 2.0, %v6080_v51  ;;  %v1678_v61 = vsel %vm1550_vm2, %v5928_v17, 256  ;;  %v8936_v1 = vld [vmem:[#allocation49_spill] sm:$0xff] }
 0x1ec   : > { %8898 = vst [vmem:[#allocation124_spill] sm:$0xff] %v6208_v4  ;;  %v1799_v10 = vsel %vm1798_vm4, %v1670_v60, %v1674_v63  ;;  %v6216_v52 = vsub.f32 %v5855_v20, %v1056_v44  ;;  %v6219_v46 = vsub.f32 %v5889_v50, %v1059_v18  ;;  %vm1558_vm5 = vcmp.le.f32.partialorder %v5517_v0, %v6142_v19  ;;  %v8902_v20 = vld [vmem:[#allocation71_spill] sm:$0xff]  ;;  %v907_v44 = vpop.f32.mrf.mxu3 }
 0x1ed   : > { %vm1800_vm6 = vcmp.lt.s32.totalorder %v1799_v10, %v1678_v61  ;;  %v1067_v58 = vmul.f32 2.0, %v794_v57  ;;  %v1682_v24 = vsel %vm1554_vm3, %v8901_v14, 256  ;;  %v1432_v9 = vmin.f32 %v1430_v48, %v1431_v5  ;;  %v8904_v48 = vld [vmem:[#allocation73_spill] sm:$0xff] }
 0x1ee   : > { %8899 = vst [vmem:[#allocation125_spill] sm:$0xff] %v6216_v52  ;;  %v1801_v54 = vsel %vm1800_vm6, %v1799_v10, %v1678_v61  ;;  %v1461_v51 = vmin.f32 %v1460_v35, %v6208_v4  ;;  %v1060_v60 = vmul.f32 2.0, %v6103_v42  ;;  %vm1562_vm7 = vcmp.le.f32.partialorder %v8902_v20, %v6142_v19  ;;  %v8933_v4 = vld [vmem:[#allocation112_spill] sm:$0xff] }
 0x1ef   : > { %8900 = vst [vmem:[#allocation126_spill] sm:$0xff] %v6219_v46  ;;  %vm1802_vm8 = vcmp.lt.s32.totalorder %v1801_v54, %v1682_v24  ;;  %v6229_v63 = vsub.f32 %v5916_v37, %v1063_v45  ;;  %v1686_v0 = vsel %vm1558_vm5, %v5969_v33, 256  ;;  %v1071_v57 = vmul.f32 2.0, %v797_v2 }
 0x1f0   : > { %v1803_v18 = vsel %vm1802_vm8, %v1801_v54, %v1682_v24  ;;  %v1462_v23 = vmin.f32 %v1461_v51, %v6219_v46  ;;  %v1064_v61 = vmul.f32 2.0, %v904_v49  ;;  %vm1566_vm9 = vcmp.le.f32.partialorder %v8904_v48, %v6142_v19  ;;  %v8907_v24 = vld [vmem:[#allocation75_spill] sm:$0xff] }
 0x1f1   : > { %8903 = vst [vmem:[#allocation37_spill] sm:$0xff] %v6229_v63  ;;  %vm1804_vm10 = vcmp.lt.s32.totalorder %v1803_v18, %v1686_v0  ;;  %v6236_v42 = vsub.f32 %v5931_v25, %v1067_v58  ;;  %v1690_v5 = vsel %vm1562_vm7, %v5977_v55, 256  ;;  %v1433_v45 = vrot.slane %v1432_v9, 1 }
 0x1f2   : > { %v1805_v35 = vsel %vm1804_vm10, %v1803_v18, %v1686_v0  ;;  %v6240_v10 = vsub.f32 %v5889_v50, %v1060_v60  ;;  %v1068_v20 = vmul.f32 2.0, %v907_v44  ;;  %vm1570_vm11 = vcmp.le.f32.partialorder %v8907_v24, %v6142_v19  ;;  %v8910_v50 = vld [vmem:[#allocation78_spill] sm:$0xff] }
 0x1f3   : > { %8905 = vst [vmem:[#allocation71_spill] sm:$0xff] %v6236_v42  ;;  %vm1806_vm12 = vcmp.lt.s32.totalorder %v1805_v35, %v1690_v5  ;;  %v1463_v49 = vmin.f32 %v1462_v23, %v6229_v63  ;;  %v1694_v2 = vsel %vm1566_vm9, %v5985_v28, 256  ;;  %v6247_v58 = vsub.f32 %v5962_v43, %v1071_v57 }
 0x1f4   : > { %8906 = vst [vmem:[#allocation73_spill] sm:$0xff] %v6240_v10  ;;  %v1807_v54 = vsel %vm1806_vm12, %v1805_v35, %v1690_v5  ;;  %v1498_v51 = vmin.f32 %v1497_v59, %v6216_v52  ;;  %v6251_v0 = vsub.f32 %v5916_v37, %v1064_v61  ;;  %vm1574_vm13 = vcmp.le.f32.partialorder %v8910_v50, %v6142_v19  ;;  %v8912_v59 = vld [vmem:[#allocation81_spill] sm:$0xff] }
 0x1f5   : > { %8908 = vst [vmem:[#allocation75_spill] sm:$0xff] %v6247_v58  ;;  %vm1808_vm14 = vcmp.lt.s32.totalorder %v1807_v54, %v1694_v2  ;;  %v1464_v60 = vmin.f32 %v1463_v49, %v6236_v42  ;;  %v1698_v44 = vsel %vm1570_vm11, %v6006_v27, 256  ;;  %v6257_v18 = vmin.f32 %v1432_v9, %v1433_v45  ;;  %v8930_v42 = vld [vmem:[#allocation111_spill] sm:$0xff] }
 0x1f6   : > { %8909 = vst [vmem:[#allocation127_spill] sm:$0xff] %v6251_v0  ;;  %v1809_v23 = vsel %vm1808_vm14, %v1807_v54, %v1694_v2  ;;  %v1499_v48 = vmin.f32 %v1498_v51, %v6240_v10  ;;  %v6261_v57 = vsub.f32 %v5931_v25, %v1068_v20  ;;  %vm1578_vm15 = vcmp.le.f32.partialorder %v8912_v59, %v6142_v19  ;;  %v8913_v25 = vld [vmem:[#allocation84_spill] sm:$0xff]  ;;  %v8914_v20 = vld [vmem:[#allocation45_spill] sm:$0xff]  ;;  %v8915_v2 = vld [vmem:[#allocation66_spill] sm:$0xff] }
 0x1f7   : > { %vm1810_vm0 = vcmp.lt.s32.totalorder %v1809_v23, %v1698_v44  ;;  %v6266_v37 = vadd.s32 232, %v5750_v15  ;;  %v1702_v61 = vsel %vm1574_vm13, %v6014_v21, 256  ;;  %v6270_v35 = vmin.f32 %v1464_v60, %v6247_v58  ;;  %v8916_v54 = vld [vmem:[#allocation64_spill] sm:$0xff]  ;;  %v8917_v60 = vld [vmem:[#allocation87_spill] sm:$0xff]  ;;  %v8927_v10 = vld [vmem:[#allocation110_spill] sm:$0xff] }
 0x1f8   : > { %8911 = vst [vmem:[#allocation78_spill] sm:$0xff] %v6261_v57  ;;  %v1811_v5 = vsel %vm1810_vm0, %v1809_v23, %v1698_v44  ;;  %v1500_v9 = vmin.f32 %v1499_v48, %v6251_v0  ;;  %v6274_v45 = vadd.s32 240, %v5750_v15  ;;  %vm1582_vm1 = vcmp.le.f32.partialorder %v8913_v25, %v6142_v19  ;;  %v8918_v44 = vld [vmem:[#allocation89_spill] sm:$0xff]  ;;  %v8919_v23 = vld [vmem:[#allocation107_spill] sm:$0xff]  ;;  %v8923_v0 = vld [vmem:[#allocation68_spill] sm:$0xff] }
 0x1f9   : > { %vm1812_vm2 = vcmp.lt.s32.totalorder %v1811_v5, %v1702_v61  ;;  %v1706_v24 = vsel %vm1578_vm15, %v8914_v20, 256  ;;  %vm1543_vm3 = vcmp.le.f32.partialorder %v8915_v2, %v6257_v18  ;;  %vm1547_vm4 = vcmp.le.f32.partialorder %v8916_v54, %v6257_v18  ;;  %v8921_v2 = vld [vmem:[#allocation11_spill] sm:$0xff] }
 0x1fa   : > { %v1813_v49 = vsel %vm1812_vm2, %v1811_v5, %v1702_v61  ;;  %v6284_v51 = vmin.f32 %v1500_v9, %v6261_v57  ;;  %v6287_v50 = vadd.s32 248, %v5750_v15  ;;  %vm1586_vm5 = vcmp.le.f32.partialorder %v8917_v60, %v6142_v19  ;;  %v8920_v5 = vld [vmem:[#allocation9_spill] sm:$0xff]  ;;  %v8922_v54 = vld [vmem:[#allocation51_spill] sm:$0xff]  ;;  %v8926_v61 = vld [vmem:[#allocation92_spill] sm:$0xff] }
 0x1fb   : > { %vm1814_vm6 = vcmp.lt.s32.totalorder %v1813_v49, %v1706_v24  ;;  %vm1590_vm7 = vcmp.le.f32.partialorder %v8918_v44, %v6142_v19  ;;  %v1710_v48 = vsel %vm1582_vm1, %v8919_v23, 256  ;;  %vm1594_vm8 = vcmp.le.f32.partialorder %v8920_v5, %v6142_v19  ;;  %v8931_v44 = vld [vmem:[#allocation76_spill] sm:$0xff]  ;;  %v8934_v5 = vld [vmem:[#allocation79_spill] sm:$0xff] }
 0x1fc   : > { %v1815_v59 = vsel %vm1814_vm6, %v1813_v49, %v1706_v24  ;;  %v1671_v9 = vsel %vm1543_vm3, %v5750_v15, 256  ;;  %v1675_v25 = vsel %vm1547_vm4, %v5794_v30, 256  ;;  %vm1598_vm10 = vcmp.le.f32.partialorder %v8921_v2, %v6142_v19  ;;  %v8924_v24 = vld [vmem:[#allocation12_spill] sm:$0xff]  ;;  %v8925_v49 = vld [vmem:[#allocation14_spill] sm:$0xff] }
 0x1fd   : > { %vm1816_vm9 = vcmp.lt.s32.totalorder %v1815_v59, %v1710_v48  ;;  %v1714_v60 = vsel %vm1586_vm5, %v8922_v54, 256  ;;  %vm1551_vm11 = vcmp.le.f32.partialorder %v8923_v0, %v6257_v18  ;;  %vm1602_vm12 = vcmp.le.f32.partialorder %v8924_v24, %v6142_v19  ;;  %v8929_v0 = vld [vmem:[#allocation15_spill] sm:$0xff]  ;;  %v8938_v2 = vld [vmem:[#allocation56_spill] sm:$0xff]  ;;  %v8939_v24 = vld [vmem:[#allocation86_spill] sm:$0xff] }
 0x1fe   : > { %v1817_v57 = vsel %vm1816_vm9, %v1815_v59, %v1710_v48  ;;  %vm1606_vm13 = vcmp.le.f32.partialorder %v8925_v49, %v6142_v19  ;;  %vm1610_vm14 = vcmp.le.f32.partialorder %v8926_v61, %v6142_v19  ;;  %v1718_v52 = vsel %vm1590_vm7, %v8927_v10, 256  ;;  %v8928_v48 = vld [vmem:[#allocation70_spill] sm:$0xff] }
 0x1ff   : > { %vm1818_vm15 = vcmp.lt.s32.totalorder %v1817_v57, %v1714_v60  ;;  %vm1555_vm0 = vcmp.le.f32.partialorder %v8928_v48, %v6257_v18  ;;  %vm1869_vm1 = vcmp.lt.s32.totalorder %v1671_v9, %v1675_v25  ;;  %vm1614_vm2 = vcmp.le.f32.partialorder %v8929_v0, %v6142_v19  ;;  %v8944_v61 = vld [vmem:[#allocation10_spill] sm:$0xff] }
 0x200   : > { %v1819_v7 = vsel %vm1818_vm15, %v1817_v57, %v1714_v60  ;;  %v1679_v59 = vsel %vm1551_vm11, %v5928_v17, 256  ;;  %v1870_v58 = vsel %vm1869_vm1, %v1671_v9, %v1675_v25  ;;  %v1722_v63 = vsel %vm1594_vm8, %v8930_v42, 256  ;;  %v8932_v57 = vld [vmem:[#allocation42_spill] sm:$0xff] }
 0x201   : > { %vm1820_vm3 = vcmp.lt.s32.totalorder %v1819_v7, %v1718_v52  ;;  %vm1559_vm4 = vcmp.le.f32.partialorder %v8931_v44, %v6257_v18  ;;  %vm1871_vm5 = vcmp.lt.s32.totalorder %v1870_v58, %v1679_v59  ;;  %vm1618_vm6 = vcmp.le.f32.partialorder %v8932_v57, %v6142_v19  ;;  %v8949_v57 = vld [vmem:[#allocation50_spill] sm:$0xff] }
 0x202   : > { %v1821_v46 = vsel %vm1820_vm3, %v1819_v7, %v1718_v52  ;;  %v1683_v60 = vsel %vm1555_vm0, %v8901_v14, 256  ;;  %v1872_v48 = vsel %vm1871_vm5, %v1870_v58, %v1679_v59  ;;  %v1726_v9 = vsel %vm1598_vm10, %v8933_v4, 256  ;;  %v8935_v7 = vld [vmem:[#allocation18_spill] sm:$0xff] }
 0x203   : > { %vm1822_vm7 = vcmp.lt.s32.totalorder %v1821_v46, %v1722_v63  ;;  %vm1563_vm8 = vcmp.le.f32.partialorder %v8934_v5, %v6257_v18  ;;  %vm1873_vm9 = vcmp.lt.s32.totalorder %v1872_v48, %v1683_v60  ;;  %vm1622_vm11 = vcmp.le.f32.partialorder %v8935_v7, %v6142_v19 }
 0x204   : > { %v1823_v25 = vsel %vm1822_vm7, %v1821_v46, %v1722_v63  ;;  %v1687_v52 = vsel %vm1559_vm4, %v5969_v33, 256  ;;  %v1874_v44 = vsel %vm1873_vm9, %v1872_v48, %v1683_v60  ;;  %vm1626_vm0 = vcmp.le.f32.partialorder %v8936_v1, %v6142_v19  ;;  %v8937_v63 = vld [vmem:[#allocation83_spill] sm:$0xff]  ;;  %v8954_v1 = vld [vmem:[#allocation41_spill] sm:$0xff] }
 0x205   : > { %vm1824_vm15 = vcmp.lt.s32.totalorder %v1823_v25, %v1726_v9  ;;  %v1730_v58 = vsel %vm1602_vm12, %v6074_v6, 256  ;;  %vm1567_vm10 = vcmp.le.f32.partialorder %v8937_v63, %v6257_v18  ;;  %vm1875_vm1 = vcmp.lt.s32.totalorder %v1874_v44, %v1687_v52 }
 0x206   : > { %v1825_v46 = vsel %vm1824_vm15, %v1823_v25, %v1726_v9  ;;  %vm1630_vm3 = vcmp.le.f32.partialorder %v8938_v2, %v6142_v19  ;;  %v1691_v59 = vsel %vm1563_vm8, %v5977_v55, 256  ;;  %v1876_v60 = vsel %vm1875_vm1, %v1874_v44, %v1687_v52  ;;  %v8940_v9 = vld [vmem:[#allocation29_spill] sm:$0xff]  ;;  %v8942_v44 = vld [vmem:[#allocation24_spill] sm:$0xff]  ;;  %v8955_v2 = vld [vmem:[#allocation22_spill] sm:$0xff] }
 0x207   : > { %vm1826_vm5 = vcmp.lt.s32.totalorder %v1825_v46, %v1730_v58  ;;  %v1734_v48 = vsel %vm1606_vm13, %v6077_v26, 256  ;;  %vm1571_vm12 = vcmp.le.f32.partialorder %v8939_v24, %v6257_v18  ;;  %vm1877_vm4 = vcmp.lt.s32.totalorder %v1876_v60, %v1691_v59 }
 0x208   : > { %v1827_v5 = vsel %vm1826_vm5, %v1825_v46, %v1730_v58  ;;  %vm1634_vm7 = vcmp.le.f32.partialorder %v8940_v9, %v6142_v19  ;;  %v1695_v25 = vsel %vm1567_vm10, %v5985_v28, 256  ;;  %v1878_v63 = vsel %vm1877_vm4, %v1876_v60, %v1691_v59  ;;  %v8943_v58 = vld [vmem:[#allocation94_spill] sm:$0xff] }
 0x209   : > { %vm1828_vm9 = vcmp.lt.s32.totalorder %v1827_v5, %v1734_v48  ;;  %vm1638_vm8 = vcmp.le.f32.partialorder %v8941_v62, %v6142_v19  ;;  %v1738_v49 = vsel %vm1610_vm14, %v6083_v53, 256  ;;  %vm1575_vm13 = vcmp.le.f32.partialorder %v8942_v44, %v6257_v18 }
 0x20a   : > { %v1829_v52 = vsel %vm1828_vm9, %v1827_v5, %v1734_v48  ;;  %vm1879_vm15 = vcmp.lt.s32.totalorder %v1878_v63, %v1695_v25  ;;  %vm1642_vm1 = vcmp.le.f32.partialorder %v8943_v58, %v6142_v19  ;;  %v1699_v46 = vsel %vm1571_vm12, %v6006_v27, 256  ;;  %v8945_v48 = vld [vmem:[#allocation39_spill] sm:$0xff] }
 0x20b   : > { %vm1830_vm5 = vcmp.lt.s32.totalorder %v1829_v52, %v1738_v49  ;;  %v1880_v59 = vsel %vm1879_vm15, %v1878_v63, %v1695_v25  ;;  %v1742_v60 = vsel %vm1614_vm2, %v6091_v36, 256  ;;  %vm1579_vm14 = vcmp.le.f32.partialorder %v8944_v61, %v6257_v18  ;;  %v8947_v63 = vld [vmem:[#allocation31_spill] sm:$0xff] }
 0x20c   : > { %v1831_v24 = vsel %vm1830_vm5, %v1829_v52, %v1738_v49  ;;  %vm1881_vm10 = vcmp.lt.s32.totalorder %v1880_v59, %v1699_v46  ;;  %vm1646_vm4 = vcmp.le.f32.partialorder %v8945_v48, %v6142_v19  ;;  %v1703_v5 = vsel %vm1575_vm13, %v6014_v21, 256  ;;  %v8948_v49 = vld [vmem:[#allocation97_spill] sm:$0xff] }
 0x20d   : > { %vm1832_vm9 = vcmp.lt.s32.totalorder %v1831_v24, %v1742_v60  ;;  %v1882_v44 = vsel %vm1881_vm10, %v1880_v59, %v1699_v46  ;;  %vm1650_vm12 = vcmp.le.f32.partialorder %v8946_v11, %v6142_v19  ;;  %v1746_v0 = vsel %vm1618_vm6, %v6107_v40, 256 }
 0x20e   : > { %v1833_v25 = vsel %vm1832_vm9, %v1831_v24, %v1742_v60  ;;  %vm1583_vm2 = vcmp.le.f32.partialorder %v8947_v63, %v6257_v18  ;;  %vm1883_vm15 = vcmp.lt.s32.totalorder %v1882_v44, %v1703_v5  ;;  %vm1654_vm5 = vcmp.le.f32.partialorder %v8948_v49, %v6142_v19  ;;  %v8950_v24 = vld [vmem:[#allocation16_spill] sm:$0xff] }
 0x20f   : > { %v1750_v52 = vsel %vm1622_vm11, %v6114_v38, 256  ;;  %vm1834_vm13 = vcmp.lt.s32.totalorder %v1833_v25, %v1746_v0  ;;  %v1707_v46 = vsel %vm1579_vm14, %v8914_v20, 256  ;;  %v1884_v59 = vsel %vm1883_vm15, %v1882_v44, %v1703_v5 }
 0x210   : > { %vm1658_vm6 = vcmp.le.f32.partialorder %v8949_v57, %v6142_v19  ;;  %v1835_v60 = vsel %vm1834_vm13, %v1833_v25, %v1746_v0  ;;  %vm1587_vm10 = vcmp.le.f32.partialorder %v8950_v24, %v6257_v18  ;;  %vm1885_vm9 = vcmp.lt.s32.totalorder %v1884_v59, %v1707_v46 }
 0x211   : > { %v8951_v61 = vrot.slane %v6270_v35, 4  ;;  %v1754_v7 = vsel %vm1626_vm0, %v6123_v39, 256  ;;  %vm1836_vm11 = vcmp.lt.s32.totalorder %v1835_v60, %v1750_v52  ;;  %v1711_v5 = vsel %vm1583_vm2, %v8919_v23, 256 }
 0x212   : > { %v1886_v44 = vsel %vm1885_vm9, %v1884_v59, %v1707_v46  ;;  %vm1662_vm14 = vcmp.le.f32.partialorder %v8952_v41, %v6142_v19  ;;  %v1758_v0 = vsel %vm1630_vm3, %v6131_v32, 256  ;;  %v1837_v25 = vsel %vm1836_vm11, %v1835_v60, %v1750_v52 }
 0x213   : > { %v1467_v63 = vmin.f32 %v6270_v35, %v8951_v61  ;;  %v8953_v35 = vld [vmem:[#allocation19_spill] sm:$0xff]  ;;  %vm1887_vm13 = vcmp.lt.s32.totalorder %v1886_v44, %v1711_v5  ;;  %vm1666_vm0 = vcmp.le.f32.partialorder %v8954_v1, %v6142_v19  ;;  %v1762_v46 = vsel %vm1634_vm7, %v6151_v13, 256  ;;  %v8963_v19 = vld [vmem:[#allocation30_spill] sm:$0xff] }
 0x214   : > { %vm1591_vm15 = vcmp.le.f32.partialorder %v8953_v35, %v6257_v18  ;;  %vm1838_vm2 = vcmp.lt.s32.totalorder %v1837_v25, %v1754_v7  ;;  %v1715_v59 = vsel %vm1587_vm10, %v8922_v54, 256  ;;  %v1888_v24 = vsel %vm1887_vm13, %v1886_v44, %v1711_v5  ;;  %v8956_v44 = vld [vmem:[#allocation93_spill] sm:$0xff] }
 0x215   : > { %v1839_v61 = vsel %vm1838_vm2, %v1837_v25, %v1754_v7  ;;  %vm1595_vm3 = vcmp.le.f32.partialorder %v8955_v2, %v6257_v18  ;;  %vm1889_vm9 = vcmp.lt.s32.totalorder %v1888_v24, %v1715_v59  ;;  %v1468_v52 = vrot.slane %v1467_v63, 2 }
 0x216   : > { %v1766_v60 = vsel %vm1638_vm8, %v6159_v16, 256  ;;  %vm1840_vm11 = vcmp.lt.s32.totalorder %v1839_v61, %v1758_v0  ;;  %v1719_v35 = vsel %vm1591_vm15, %v8927_v10, 256  ;;  %v1890_v9 = vsel %vm1889_vm9, %v1888_v24, %v1715_v59  ;;  %v8957_v24 = vld [vmem:[#allocation23_spill] sm:$0xff] }
 0x217   : > { %v1770_v5 = vsel %vm1642_vm1, %v6175_v56, 256  ;;  %v1841_v7 = vsel %vm1840_vm11, %v1839_v61, %v1758_v0  ;;  %vm1599_vm7 = vcmp.le.f32.partialorder %v8956_v44, %v6257_v18  ;;  %vm1891_vm10 = vcmp.lt.s32.totalorder %v1890_v9, %v1719_v35  ;;  %v8959_v44 = vld [vmem:[#allocation96_spill] sm:$0xff] }
 0x218   : > { %v1774_v62 = vsel %vm1646_vm4, %v6182_v8, 256  ;;  %vm1842_vm8 = vcmp.lt.s32.totalorder %v1841_v7, %v1762_v46  ;;  %v1723_v25 = vsel %vm1595_vm3, %v8930_v42, 256  ;;  %v1892_v2 = vsel %vm1891_vm10, %v1890_v9, %v1719_v35  ;;  %v8958_v9 = vld [vmem:[#allocation32_spill] sm:$0xff] }
 0x219   : > { %v1843_v59 = vsel %vm1842_vm8, %v1841_v7, %v1762_v46  ;;  %vm1603_vm15 = vcmp.le.f32.partialorder %v8957_v24, %v6257_v18  ;;  %vm1893_vm13 = vcmp.lt.s32.totalorder %v1892_v2, %v1723_v25  ;;  %v1469_v58 = vmin.f32 %v1467_v63, %v1468_v52  ;;  %v8961_v24 = vld [vmem:[#allocation43_spill] sm:$0xff] }
 0x21a   : > { %v1778_v0 = vsel %vm1650_vm12, %v6201_v34, 256  ;;  %vm1844_vm1 = vcmp.lt.s32.totalorder %v1843_v59, %v1766_v60  ;;  %v1727_v61 = vsel %vm1599_vm7, %v8933_v4, 256  ;;  %v1894_v48 = vsel %vm1893_vm13, %v1892_v2, %v1723_v25 }
 0x21b   : > { %v1782_v35 = vsel %vm1654_vm5, %v6204_v29, 256  ;;  %v1845_v46 = vsel %vm1844_vm1, %v1843_v59, %v1766_v60  ;;  %vm1607_vm4 = vcmp.le.f32.partialorder %v8958_v9, %v6257_v18  ;;  %vm1895_vm2 = vcmp.lt.s32.totalorder %v1894_v48, %v1727_v61  ;;  %v8960_v59 = vld [vmem:[#allocation27_spill] sm:$0xff] }
 0x21c   : > { %v1786_v11 = vsel %vm1658_vm6, %v6266_v37, 256  ;;  %vm1846_vm12 = vcmp.lt.s32.totalorder %v1845_v46, %v1770_v5  ;;  %v1731_v63 = vsel %vm1603_vm15, %v6074_v6, 256  ;;  %v1896_v52 = vsel %vm1895_vm2, %v1894_v48, %v1727_v61 }
 0x21d   : > { %v1847_v7 = vsel %vm1846_vm12, %v1845_v46, %v1770_v5  ;;  %vm1611_vm3 = vcmp.le.f32.partialorder %v8959_v44, %v6257_v18  ;;  %vm1897_vm9 = vcmp.lt.s32.totalorder %v1896_v52, %v1731_v63  ;;  %v1470_v49 = vrot.slane %v1469_v58, 1  ;;  %v8962_v46 = vld [vmem:[#allocation99_spill] sm:$0xff] }
 0x21e   : > { %v1790_v60 = vsel %vm1662_vm14, %v6274_v45, 256  ;;  %vm1848_vm5 = vcmp.lt.s32.totalorder %v1847_v7, %v1774_v62  ;;  %v1735_v25 = vsel %vm1607_vm4, %v6077_v26, 256  ;;  %v1898_v57 = vsel %vm1897_vm9, %v1896_v52, %v1731_v63  ;;  %v8964_v52 = vld [vmem:[#allocation100_spill] sm:$0xff] }
 0x21f   : > { %v1794_v2 = vsel %vm1666_vm0, %v6287_v50, 256  ;;  %v1849_v5 = vsel %vm1848_vm5, %v1847_v7, %v1774_v62  ;;  %vm1615_vm6 = vcmp.le.f32.partialorder %v8960_v59, %v6257_v18  ;;  %vm1899_vm11 = vcmp.lt.s32.totalorder %v1898_v57, %v1735_v25  ;;  %v8965_v7 = vld [vmem:[#allocation36_spill] sm:$0xff] }
 0x220   : > { %vm1850_vm7 = vcmp.lt.s32.totalorder %v1849_v5, %v1778_v0  ;;  %vm1619_vm10 = vcmp.le.f32.partialorder %v8961_v24, %v6257_v18  ;;  %v1739_v41 = vsel %vm1611_vm3, %v6083_v53, 256  ;;  %v1900_v61 = vsel %vm1899_vm11, %v1898_v57, %v1735_v25  ;;  %v8968_v57 = vld [vmem:[#allocation53_spill] sm:$0xff] }
 0x221   : > { %v1851_v48 = vsel %vm1850_vm7, %v1849_v5, %v1778_v0  ;;  %vm1623_vm14 = vcmp.le.f32.partialorder %v8962_v46, %v6257_v18  ;;  %vm1901_vm8 = vcmp.lt.s32.totalorder %v1900_v61, %v1739_v41  ;;  %v6473_v9 = vmin.f32 %v1469_v58, %v1470_v49  ;;  %v910_v0 = vpop.f32.mrf.mxu3  ;;  %v8966_v58 = vld [vmem:[#allocation103_spill] sm:$0xff]  ;;  %v8969_v24 = vld [vmem:[#allocation105_spill] sm:$0xff] }
 0x222   : > { %vm1852_vm0 = vcmp.lt.s32.totalorder %v1851_v48, %v1782_v35  ;;  %vm1627_vm15 = vcmp.le.f32.partialorder %v8963_v19, %v6257_v18  ;;  %v1743_v1 = vsel %vm1615_vm6, %v6091_v36, 256  ;;  %v1902_v62 = vsel %vm1901_vm8, %v1900_v61, %v1739_v41 }
 0x223   : > { %v1853_v63 = vsel %vm1852_vm0, %v1851_v48, %v1782_v35  ;;  %vm1631_vm13 = vcmp.le.f32.partialorder %v8964_v52, %v6257_v18  ;;  %vm1635_vm1 = vcmp.le.f32.partialorder %v8965_v7, %v6257_v18  ;;  %vm1903_vm4 = vcmp.lt.s32.totalorder %v1902_v62, %v1743_v1  ;;  %v8967_v35 = vld [vmem:[#allocation52_spill] sm:$0xff] }
 0x224   : > { %vm1854_vm2 = vcmp.lt.s32.totalorder %v1853_v63, %v1786_v11  ;;  %vm1639_vm12 = vcmp.le.f32.partialorder %v8966_v58, %v6257_v18  ;;  %v1747_v44 = vsel %vm1619_vm10, %v6107_v40, 256  ;;  %v1904_v49 = vsel %vm1903_vm4, %v1902_v62, %v1743_v1 }
 0x225   : > { %v1855_v25 = vsel %vm1854_vm2, %v1853_v63, %v1786_v11  ;;  %vm1905_vm3 = vcmp.lt.s32.totalorder %v1904_v49, %v1747_v44  ;;  %vm1544_vm9 = vcmp.le.f32.partialorder %v8967_v35, %v6473_v9  ;;  %vm1548_vm5 = vcmp.le.f32.partialorder %v8968_v57, %v6473_v9  ;;  %v8970_v63 = vld [vmem:[#allocation40_spill] sm:$0xff] }
 0x226   : > { %vm1856_vm6 = vcmp.lt.s32.totalorder %v1855_v25, %v1790_v60  ;;  %v1751_v5 = vsel %vm1623_vm14, %v6114_v38, 256  ;;  %v1906_v59 = vsel %vm1905_vm3, %v1904_v49, %v1747_v44  ;;  %v1072_v41 = vmul.f32 2.0, %v910_v0  ;;  %v8973_v49 = vld [vmem:[#allocation63_spill] sm:$0xff] }
 0x227   : > { %v1857_v61 = vsel %vm1856_vm6, %v1855_v25, %v1790_v60  ;;  %vm1643_vm11 = vcmp.le.f32.partialorder %v8969_v24, %v6257_v18  ;;  %v1755_v11 = vsel %vm1627_vm15, %v6123_v39, 256  ;;  %vm1907_vm7 = vcmp.lt.s32.totalorder %v1906_v59, %v1751_v5  ;;  %v8971_v60 = vld [vmem:[#allocation59_spill] sm:$0xff] }
 0x228   : > { %vm1858_vm10 = vcmp.lt.s32.totalorder %v1857_v61, %v1794_v2  ;;  %v1908_v48 = vsel %vm1907_vm7, %v1906_v59, %v1751_v5  ;;  %v1672_v1 = vsel %vm1544_vm9, %v5750_v15, 256  ;;  %v1676_v62 = vsel %vm1548_vm5, %v5794_v30, 256  ;;  %v8974_v5 = vld [vmem:[#allocation67_spill] sm:$0xff] }
 0x229   : > { %v6504_v46 = vsel %vm1858_vm10, %v1857_v61, %v1794_v2  ;;  %vm1647_vm14 = vcmp.le.f32.partialorder %v8970_v63, %v6257_v18  ;;  %vm1909_vm8 = vcmp.lt.s32.totalorder %v1908_v48, %v1755_v11  ;;  %vm1552_vm0 = vcmp.le.f32.partialorder %v8971_v60, %v6473_v9  ;;  %v8972_v2 = vld [vmem:[#allocation44_spill] sm:$0xff] }
 0x22a   : > { %vm1651_vm4 = vcmp.le.f32.partialorder %v6025_v47, %v6257_v18  ;;  %v1759_v19 = vsel %vm1631_vm13, %v6131_v32, 256  ;;  %v1910_v0 = vsel %vm1909_vm8, %v1908_v48, %v1755_v11  ;;  %v6517_v44 = vsub.f32 %v5962_v43, %v1072_v41  ;;  %v8975_v11 = vld [vmem:[#allocation113_spill] sm:$0xff]  ;;  %v8976_v48 = vld [vmem:[#allocation72_spill] sm:$0xff] }
 0x22b   : > { %vm1655_vm15 = vcmp.le.f32.partialorder %v8972_v2, %v6257_v18  ;;  %vm1911_vm2 = vcmp.lt.s32.totalorder %v1910_v0, %v1759_v19  ;;  %vm1556_vm3 = vcmp.le.f32.partialorder %v8973_v49, %v6473_v9  ;;  %vm1940_vm9 = vcmp.lt.s32.totalorder %v1672_v1, %v1676_v62 }
 0x22c   : > { %v1763_v25 = vsel %vm1635_vm1, %v6151_v13, 256  ;;  %v1912_v35 = vsel %vm1911_vm2, %v1910_v0, %v1759_v19  ;;  %v1680_v52 = vsel %vm1552_vm0, %v5928_v17, 256  ;;  %v1941_v57 = vsel %vm1940_vm9, %v1672_v1, %v1676_v62  ;;  %v8977_v19 = vld [vmem:[#allocation77_spill] sm:$0xff] }
 0x22d   : > { %v1767_v43 = vsel %vm1639_vm12, %v6159_v16, 256  ;;  %vm1913_vm13 = vcmp.lt.s32.totalorder %v1912_v35, %v1763_v25  ;;  %vm1560_vm5 = vcmp.le.f32.partialorder %v8974_v5, %v6473_v9  ;;  %vm1942_vm6 = vcmp.lt.s32.totalorder %v1941_v57, %v1680_v52 }
 0x22e   : > { %v1914_v59 = vsel %vm1913_vm13, %v1912_v35, %v1763_v25  ;;  %v1684_v41 = vsel %vm1556_vm3, %v8901_v14, 256  ;;  %v1943_v61 = vsel %vm1942_vm6, %v1941_v57, %v1680_v52  ;;  %v1502_v7 = vmin.f32 %v6284_v51, %v6517_v44  ;;  %v8978_v35 = vld [vmem:[#allocation61_spill] sm:$0xff]  ;;  %v8979_v52 = vld [vmem:[#allocation82_spill] sm:$0xff] }
 0x22f   : > { %vm1659_vm1 = vcmp.le.f32.partialorder %v8975_v11, %v6257_v18  ;;  %vm1915_vm7 = vcmp.lt.s32.totalorder %v1914_v59, %v1767_v43  ;;  %vm1564_vm10 = vcmp.le.f32.partialorder %v8976_v48, %v6473_v9  ;;  %vm1944_vm12 = vcmp.lt.s32.totalorder %v1943_v61, %v1684_v41 }
 0x230   : > { %v1771_v58 = vsel %vm1643_vm11, %v6175_v56, 256  ;;  %v1916_v1 = vsel %vm1915_vm7, %v1914_v59, %v1767_v43  ;;  %v1688_v62 = vsel %vm1560_vm5, %v5969_v33, 256  ;;  %v1945_v60 = vsel %vm1944_vm12, %v1943_v61, %v1684_v41  ;;  %v8980_v41 = vld [vmem:[#allocation88_spill] sm:$0xff] }
 0x231   : > { %v1775_v51 = vsel %vm1647_vm14, %v6182_v8, 256  ;;  %vm1917_vm8 = vcmp.lt.s32.totalorder %v1916_v1, %v1771_v58  ;;  %vm1568_vm0 = vcmp.le.f32.partialorder %v8977_v19, %v6473_v9  ;;  %vm1946_vm2 = vcmp.lt.s32.totalorder %v1945_v60, %v1688_v62  ;;  %v8982_v19 = vld [vmem:[#allocation13_spill] sm:$0xff] }
 0x232   : > { %v1918_v0 = vsel %vm1917_vm8, %v1916_v1, %v1771_v58  ;;  %v1692_v49 = vsel %vm1564_vm10, %v5977_v55, 256  ;;  %v1947_v25 = vsel %vm1946_vm2, %v1945_v60, %v1688_v62  ;;  %v1503_v24 = vrot.slane %v1502_v7, 4  ;;  %v8981_v1 = vld [vmem:[#allocation91_spill] sm:$0xff] }
 0x233   : > { %vm1663_vm11 = vcmp.le.f32.partialorder %v8978_v35, %v6257_v18  ;;  %vm1919_vm3 = vcmp.lt.s32.totalorder %v1918_v0, %v1775_v51  ;;  %vm1572_vm9 = vcmp.le.f32.partialorder %v8979_v52, %v6473_v9  ;;  %vm1948_vm13 = vcmp.lt.s32.totalorder %v1947_v25, %v1692_v49 }
 0x234   : > { %v1779_v63 = vsel %vm1651_vm4, %v6201_v34, 256  ;;  %v1920_v57 = vsel %vm1919_vm3, %v1918_v0, %v1775_v51  ;;  %v1696_v43 = vsel %vm1568_vm0, %v5985_v28, 256  ;;  %v1949_v5 = vsel %vm1948_vm13, %v1947_v25, %v1692_v49 }
 0x235   : > { %v1783_v59 = vsel %vm1655_vm15, %v6204_v29, 256  ;;  %vm1921_vm14 = vcmp.lt.s32.totalorder %v1920_v57, %v1779_v63  ;;  %vm1576_vm5 = vcmp.le.f32.partialorder %v8980_v41, %v6473_v9  ;;  %vm1950_vm6 = vcmp.lt.s32.totalorder %v1949_v5, %v1696_v43 }
 0x236   : > { %v1922_v61 = vsel %vm1921_vm14, %v1920_v57, %v1779_v63  ;;  %v1700_v48 = vsel %vm1572_vm9, %v6006_v27, 256  ;;  %v1951_v58 = vsel %vm1950_vm6, %v1949_v5, %v1696_v43  ;;  %v1504_v47 = vmin.f32 %v1502_v7, %v1503_v24  ;;  %v8983_v24 = vld [vmem:[#allocation38_spill] sm:$0xff] }
 0x237   : > { %vm1667_vm4 = vcmp.le.f32.partialorder %v6088_v22, %v6257_v18  ;;  %vm1923_vm7 = vcmp.lt.s32.totalorder %v1922_v61, %v1783_v59  ;;  %vm1580_vm10 = vcmp.le.f32.partialorder %v8981_v1, %v6473_v9  ;;  %vm1952_vm12 = vcmp.lt.s32.totalorder %v1951_v58, %v1700_v48  ;;  %v8984_v43 = vld [vmem:[#allocation46_spill] sm:$0xff] }
 0x238   : > { %v1787_v2 = vsel %vm1659_vm1, %v6266_v37, 256  ;;  %v1924_v62 = vsel %vm1923_vm7, %v1922_v61, %v1783_v59  ;;  %v1704_v60 = vsel %vm1576_vm5, %v6014_v21, 256  ;;  %v1953_v51 = vsel %vm1952_vm12, %v1951_v58, %v1700_v48  ;;  %v8985_v48 = vld [vmem:[#allocation21_spill] sm:$0xff]  ;;  %v8986_v58 = vld [vmem:[#allocation35_spill] sm:$0xff] }
 0x239   : > { %v1791_v7 = vsel %vm1663_vm11, %v6274_v45, 256  ;;  %vm1925_vm15 = vcmp.lt.s32.totalorder %v1924_v62, %v1787_v2  ;;  %vm1584_vm8 = vcmp.le.f32.partialorder %v8982_v19, %v6473_v9  ;;  %vm1954_vm0 = vcmp.lt.s32.totalorder %v1953_v51, %v1704_v60 }
 0x23a   : > { %v1926_v0 = vsel %vm1925_vm15, %v1924_v62, %v1787_v2  ;;  %v1708_v49 = vsel %vm1580_vm10, %v8914_v20, 256  ;;  %v1955_v25 = vsel %vm1954_vm0, %v1953_v51, %v1704_v60  ;;  %v1505_v11 = vrot.slane %v1504_v47, 2  ;;  %v8987_v60 = vld [vmem:[#allocation47_spill] sm:$0xff] }
 0x23b   : > { %vm1927_vm1 = vcmp.lt.s32.totalorder %v1926_v0, %v1791_v7  ;;  %vm1588_vm2 = vcmp.le.f32.partialorder %v8983_v24, %v6473_v9  ;;  %vm1956_vm3 = vcmp.lt.s32.totalorder %v1955_v25, %v1708_v49  ;;  %v1795_v35 = vsel %vm1667_vm4, %v6287_v50, 256 }
 0x23c   : > { %v1928_v52 = vsel %vm1927_vm1, %v1926_v0, %v1791_v7  ;;  %v1712_v63 = vsel %vm1584_vm8, %v8919_v23, 256  ;;  %v1957_v57 = vsel %vm1956_vm3, %v1955_v25, %v1708_v49  ;;  %vm1592_vm9 = vcmp.le.f32.partialorder %v8984_v43, %v6473_v9  ;;  %v8988_v7 = vld [vmem:[#allocation101_spill] sm:$0xff]  ;;  %v8989_v25 = vld [vmem:[#allocation104_spill] sm:$0xff]  ;;  %v8992_v43 = vld [vmem:[#allocation55_spill] sm:$0xff] }
 0x23d   : > { %vm1929_vm11 = vcmp.lt.s32.totalorder %v1928_v52, %v1795_v35  ;;  %vm1958_vm13 = vcmp.lt.s32.totalorder %v1957_v57, %v1712_v63  ;;  %v1716_v59 = vsel %vm1588_vm2, %v8922_v54, 256  ;;  %v1506_v61 = vmin.f32 %v1504_v47, %v1505_v11 }
 0x23e   : > { %v6594_v5 = vsel %vm1929_vm11, %v1928_v52, %v1795_v35  ;;  %v1959_v41 = vsel %vm1958_vm13, %v1957_v57, %v1712_v63  ;;  %vm1596_vm14 = vcmp.le.f32.partialorder %v8985_v48, %v6473_v9  ;;  %v1720_v22 = vsel %vm1592_vm9, %v8927_v10, 256  ;;  %v8990_v35 = vld [vmem:[#allocation108_spill] sm:$0xff]  ;;  %v8991_v57 = vld [vmem:[#allocation54_spill] sm:$0xff]  ;;  %v8994_v48 = vld [vmem:[#allocation117_spill] sm:$0xff] }
 0x23f   : > { %vm1960_vm5 = vcmp.lt.s32.totalorder %v1959_v41, %v1716_v59  ;;  %vm1600_vm6 = vcmp.le.f32.partialorder %v8986_v58, %v6473_v9  ;;  %v1724_v1 = vsel %vm1596_vm14, %v8930_v42, 256  ;;  %v1507_v62 = vrot.slane %v1506_v61, 1  ;;  %v8995_v58 = vld [vmem:[#allocation119_spill] sm:$0xff] }
 0x240   : > { %v1961_v18 = vsel %vm1960_vm5, %v1959_v41, %v1716_v59  ;;  %vm1604_vm7 = vcmp.le.f32.partialorder %v8987_v60, %v6473_v9  ;;  %v1728_v47 = vsel %vm1600_vm6, %v8933_v4, 256  ;;  %vm1608_vm12 = vcmp.le.f32.partialorder %v8988_v7, %v6473_v9  ;;  %v8993_v59 = vld [vmem:[#allocation114_spill] sm:$0xff]  ;;  %v8997_v60 = vld [vmem:[#allocation121_spill] sm:$0xff] }
 0x241   : > { %vm1962_vm4 = vcmp.lt.s32.totalorder %v1961_v18, %v1720_v22  ;;  %v1732_v19 = vsel %vm1604_vm7, %v6074_v6, 256  ;;  %v6609_v49 = vmin.f32 %v1506_v61, %v1507_v62  ;;  %vm1612_vm8 = vcmp.le.f32.partialorder %v8989_v25, %v6473_v9  ;;  %v8996_v62 = vld [vmem:[#allocation60_spill] sm:$0xff] }
 0x242   : > { %v1963_v2 = vsel %vm1962_vm4, %v1961_v18, %v1720_v22  ;;  %v1736_v11 = vsel %vm1608_vm12, %v6077_v26, 256  ;;  %vm1616_vm1 = vcmp.le.f32.partialorder %v8990_v35, %v6473_v9  ;;  %v1740_v52 = vsel %vm1612_vm8, %v6083_v53, 256  ;;  %v9001_v35 = vld [vmem:[#allocation126_spill] sm:$0xff] }
 0x243   : > { %vm1964_vm10 = vcmp.lt.s32.totalorder %v1963_v2, %v1724_v1  ;;  %vm1545_vm3 = vcmp.le.f32.partialorder %v8991_v57, %v6609_v49  ;;  %vm1549_vm11 = vcmp.le.f32.partialorder %v8992_v43, %v6609_v49  ;;  %vm1620_vm9 = vcmp.le.f32.partialorder %v8993_v59, %v6473_v9 }
 0x244   : > { %v1965_v51 = vsel %vm1964_vm10, %v1963_v2, %v1724_v1  ;;  %vm1624_vm13 = vcmp.le.f32.partialorder %v6095_v31, %v6473_v9  ;;  %vm1628_vm5 = vcmp.le.f32.partialorder %v6110_v12, %v6473_v9  ;;  %vm1632_vm6 = vcmp.le.f32.partialorder %v6126_v3, %v6473_v9 }
 0x245   : > { %vm1966_vm15 = vcmp.lt.s32.totalorder %v1965_v51, %v1728_v47  ;;  %v1744_v41 = vsel %vm1616_vm1, %v6091_v36, 256  ;;  %vm1636_vm4 = vcmp.le.f32.partialorder %v8994_v48, %v6473_v9  ;;  %v1673_v22 = vsel %vm1545_vm3, %v5750_v15, 256 }
 0x246   : > { %v1967_v0 = vsel %vm1966_vm15, %v1965_v51, %v1728_v47  ;;  %v1677_v18 = vsel %vm1549_vm11, %v5794_v30, 256  ;;  %vm1640_vm10 = vcmp.le.f32.partialorder %v8995_v58, %v6473_v9  ;;  %v1748_v1 = vsel %vm1620_vm9, %v6107_v40, 256  ;;  %v8998_v47 = vld [vmem:[#allocation122_spill] sm:$0xff]  ;;  %v8999_v51 = vld [vmem:[#allocation124_spill] sm:$0xff] }
 0x247   : > { %vm1968_vm0 = vcmp.lt.s32.totalorder %v1967_v0, %v1732_v19  ;;  %vm1553_vm12 = vcmp.le.f32.partialorder %v8996_v62, %v6609_v49  ;;  %vm1644_vm15 = vcmp.le.f32.partialorder %v8997_v60, %v6473_v9  ;;  %vm1648_vm8 = vcmp.le.f32.partialorder %v8998_v47, %v6473_v9 }
 0x248   : > { %v1969_v24 = vsel %vm1968_vm0, %v1967_v0, %v1732_v19  ;;  %vm1652_vm0 = vcmp.le.f32.partialorder %v8999_v51, %v6473_v9  ;;  %v1752_v7 = vsel %vm1624_vm13, %v6114_v38, 256  ;;  %v9000_v0 = vld [vmem:[#allocation65_spill] sm:$0xff]  ;;  %vm2011_vm3 = vcmp.lt.s32.totalorder %v1673_v22, %v1677_v18 }
 0x249   : > { %vm1970_vm2 = vcmp.lt.s32.totalorder %v1969_v24, %v1736_v11  ;;  %v1756_v25 = vsel %vm1628_vm5, %v6123_v39, 256  ;;  %vm1656_vm9 = vcmp.le.f32.partialorder %v9001_v35, %v6473_v9  ;;  %v1760_v31 = vsel %vm1632_vm6, %v6131_v32, 256 }
 0x24a   : > { %v1971_v63 = vsel %vm1970_vm2, %v1969_v24, %v1736_v11  ;;  %vm1557_vm2 = vcmp.le.f32.partialorder %v9000_v0, %v6609_v49  ;;  %v1681_v11 = vsel %vm1553_vm12, %v5928_v17, 256  ;;  %v2012_v24 = vsel %vm2011_vm3, %v1673_v22, %v1677_v18  ;;  %v9004_v22 = vld [vmem:[#allocation37_spill] sm:$0xff] }
 0x24b   : > { %vm1972_vm14 = vcmp.lt.s32.totalorder %v1971_v63, %v1740_v52  ;;  %v1764_v12 = vsel %vm1636_vm4, %v6151_v13, 256  ;;  %v1685_v57 = vsel %vm1557_vm2, %v8901_v14, 256  ;;  %v1768_v3 = vsel %vm1640_vm10, %v6159_v16, 256 }
 0x24c   : > { %v1973_v61 = vsel %vm1972_vm14, %v1971_v63, %v1740_v52  ;;  %v9002_v63 = vld [vmem:[#allocation69_spill] sm:$0xff]  ;;  %vm2013_vm14 = vcmp.lt.s32.totalorder %v2012_v24, %v1681_v11  ;;  %vm1660_vm12 = vcmp.le.f32.partialorder %v9004_v22, %v6473_v9  ;;  %v1772_v58 = vsel %vm1644_vm15, %v6175_v56, 256 }
 0x24d   : > { %vm1974_vm7 = vcmp.lt.s32.totalorder %v1973_v61, %v1744_v41  ;;  %vm1561_vm13 = vcmp.le.f32.partialorder %v9002_v63, %v6609_v49  ;;  %v2014_v43 = vsel %vm2013_vm14, %v2012_v24, %v1681_v11  ;;  %v1931_v62 = vrot.slane %v6594_v5, 4  ;;  %v9007_v11 = vld [vmem:[#allocation85_spill] sm:$0xff]  ;;  %v9008_v24 = vld [vmem:[#allocation75_spill] sm:$0xff] }
 0x24e   : > { %v1975_v2 = vsel %vm1974_vm7, %v1973_v61, %v1744_v41  ;;  %v9003_v41 = vld [vmem:[#allocation74_spill] sm:$0xff]  ;;  %vm2015_vm7 = vcmp.lt.s32.totalorder %v2014_v43, %v1685_v57  ;;  %v1860_v61 = vrot.slane %v6504_v46, 4  ;;  %v1689_v48 = vsel %vm1561_vm13, %v5969_v33, 256 }
 0x24f   : > { %vm1976_vm1 = vcmp.lt.s32.totalorder %v1975_v2, %v1748_v1  ;;  %vm1565_vm6 = vcmp.le.f32.partialorder %v9003_v41, %v6609_v49  ;;  %v2016_v18 = vsel %vm2015_vm7, %v2014_v43, %v1685_v57  ;;  %v1776_v60 = vsel %vm1648_vm8, %v6182_v8, 256 }
 0x250   : > { %v1977_v19 = vsel %vm1976_vm1, %v1975_v2, %v1748_v1  ;;  %v9005_v2 = vld [vmem:[#allocation80_spill] sm:$0xff]  ;;  %vm2017_vm1 = vcmp.lt.s32.totalorder %v2016_v18, %v1689_v48  ;;  %vm1573_vm15 = vcmp.le.f32.partialorder %v9007_v11, %v6609_v49  ;;  %vm1861_vm13 = vcmp.lt.s32.totalorder %v6504_v46, %v1860_v61 }
 0x251   : > { %vm1978_vm11 = vcmp.lt.s32.totalorder %v1977_v19, %v1752_v7  ;;  %vm1569_vm10 = vcmp.le.f32.partialorder %v9005_v2, %v6609_v49  ;;  %v2018_v0 = vsel %vm2017_vm1, %v2016_v18, %v1689_v48  ;;  %vm1668_vm14 = vcmp.le.f32.partialorder %v9008_v24, %v6473_v9  ;;  %v9010_v48 = vld [vmem:[#allocation28_spill] sm:$0xff] }
 0x252   : > { %v1979_v52 = vsel %vm1978_vm11, %v1977_v19, %v1752_v7  ;;  %v9006_v7 = vld [vmem:[#allocation71_spill] sm:$0xff]  ;;  %v1693_v19 = vsel %vm1565_vm6, %v5977_v55, 256  ;;  %v1780_v47 = vsel %vm1652_vm0, %v6201_v34, 256  ;;  %vm1932_vm7 = vcmp.lt.s32.totalorder %v6594_v5, %v1931_v62 }
 0x253   : > { %vm1980_vm5 = vcmp.lt.s32.totalorder %v1979_v52, %v1756_v25  ;;  %vm1664_vm2 = vcmp.le.f32.partialorder %v9006_v7, %v6473_v9  ;;  %vm2019_vm11 = vcmp.lt.s32.totalorder %v2018_v0, %v1693_v19  ;;  %v1701_v57 = vsel %vm1573_vm15, %v6006_v27, 256 }
 0x254   : > { %v1981_v59 = vsel %vm1980_vm5, %v1979_v52, %v1756_v25  ;;  %v2020_v52 = vsel %vm2019_vm11, %v2018_v0, %v1693_v19  ;;  %v1784_v51 = vsel %vm1656_vm9, %v6204_v29, 256  ;;  %v9011_v19 = vld [vmem:[#allocation34_spill] sm:$0xff]  ;;  %v1788_v35 = vsel %vm1660_vm12, %v6266_v37, 256 }
 0x255   : > { %vm1982_vm4 = vcmp.lt.s32.totalorder %v1981_v59, %v1760_v31  ;;  %v1792_v11 = vsel %vm1664_vm2, %v6274_v45, 256 }
 0x256   : > { %v1983_v1 = vsel %vm1982_vm4, %v1981_v59, %v1760_v31  ;;  %v1697_v31 = vsel %vm1569_vm10, %v5985_v28, 256  ;;  %v1862_v59 = vsel %vm1861_vm13, %v6504_v46, %v1860_v61  ;;  %vm1581_vm10 = vcmp.le.f32.partialorder %v9010_v48, %v6609_v49 }
 0x257   : > { %vm1984_vm3 = vcmp.lt.s32.totalorder %v1983_v1, %v1764_v12  ;;  %vm2021_vm6 = vcmp.lt.s32.totalorder %v2020_v52, %v1697_v31  ;;  %v1863_v46 = vrot.slane %v1862_v59, 2  ;;  %v1709_v61 = vsel %vm1581_vm10, %v8914_v20, 256 }
 0x258   : > { %v1985_v25 = vsel %vm1984_vm3, %v1983_v1, %v1764_v12  ;;  %v9009_v12 = vld [vmem:[#allocation90_spill] sm:$0xff]  ;;  %v2022_v43 = vsel %vm2021_vm6, %v2020_v52, %v1697_v31  ;;  %v1933_v1 = vsel %vm1932_vm7, %v6594_v5, %v1931_v62  ;;  %vm1585_vm3 = vcmp.le.f32.partialorder %v9011_v19, %v6609_v49  ;;  %v9013_v52 = vld [vmem:[#allocation20_spill] sm:$0xff] }
 0x259   : > { %vm1986_vm5 = vcmp.lt.s32.totalorder %v1985_v25, %v1768_v3  ;;  %vm1577_vm8 = vcmp.le.f32.partialorder %v9009_v12, %v6609_v49  ;;  %vm2023_vm1 = vcmp.lt.s32.totalorder %v2022_v43, %v1701_v57  ;;  %v1934_v5 = vrot.slane %v1933_v1, 2 }
 0x25a   : > { %v1987_v63 = vsel %vm1986_vm5, %v1985_v25, %v1768_v3  ;;  %v1705_v3 = vsel %vm1577_vm8, %v6014_v21, 256  ;;  %v2024_v18 = vsel %vm2023_vm1, %v2022_v43, %v1701_v57  ;;  %v9012_v25 = vld [vmem:[#allocation17_spill] sm:$0xff]  ;;  %v1713_v62 = vsel %vm1585_vm3, %v8919_v23, 256 }
 0x25b   : > { %vm1988_vm4 = vcmp.lt.s32.totalorder %v1987_v63, %v1772_v58  ;;  %vm2025_vm15 = vcmp.lt.s32.totalorder %v2024_v18, %v1705_v3  ;;  %vm1589_vm9 = vcmp.le.f32.partialorder %v9012_v25, %v6609_v49  ;;  %vm1593_vm8 = vcmp.le.f32.partialorder %v9013_v52, %v6609_v49  ;;  %v9014_v57 = vld [vmem:[#allocation25_spill] sm:$0xff] }
 0x25c   : > { %v1989_v41 = vsel %vm1988_vm4, %v1987_v63, %v1772_v58  ;;  %v2026_v58 = vsel %vm2025_vm15, %v2024_v18, %v1705_v3  ;;  %vm1864_vm6 = vcmp.lt.s32.totalorder %v1862_v59, %v1863_v46  ;;  %v1717_v22 = vsel %vm1589_vm9, %v8922_v54, 256 }
 0x25d   : > { %vm1990_vm0 = vcmp.lt.s32.totalorder %v1989_v41, %v1776_v60  ;;  %vm2027_vm13 = vcmp.lt.s32.totalorder %v2026_v58, %v1709_v61  ;;  %v1796_v63 = vsel %vm1668_vm14, %v6287_v50, 256  ;;  %vm1597_vm4 = vcmp.le.f32.partialorder %v9014_v57, %v6609_v49  ;;  %v9022_v57 = vld [vmem:[#allocation115_spill] sm:$0xff] }
 0x25e   : > { %v1991_v2 = vsel %vm1990_vm0, %v1989_v41, %v1776_v60  ;;  %v2028_v60 = vsel %vm2027_vm13, %v2026_v58, %v1709_v61  ;;  %vm1935_vm10 = vcmp.lt.s32.totalorder %v1933_v1, %v1934_v5  ;;  %v1721_v7 = vsel %vm1593_vm8, %v8927_v10, 256 }
 0x25f   : > { %vm1992_vm11 = vcmp.lt.s32.totalorder %v1991_v2, %v1780_v47  ;;  %vm2029_vm12 = vcmp.lt.s32.totalorder %v2028_v60, %v1713_v62  ;;  %v1865_v41 = vsel %vm1864_vm6, %v1862_v59, %v1863_v46  ;;  %v1725_v9 = vsel %vm1597_vm4, %v8930_v42, 256  ;;  %v9017_v46 = vld [vmem:[#allocation102_spill] sm:$0xff] }
 0x260   : > { %v1993_v0 = vsel %vm1992_vm11, %v1991_v2, %v1780_v47  ;;  %v2030_v47 = vsel %vm2029_vm12, %v2028_v60, %v1713_v62  ;;  %v1936_v3 = vsel %vm1935_vm10, %v1933_v1, %v1934_v5  ;;  %v9016_v2 = vld [vmem:[#allocation98_spill] sm:$0xff]  ;;  %v1866_v19 = vrot.slane %v1865_v41, 1 }
 0x261   : > { %vm1994_vm5 = vcmp.lt.s32.totalorder %v1993_v0, %v1784_v51  ;;  %vm2031_vm2 = vcmp.lt.s32.totalorder %v2030_v47, %v1717_v22  ;;  %vm1605_vm14 = vcmp.le.f32.partialorder %v9016_v2, %v6609_v49  ;;  %vm1609_vm9 = vcmp.le.f32.partialorder %v9017_v46, %v6609_v49  ;;  %v9018_v5 = vld [vmem:[#allocation106_spill] sm:$0xff] }
 0x262   : > { %v1995_v31 = vsel %vm1994_vm5, %v1993_v0, %v1784_v51  ;;  %v2032_v43 = vsel %vm2031_vm2, %v2030_v47, %v1717_v22  ;;  %v9015_v51 = vld [vmem:[#allocation95_spill] sm:$0xff]  ;;  %v1733_v0 = vsel %vm1605_vm14, %v6074_v6, 256  ;;  %vm1613_vm8 = vcmp.le.f32.partialorder %v9018_v5, %v6609_v49  ;;  %v9026_v2 = vld [vmem:[#allocation62_spill] sm:$0xff]  ;;  %v9029_v5 = vld [vmem:[#allocation73_spill] sm:$0xff] }
 0x263   : > { %vm1996_vm7 = vcmp.lt.s32.totalorder %v1995_v31, %v1788_v35  ;;  %vm1601_vm0 = vcmp.le.f32.partialorder %v9015_v51, %v6609_v49  ;;  %vm2033_vm3 = vcmp.lt.s32.totalorder %v2032_v43, %v1721_v7  ;;  %vm1867_vm6 = vcmp.lt.s32.totalorder %v1865_v41, %v1866_v19  ;;  %v9023_v51 = vld [vmem:[#allocation116_spill] sm:$0xff] }
 0x264   : > { %v1997_v12 = vsel %vm1996_vm7, %v1995_v31, %v1788_v35  ;;  %v2034_v24 = vsel %vm2033_vm3, %v2032_v43, %v1721_v7  ;;  %v1729_v58 = vsel %vm1601_vm0, %v8933_v4, 256  ;;  %v1937_v35 = vrot.slane %v1936_v3, 1 }
 0x265   : > { %vm1998_vm1 = vcmp.lt.s32.totalorder %v1997_v12, %v1792_v11  ;;  %vm2035_vm11 = vcmp.lt.s32.totalorder %v2034_v24, %v1725_v9  ;;  %v1737_v62 = vsel %vm1609_vm9, %v6077_v26, 256  ;;  %v1741_v52 = vsel %vm1613_vm8, %v6083_v53, 256 }
 0x266   : > { %v1999_v48 = vsel %vm1998_vm1, %v1997_v12, %v1792_v11  ;;  %v2036_v59 = vsel %vm2035_vm11, %v2034_v24, %v1725_v9  ;;  %v9019_v11 = vld [vmem:[#allocation109_spill] sm:$0xff]  ;;  %vm1938_vm2 = vcmp.lt.s32.totalorder %v1936_v3, %v1937_v35  ;;  %v6755_v47 = vsel %vm1867_vm6, %v1865_v41, %v1866_v19  ;;  %v9021_v12 = vld [vmem:[#allocation58_spill] sm:$0xff]  ;;  %v9025_v9 = vld [vmem:[#allocation120_spill] sm:$0xff] }
 0x267   : > { %vm2000_vm15 = vcmp.lt.s32.totalorder %v1999_v48, %v1796_v63  ;;  %vm2037_vm13 = vcmp.lt.s32.totalorder %v2036_v59, %v1729_v58  ;;  %vm1617_vm7 = vcmp.le.f32.partialorder %v9019_v11, %v6609_v49  ;;  %vm1625_vm0 = vcmp.le.f32.partialorder %v9021_v12, %v6609_v49  ;;  %v9024_v41 = vld [vmem:[#allocation118_spill] sm:$0xff]  ;;  %v9030_v11 = vld [vmem:[#allocation127_spill] sm:$0xff] }
 0x268   : > { %v2001_v18 = vsel %vm2000_vm15, %v1999_v48, %v1796_v63  ;;  %v2038_v25 = vsel %vm2037_vm13, %v2036_v59, %v1729_v58  ;;  %v9020_v63 = vld [vmem:[#allocation48_spill] sm:$0xff]  ;;  %vm1629_vm3 = vcmp.le.f32.partialorder %v9022_v57, %v6609_v49  ;;  %v1745_v7 = vsel %vm1617_vm7, %v6091_v36, 256  ;;  %v9027_v59 = vld [vmem:[#allocation123_spill] sm:$0xff] }
 0x269   : > { %v2002_v61 = vrot.slane %v2001_v18, 4  ;;  %vm2039_vm12 = vcmp.lt.s32.totalorder %v2038_v25, %v1733_v0  ;;  %vm1621_vm10 = vcmp.le.f32.partialorder %v9020_v63, %v6609_v49  ;;  %v6764_v48 = vsel %vm1938_vm2, %v1936_v3, %v1937_v35 }
 0x26a   : > { %v2040_v60 = vsel %vm2039_vm12, %v2038_v25, %v1733_v0  ;;  %vm1633_vm15 = vcmp.le.f32.partialorder %v9023_v51, %v6609_v49  ;;  %vm1637_vm14 = vcmp.le.f32.partialorder %v9024_v41, %v6609_v49  ;;  %vm1641_vm13 = vcmp.le.f32.partialorder %v9025_v9, %v6609_v49  ;;  %v9028_v0 = vld [vmem:[#allocation125_spill] sm:$0xff] }
 0x26b   : > { %vm2003_vm5 = vcmp.lt.s32.totalorder %v2001_v18, %v2002_v61  ;;  %vm2041_vm4 = vcmp.lt.s32.totalorder %v2040_v60, %v1737_v62  ;;  %v1749_v24 = vsel %vm1621_vm10, %v6107_v40, 256  ;;  %v1753_v3 = vsel %vm1625_vm0, %v6114_v38, 256 }
 0x26c   : > { %v2004_v1 = vsel %vm2003_vm5, %v2001_v18, %v2002_v61  ;;  %v2042_v22 = vsel %vm2041_vm4, %v2040_v60, %v1737_v62  ;;  %vm1645_vm5 = vcmp.le.f32.partialorder %v9026_v2, %v6609_v49  ;;  %vm2142_vm12 = vcmp.eq.s32.totalorder %v6074_v6, %v6755_v47 }
 0x26d   : > { %v2005_v31 = vrot.slane %v2004_v1, 2  ;;  %vm2043_vm1 = vcmp.lt.s32.totalorder %v2042_v22, %v1741_v52  ;;  %v4709_v61 = vmov 1.0   ;;  %vm8569_vm6 = vcmp.eq.s32.totalorder %v6287_v50, %v6755_v47 }
 0x26e   : > { %v2044_v43 = vsel %vm2043_vm1, %v2042_v22, %v1741_v52  ;;  %3974 = vmatpush.msk.msra.mxu0 %vm2142_vm12, %v4709_v61  ;;  %vm2143_vm7 = vcmp.eq.s32.totalorder %v6074_v6, %v6764_v48  ;;  %vm8567_vm4 = vcmp.eq.s32.totalorder %v6287_v50, %v6764_v48  ;;  %vm1649_vm2 = vcmp.le.f32.partialorder %v9027_v59, %v6609_v49  ;;  %v9031_v22 = vld [vmem:[#allocation78_spill] sm:$0xff] }
 0x26f   : > { %vm2045_vm11 = vcmp.lt.s32.totalorder %v2044_v43, %v1745_v7  ;;  %vm2006_vm9 = vcmp.lt.s32.totalorder %v2004_v1, %v2005_v31  ;;  %3990 = vmatpush.msk.msra.mxu1 %vm8569_vm6, %v4709_v61  ;;  %4006 = vmatpush.msk.msra.mxu2 %vm2143_vm7, %v4709_v61  ;;  %vm2138_vm1 = vcmp.eq.s32.totalorder %v8933_v4, %v6755_v47  ;;  %v1757_v46 = vsel %vm1629_vm3, %v6123_v39, 256 }
 0x270   : > { %v2046_v18 = vsel %vm2045_vm11, %v2044_v43, %v1745_v7  ;;  %v6788_v58 = vsel %vm2006_vm9, %v2004_v1, %v2005_v31  ;;  %4022 = vmatpush.msk.msra.mxu3 %vm8567_vm4, %v4709_v61  ;;  %3975 = vmatpush.msk.msra.mxu0 %vm2138_vm1, %v4709_v61  ;;  %vm8566_vm0 = vcmp.eq.s32.totalorder %v6274_v45, %v6755_v47  ;;  %v1761_v25 = vsel %vm1633_vm15, %v6131_v32, 256 }
 0x271   : > { %vm2047_vm8 = vcmp.lt.s32.totalorder %v2046_v18, %v1749_v24  ;;  %vm8581_vm11 = vcmp.eq.s32.totalorder %v8933_v4, %v6764_v48  ;;  %vm1653_vm3 = vcmp.le.f32.partialorder %v9028_v0, %v6609_v49  ;;  %3991 = vmatpush.msk.msra.mxu1 %vm8566_vm0, %v4709_v61  ;;  %vm8570_vm0 = vcmp.eq.s32.totalorder %v6266_v37, %v6755_v47 }
 0x272   : > { %v2048_v19 = vsel %vm2047_vm8, %v2046_v18, %v1749_v24  ;;  %4007 = vmatpush.msk.msra.mxu2 %vm8581_vm11, %v4709_v61  ;;  %vm8568_vm8 = vcmp.eq.s32.totalorder %v6274_v45, %v6764_v48  ;;  %vm8571_vm4 = vcmp.eq.s32.totalorder %v8930_v42, %v6764_v48  ;;  %vm1657_vm15 = vcmp.le.f32.partialorder %v9029_v5, %v6609_v49 }
 0x273   : > { %vm2049_vm10 = vcmp.lt.s32.totalorder %v2048_v19, %v1753_v3  ;;  %4023 = vmatpush.msk.msra.mxu3 %vm8568_vm8, %v4709_v61  ;;  %3992 = vmatpush.msk.msra.mxu1 %vm8570_vm0, %v4709_v61  ;;  %vm8572_vm8 = vcmp.eq.s32.totalorder %v6266_v37, %v6764_v48  ;;  %vm8573_vm6 = vcmp.eq.s32.totalorder %v8927_v10, %v6755_v47  ;;  %v1765_v62 = vsel %vm1637_vm14, %v6151_v13, 256 }
 0x274   : > { %v2050_v35 = vsel %vm2049_vm10, %v2048_v19, %v1753_v3  ;;  %vm8578_vm10 = vcmp.eq.s32.totalorder %v8930_v42, %v6755_v47  ;;  %4008 = vmatpush.msk.msra.mxu2 %vm8571_vm4, %v4709_v61  ;;  %vm8574_vm0 = vcmp.eq.s32.totalorder %v6204_v29, %v6755_v47  ;;  %vm8575_vm4 = vcmp.eq.s32.totalorder %v8927_v10, %v6764_v48 }
 0x275   : > { %vm2051_vm9 = vcmp.lt.s32.totalorder %v2050_v35, %v1757_v46  ;;  %3976 = vmatpush.msk.msra.mxu0 %vm8578_vm10, %v4709_v61  ;;  %4024 = vmatpush.msk.msra.mxu3 %vm8572_vm8, %v4709_v61  ;;  %vm1661_vm14 = vcmp.le.f32.partialorder %v9030_v11, %v6609_v49  ;;  %vm8576_vm8 = vcmp.eq.s32.totalorder %v6204_v29, %v6764_v48  ;;  %v1769_v31 = vsel %vm1641_vm13, %v6159_v16, 256 }
 0x276   : > { %v2052_v1 = vsel %vm2051_vm9, %v2050_v35, %v1757_v46  ;;  %3993 = vmatpush.msk.msra.mxu1 %vm8574_vm0, %v4709_v61  ;;  %4009 = vmatpush.msk.msra.mxu2 %vm8575_vm4, %v4709_v61  ;;  %vm8579_vm0 = vcmp.eq.s32.totalorder %v6201_v34, %v6755_v47  ;;  %vm8580_vm4 = vcmp.eq.s32.totalorder %v8922_v54, %v6764_v48  ;;  %v1773_v63 = vsel %vm1645_vm5, %v6175_v56, 256 }
 0x277   : > { %vm2053_vm9 = vcmp.lt.s32.totalorder %v2052_v1, %v1761_v25  ;;  %3977 = vmatpush.msk.msra.mxu0 %vm8573_vm6, %v4709_v61  ;;  %vm8577_vm6 = vcmp.eq.s32.totalorder %v8922_v54, %v6755_v47  ;;  %4025 = vmatpush.msk.msra.mxu3 %vm8576_vm8, %v4709_v61  ;;  %vm1665_vm13 = vcmp.le.f32.partialorder %v9031_v22, %v6609_v49  ;;  %v1777_v57 = vsel %vm1649_vm2, %v6182_v8, 256 }
 0x278   : > { %v2054_v60 = vsel %vm2053_vm9, %v2052_v1, %v1761_v25  ;;  %3994 = vmatpush.msk.msra.mxu1 %vm8579_vm0, %v4709_v61  ;;  %4010 = vmatpush.msk.msra.mxu2 %vm8580_vm4, %v4709_v61  ;;  %vm8583_vm8 = vcmp.eq.s32.totalorder %v6201_v34, %v6764_v48  ;;  %vm1669_vm10 = vcmp.le.f32.partialorder %v6517_v44, %v6609_v49  ;;  %v1781_v43 = vsel %vm1653_vm3, %v6201_v34, 256 }
 0x279   : > { %vm2055_vm9 = vcmp.lt.s32.totalorder %v2054_v60, %v1765_v62  ;;  %3978 = vmatpush.msk.msra.mxu0 %vm8577_vm6, %v4709_v61  ;;  %vm8635_vm6 = vcmp.eq.s32.totalorder %v8919_v23, %v6755_v47  ;;  %4026 = vmatpush.msk.msra.mxu3 %vm8583_vm8, %v4709_v61  ;;  %vm8582_vm0 = vcmp.eq.s32.totalorder %v6182_v8, %v6755_v47  ;;  %v1785_v41 = vsel %vm1657_vm15, %v6204_v29, 256 }
 0x27a   : > { %v2056_v52 = vsel %vm2055_vm9, %v2054_v60, %v1765_v62  ;;  %vm8584_vm4 = vcmp.eq.s32.totalorder %v8919_v23, %v6764_v48  ;;  %3995 = vmatpush.msk.msra.mxu1 %vm8582_vm0, %v4709_v61  ;;  %vm8586_vm5 = vcmp.eq.s32.totalorder %v6182_v8, %v6764_v48  ;;  %vm8585_vm0 = vcmp.eq.s32.totalorder %v6175_v56, %v6755_v47 }
 0x27b   : > { %vm2057_vm9 = vcmp.lt.s32.totalorder %v2056_v52, %v1769_v31  ;;  %3979 = vmatpush.msk.msra.mxu0 %vm8635_vm6, %v4709_v61  ;;  %4011 = vmatpush.msk.msra.mxu2 %vm8584_vm4, %v4709_v61  ;;  %vm8587_vm8 = vcmp.eq.s32.totalorder %v8914_v20, %v6764_v48  ;;  %vm8589_vm2 = vcmp.eq.s32.totalorder %v6175_v56, %v6764_v48  ;;  %v1789_v24 = vsel %vm1661_vm14, %v6266_v37, 256 }
 0x27c   : > { %v2058_v12 = vsel %vm2057_vm9, %v2056_v52, %v1769_v31  ;;  %vm8633_vm9 = vcmp.eq.s32.totalorder %v8914_v20, %v6755_v47  ;;  %4027 = vmatpush.msk.msra.mxu3 %vm8586_vm5, %v4709_v61  ;;  %3996 = vmatpush.msk.msra.mxu1 %vm8585_vm0, %v4709_v61  ;;  %vm8588_vm0 = vcmp.eq.s32.totalorder %v6159_v16, %v6755_v47  ;;  %v1793_v2 = vsel %vm1665_vm13, %v6274_v45, 256 }
 0x27d   : > { %vm2059_vm11 = vcmp.lt.s32.totalorder %v2058_v12, %v1773_v63  ;;  %3980 = vmatpush.msk.msra.mxu0 %vm8633_vm9, %v4709_v61  ;;  %4012 = vmatpush.msk.msra.mxu2 %vm8587_vm8, %v4709_v61  ;;  %vm8590_vm5 = vcmp.eq.s32.totalorder %v6014_v21, %v6764_v48  ;;  %vm8626_vm3 = vcmp.eq.s32.totalorder %v6006_v27, %v6755_v47  ;;  %v1797_v19 = vsel %vm1669_vm10, %v6287_v50, 256 }
 0x27e   : > { %v2060_v7 = vsel %vm2059_vm11, %v2058_v12, %v1773_v63  ;;  %vm8631_vm11 = vcmp.eq.s32.totalorder %v6014_v21, %v6755_v47  ;;  %4028 = vmatpush.msk.msra.mxu3 %vm8589_vm2, %v4709_v61  ;;  %3997 = vmatpush.msk.msra.mxu1 %vm8588_vm0, %v4709_v61  ;;  %vm8591_vm0 = vcmp.eq.s32.totalorder %v6151_v13, %v6755_v47  ;;  %v2008_v44 = vrot.slane %v6788_v58, 1 }
 0x27f   : > { %vm2061_vm4 = vcmp.lt.s32.totalorder %v2060_v7, %v1777_v57  ;;  %3981 = vmatpush.msk.msra.mxu0 %vm8631_vm11, %v4709_v61  ;;  %4013 = vmatpush.msk.msra.mxu2 %vm8590_vm5, %v4709_v61  ;;  %vm8593_vm2 = vcmp.eq.s32.totalorder %v6006_v27, %v6764_v48  ;;  %vm8625_vm15 = vcmp.eq.s32.totalorder %v5985_v28, %v6755_v47  ;;  %v3114_v60 = vrot.slane %v6764_v48, 7 }
 0x280   : > { %v2062_v51 = vsel %vm2061_vm4, %v2060_v7, %v1777_v57  ;;  %vm8592_vm4 = vcmp.eq.s32.totalorder %v6159_v16, %v6764_v48  ;;  %3998 = vmatpush.msk.msra.mxu1 %vm8591_vm0, %v4709_v61  ;;  %vm8594_vm0 = vcmp.eq.s32.totalorder %v6131_v32, %v6755_v47  ;;  %vm8596_vm14 = vcmp.eq.s32.totalorder %v6131_v32, %v6764_v48 }
 0x281   : > { %vm2063_vm8 = vcmp.lt.s32.totalorder %v2062_v51, %v1781_v43  ;;  %4029 = vmatpush.msk.msra.mxu3 %vm8592_vm4, %v4709_v61  ;;  %3982 = vmatpush.msk.msra.mxu0 %vm8626_vm3, %v4709_v61  ;;  %vm8623_vm4 = vcmp.eq.s32.totalorder %v5985_v28, %v6764_v48  ;;  %vm8600_vm10 = vcmp.eq.s32.totalorder %v6114_v38, %v6755_v47  ;;  %v9034_v52 = vlaneseq }
 0x282   : > { %v2064_v9 = vsel %vm2063_vm8, %v2062_v51, %v1781_v43  ;;  %4014 = vmatpush.msk.msra.mxu2 %vm8593_vm2, %v4709_v61  ;;  %vm8595_vm8 = vcmp.eq.s32.totalorder %v6151_v13, %v6764_v48  ;;  %3999 = vmatpush.msk.msra.mxu1 %vm8594_vm0, %v4709_v61  ;;  %vm8597_vm0 = vcmp.eq.s32.totalorder %v6123_v39, %v6755_v47 }
 0x283   : > { %vm2065_vm5 = vcmp.lt.s32.totalorder %v2064_v9, %v1785_v41  ;;  %4030 = vmatpush.msk.msra.mxu3 %vm8595_vm8, %v4709_v61  ;;  %3983 = vmatpush.msk.msra.mxu0 %vm8625_vm15, %v4709_v61  ;;  %vm8598_vm8 = vcmp.eq.s32.totalorder %v5977_v55, %v6764_v48 }
 0x284   : > { %v2066_v18 = vsel %vm2065_vm5, %v2064_v9, %v1785_v41  ;;  %4015 = vmatpush.msk.msra.mxu2 %vm8623_vm4, %v4709_v61  ;;  %vm8620_vm5 = vcmp.eq.s32.totalorder %v5977_v55, %v6755_v47  ;;  %4000 = vmatpush.msk.msra.mxu1 %vm8597_vm0, %v4709_v61  ;;  %vm8601_vm0 = vcmp.eq.s32.totalorder %v5969_v33, %v6764_v48 }
 0x285   : > { %vm2067_vm2 = vcmp.lt.s32.totalorder %v2066_v18, %v1789_v24  ;;  %4031 = vmatpush.msk.msra.mxu3 %vm8596_vm14, %v4709_v61  ;;  %3984 = vmatpush.msk.msra.mxu0 %vm8620_vm5, %v4709_v61  ;;  %vm8606_vm14 = vcmp.eq.s32.totalorder %v5969_v33, %v6755_v47 }
 0x286   : > { %v2068_v3 = vsel %vm2067_vm2, %v2066_v18, %v1789_v24  ;;  %4016 = vmatpush.msk.msra.mxu2 %vm8598_vm8, %v4709_v61  ;;  %vm8599_vm2 = vcmp.eq.s32.totalorder %v6123_v39, %v6764_v48  ;;  %4001 = vmatpush.msk.msra.mxu1 %vm8600_vm10, %v4709_v61  ;;  %vm8604_vm10 = vcmp.eq.s32.totalorder %v6107_v40, %v6755_v47 }
 0x287   : > { %vm2069_vm13 = vcmp.lt.s32.totalorder %v2068_v3, %v1793_v2  ;;  %4032 = vmatpush.msk.msra.mxu3 %vm8599_vm2, %v4709_v61  ;;  %3985 = vmatpush.msk.msra.mxu0 %vm8606_vm14, %v4709_v61  ;;  %vm8603_vm2 = vcmp.eq.s32.totalorder %v8901_v14, %v6755_v47 }
 0x288   : > { %v2070_v49 = vsel %vm2069_vm13, %v2068_v3, %v1793_v2  ;;  %4017 = vmatpush.msk.msra.mxu2 %vm8601_vm0, %v4709_v61  ;;  %vm8602_vm13 = vcmp.eq.s32.totalorder %v6114_v38, %v6764_v48  ;;  %vm8605_vm0 = vcmp.eq.s32.totalorder %v8901_v14, %v6764_v48  ;;  %4002 = vmatpush.msk.msra.mxu1 %vm8604_vm10, %v4709_v61  ;;  %v4528_v3 = vld [vmem:[%s4831_s7 + $0x8] sm:$0xff] }
 0x289   : > { %vm2071_vm8 = vcmp.lt.s32.totalorder %v2070_v49, %v1797_v19  ;;  %4033 = vmatpush.msk.msra.mxu3 %vm8602_vm13, %v4709_v61  ;;  %3986 = vmatpush.msk.msra.mxu0 %vm8603_vm2, %v4709_v61  ;;  %vm8608_vm13 = vcmp.eq.s32.totalorder %v5928_v17, %v6755_v47  ;;  %vm7146_vm2 = vcmp.lt.s32.totalorder %v6788_v58, %v2008_v44 }
 0x28a   : > { %v2072_v59 = vsel %vm2071_vm8, %v2070_v49, %v1797_v19  ;;  %4018 = vmatpush.msk.msra.mxu2 %vm8605_vm0, %v4709_v61  ;;  %vm8607_vm8 = vcmp.eq.s32.totalorder %v6107_v40, %v6764_v48  ;;  %vm8609_vm10 = vcmp.eq.s32.totalorder %v6091_v36, %v6755_v47  ;;  %vm8610_vm0 = vcmp.eq.s32.totalorder %v5928_v17, %v6764_v48 }
 0x28b   : > { %v2073_v46 = vrot.slane %v2072_v59, 4  ;;  %4034 = vmatpush.msk.msra.mxu3 %vm8607_vm8, %v4709_v61  ;;  %3987 = vmatpush.msk.msra.mxu0 %vm8608_vm13, %v4709_v61  ;;  %vm8611_vm8 = vcmp.eq.s32.totalorder %v6091_v36, %v6764_v48  ;;  %vm8614_vm13 = vcmp.eq.s32.totalorder %v5794_v30, %v6755_v47  ;;  %v7201_v1 = vsel %vm7146_vm2, %v6788_v58, %v2008_v44  ;;  %v4529_v44 = vld [vmem:[%s4831_s7] sm:$0xff] }
 0x28c   : > { %4003 = vmatpush.msk.msra.mxu1 %vm8609_vm10, %v4709_v61  ;;  %4019 = vmatpush.msk.msra.mxu2 %vm8610_vm0, %v4709_v61  ;;  %vm8612_vm10 = vcmp.eq.s32.totalorder %v6083_v53, %v6755_v47  ;;  %vm8613_vm0 = vcmp.eq.s32.totalorder %v5794_v30, %v6764_v48  ;;  %vm8617_vm2 = vcmp.eq.s32.totalorder %v6077_v26, %v6764_v48  ;;  %v3115_v11 = vrot.slane %v7201_v1, 6 }
 0x28d   : > { %vm2074_vm14 = vcmp.lt.s32.totalorder %v2072_v59, %v2073_v46  ;;  %4035 = vmatpush.msk.msra.mxu3 %vm8611_vm8, %v4709_v61  ;;  %3988 = vmatpush.msk.msra.mxu0 %vm8614_vm13, %v4709_v61  ;;  %vm8619_vm8 = vcmp.eq.s32.totalorder %v5750_v15, %v6755_v47  ;;  %vm8629_vm15 = vcmp.eq.s32.totalorder %v6204_v29, %v7201_v1 }
 0x28e   : > { %v2075_v0 = vsel %vm2074_vm14, %v2072_v59, %v2073_v46  ;;  %4004 = vmatpush.msk.msra.mxu1 %vm8612_vm10, %v4709_v61  ;;  %4020 = vmatpush.msk.msra.mxu2 %vm8613_vm0, %v4709_v61  ;;  %vm8616_vm14 = vcmp.eq.s32.totalorder %v6083_v53, %v6764_v48  ;;  %vm8615_vm10 = vcmp.eq.s32.totalorder %v6077_v26, %v6755_v47 }
 0x28f   : > { %v2076_v25 = vrot.slane %v2075_v0, 2  ;;  %4036 = vmatpush.msk.msra.mxu3 %vm8616_vm14, %v4709_v61  ;;  %3989 = vmatpush.msk.msra.mxu0 %vm8619_vm8, %v4709_v61  ;;  %vm8618_vm0 = vcmp.eq.s32.totalorder %v5750_v15, %v6764_v48  ;;  %vm8634_vm11 = vcmp.eq.s32.totalorder %v6201_v34, %v7201_v1  ;;  %vm8641_vm6 = vcmp.eq.s32.totalorder %v6182_v8, %v7201_v1 }
 0x290   : > { %4005 = vmatpush.msk.msra.mxu1 %vm8615_vm10, %v4709_v61  ;;  %4021 = vmatpush.msk.msra.mxu2 %vm8618_vm0, %v4709_v61  ;;  %vm2144_vm10 = vcmp.eq.s32.totalorder %v6074_v6, %v7201_v1  ;;  %vm8622_vm0 = vcmp.eq.s32.totalorder %v6274_v45, %v7201_v1 }
 0x291   : > { %vm2077_vm13 = vcmp.lt.s32.totalorder %v2075_v0, %v2076_v25  ;;  %4037 = vmatpush.msk.msra.mxu3 %vm8617_vm2, %v4709_v61  ;;  %4260 = vmatmul.lmr.bf16.vlgmr.msra.gmra.16.mxu0  ;;  %vm2140_vm2 = vcmp.eq.s32.totalorder %v8933_v4, %v7201_v1 }
 0x292   : > { %v2078_v58 = vsel %vm2077_vm13, %v2075_v0, %v2076_v25  ;;  %4315 = vmatmul.lmr.bf16.vlgmr.msra.gmra.16.mxu1  ;;  %4370 = vmatmul.lmr.bf16.vlgmr.msra.gmra.16.mxu2  ;;  %vm8621_vm13 = vcmp.eq.s32.totalorder %v6287_v50, %v7201_v1 }
 0x293   : > { %v2079_v5 = vrot.slane %v2078_v58, 1  ;;  %4425 = vmatmul.lmr.bf16.vlgmr.msra.gmra.16.mxu3  ;;  %4038 = vmatpush.msk.msra.mxu0 %vm2144_vm10, %v4709_v61 }
 0x294   : > { %4054 = vmatpush.msk.msra.mxu1 %vm8621_vm13, %v4709_v61  ;;  %vm8627_vm13 = vcmp.eq.s32.totalorder %v6266_v37, %v7201_v1 }
 0x295   : > { %vm2080_vm14 = vcmp.lt.s32.totalorder %v2078_v58, %v2079_v5  ;;  %4039 = vmatpush.msk.msra.mxu0 %vm2140_vm2, %v4709_v61 }
 0x296   : > { %v7243_v62 = vsel %vm2080_vm14, %v2078_v58, %v2079_v5  ;;  %4055 = vmatpush.msk.msra.mxu1 %vm8622_vm0, %v4709_v61  ;;  %vm2136_vm14 = vcmp.eq.s32.totalorder %v8930_v42, %v7201_v1  ;;  %v4530_v5 = vld [vmem:[%s4831_s7 + $0x28] sm:$0xff] }
 0x297   : > { %vm2145_vm8 = vcmp.eq.s32.totalorder %v6074_v6, %v7243_v62  ;;  %vm8624_vm5 = vcmp.eq.s32.totalorder %v6287_v50, %v7243_v62  ;;  %vm2141_vm0 = vcmp.eq.s32.totalorder %v8933_v4, %v7243_v62  ;;  %vm8628_vm4 = vcmp.eq.s32.totalorder %v6274_v45, %v7243_v62  ;;  %4040 = vmatpush.msk.msra.mxu0 %vm2136_vm14, %v4709_v61 }
 0x298   : > { %4070 = vmatpush.msk.msra.mxu2 %vm2145_vm8, %v4709_v61  ;;  %4086 = vmatpush.msk.msra.mxu3 %vm8624_vm5, %v4709_v61  ;;  %vm8640_vm5 = vcmp.eq.s32.totalorder %v8927_v10, %v7201_v1  ;;  %vm8643_vm3 = vcmp.eq.s32.totalorder %v8930_v42, %v7243_v62  ;;  %vm8638_vm9 = vcmp.eq.s32.totalorder %v6201_v34, %v7243_v62  ;;  %v3116_v31 = vrot.slane %v7243_v62, 5 }
 0x299   : > { %4056 = vmatpush.msk.msra.mxu1 %vm8627_vm13, %v4709_v61  ;;  %vm8630_vm13 = vcmp.eq.s32.totalorder %v6266_v37, %v7243_v62  ;;  %4041 = vmatpush.msk.msra.mxu0 %vm8640_vm5, %v4709_v61  ;;  %vm3121_vm5 = vcmask 1041408  }
 0x29a   : > { %4071 = vmatpush.msk.msra.mxu2 %vm2141_vm0, %v4709_v61  ;;  %4087 = vmatpush.msk.msra.mxu3 %vm8628_vm4, %v4709_v61  ;;  %vm8637_vm4 = vcmp.eq.s32.totalorder %v8927_v10, %v7243_v62 }
 0x29b   : > { %4057 = vmatpush.msk.msra.mxu1 %vm8629_vm15, %v4709_v61  ;;  %vm8632_vm15 = vcmp.eq.s32.totalorder %v6204_v29, %v7243_v62  ;;  %4261 = vmatmul.lmr.bf16.gmra.16.mxu0 }
 0x29c   : > { %4072 = vmatpush.msk.msra.mxu2 %vm8643_vm3, %v4709_v61  ;;  %4088 = vmatpush.msk.msra.mxu3 %vm8630_vm13, %v4709_v61  ;;  %vm8636_vm13 = vcmp.eq.s32.totalorder %v8922_v54, %v7201_v1  ;;  %vm2121_vm3 = vcmp.eq.s32.totalorder %v8914_v20, %v7243_v62 }
 0x29d   : > { %4316 = vmatmul.lmr.bf16.gmra.16.mxu1  ;;  %4371 = vmatmul.lmr.bf16.gmra.16.mxu2 }
 0x29e   : > { %4073 = vmatpush.msk.msra.mxu2 %vm8637_vm4, %v4709_v61  ;;  %4089 = vmatpush.msk.msra.mxu3 %vm8632_vm15, %v4709_v61  ;;  %vm8639_vm15 = vcmp.eq.s32.totalorder %v8922_v54, %v7243_v62  ;;  %vm3119_vm4 = vcmask 1042434  }
 0x29f   : > { %4426 = vmatmul.lmr.bf16.gmra.16.mxu3  ;;  %4042 = vmatpush.msk.msra.mxu0 %vm8636_vm13, %v4709_v61  ;;  %vm8648_vm13 = vcmask 1040384   ;;  %v3120_v63 = vsel %vm3119_vm4, %v3115_v11, %v3116_v31  ;;  %vm2117_vm4 = vcmp.eq.s32.totalorder %v6014_v21, %v7243_v62  ;;  %v4531_v31 = vld [vmem:[%s4831_s7 + $0x20] sm:$0xff] }
 0x2a0   : > { %4058 = vmatpush.msk.msra.mxu1 %vm8634_vm11, %v4709_v61  ;;  %4074 = vmatpush.msk.msra.mxu2 %vm8639_vm15, %v4709_v61  ;;  %vm8642_vm11 = vcmp.eq.s32.totalorder %v8919_v23, %v7201_v1  ;;  %vm8645_vm15 = vcmp.eq.s32.totalorder %v6182_v8, %v7243_v62  ;;  %v3118_v22 = vsel %vm8648_vm13, %v6755_v47, %v3114_v60 }
 0x2a1   : > { %4090 = vmatpush.msk.msra.mxu3 %vm8638_vm9, %v4709_v61  ;;  %4043 = vmatpush.msk.msra.mxu0 %vm8642_vm11, %v4709_v61  ;;  %vm8644_vm9 = vcmp.eq.s32.totalorder %v8919_v23, %v7243_v62  ;;  %vm8646_vm11 = vcmp.eq.s32.totalorder %v6175_v56, %v7201_v1  ;;  %v3122_v12 = vsel %vm3121_vm5, %v3118_v22, %v3120_v63 }
 0x2a2   : > { %4059 = vmatpush.msk.msra.mxu1 %vm8641_vm6, %v4709_v61  ;;  %4075 = vmatpush.msk.msra.mxu2 %vm8644_vm9, %v4709_v61  ;;  %vm8647_vm6 = vcmp.eq.s32.totalorder %v8914_v20, %v7201_v1  ;;  %vm3125_vm9 = vcmp.lt.s32.totalorder %v9034_v52, 512  ;;  %vm8649_vm13 = vcmp.eq.s32.totalorder %v6159_v16, %v7243_v62  ;;  %vm2112_vm5 = vcmp.eq.s32.totalorder %v6006_v27, %v7201_v1 }
 0x2a3   : > { %4091 = vmatpush.msk.msra.mxu3 %vm8645_vm15, %v4709_v61  ;;  %4044 = vmatpush.msk.msra.mxu0 %vm8647_vm6, %v4709_v61  ;;  %vm8651_vm15 = vcmp.eq.s32.totalorder %v6175_v56, %v7243_v62  ;;  %vm8650_vm6 = vcmp.eq.s32.totalorder %v6159_v16, %v7201_v1  ;;  %3127 = vst.msk [vmem:[%s334_s9] sm:$0xf] %vm3125_vm9, %v3122_v12 }
 0x2a4   : > { %4060 = vmatpush.msk.msra.mxu1 %vm8646_vm11, %v4709_v61  ;;  %4076 = vmatpush.msk.msra.mxu2 %vm2121_vm3, %v4709_v61  ;;  %vm2116_vm11 = vcmp.eq.s32.totalorder %v6014_v21, %v7201_v1  ;;  %vm8652_vm9 = vcmp.eq.s32.totalorder %v6151_v13, %v7201_v1 }
 0x2a5   : > { %4092 = vmatpush.msk.msra.mxu3 %vm8651_vm15, %v4709_v61  ;;  %4045 = vmatpush.msk.msra.mxu0 %vm2116_vm11, %v4709_v61  ;;  %vm8655_vm15 = vcmp.eq.s32.totalorder %v5985_v28, %v7201_v1 }
 0x2a6   : > { %4061 = vmatpush.msk.msra.mxu1 %vm8650_vm6, %v4709_v61  ;;  %4077 = vmatpush.msk.msra.mxu2 %vm2117_vm4, %v4709_v61  ;;  %vm8654_vm6 = vcmp.eq.s32.totalorder %v6151_v13, %v7243_v62 }
 0x2a7   : > { %4093 = vmatpush.msk.msra.mxu3 %vm8649_vm13, %v4709_v61  ;;  %4262 = vmatmul.lmr.bf16.gmra.16.mxu0  ;;  %vm8653_vm13 = vcmp.eq.s32.totalorder %v6006_v27, %v7243_v62 }
 0x2a8   : > { %4317 = vmatmul.lmr.bf16.gmra.16.mxu1  ;;  %4372 = vmatmul.lmr.bf16.gmra.16.mxu2 }
 0x2a9   : > { %4427 = vmatmul.lmr.bf16.gmra.16.mxu3  ;;  %4046 = vmatpush.msk.msra.mxu0 %vm2112_vm5, %v4709_v61 }
 0x2aa   : > { %4062 = vmatpush.msk.msra.mxu1 %vm8652_vm9, %v4709_v61  ;;  %4078 = vmatpush.msk.msra.mxu2 %vm8653_vm13, %v4709_v61  ;;  %vm8656_vm9 = vcmp.eq.s32.totalorder %v6131_v32, %v7201_v1  ;;  %vm8657_vm13 = vcmp.eq.s32.totalorder %v5985_v28, %v7243_v62 }
 0x2ab   : > { %4094 = vmatpush.msk.msra.mxu3 %vm8654_vm6, %v4709_v61  ;;  %4047 = vmatpush.msk.msra.mxu0 %vm8655_vm15, %v4709_v61  ;;  %vm8658_vm6 = vcmp.eq.s32.totalorder %v6131_v32, %v7243_v62  ;;  %vm8659_vm15 = vcmp.eq.s32.totalorder %v5977_v55, %v7201_v1 }
 0x2ac   : > { %4063 = vmatpush.msk.msra.mxu1 %vm8656_vm9, %v4709_v61  ;;  %4079 = vmatpush.msk.msra.mxu2 %vm8657_vm13, %v4709_v61  ;;  %vm8660_vm9 = vcmp.eq.s32.totalorder %v6123_v39, %v7201_v1  ;;  %vm8661_vm13 = vcmp.eq.s32.totalorder %v5977_v55, %v7243_v62 }
 0x2ad   : > { %4095 = vmatpush.msk.msra.mxu3 %vm8658_vm6, %v4709_v61  ;;  %4048 = vmatpush.msk.msra.mxu0 %vm8659_vm15, %v4709_v61  ;;  %vm8662_vm6 = vcmp.eq.s32.totalorder %v6123_v39, %v7243_v62  ;;  %vm8664_vm15 = vcmp.eq.s32.totalorder %v5969_v33, %v7201_v1 }
 0x2ae   : > { %4064 = vmatpush.msk.msra.mxu1 %vm8660_vm9, %v4709_v61  ;;  %4080 = vmatpush.msk.msra.mxu2 %vm8661_vm13, %v4709_v61  ;;  %vm8663_vm9 = vcmp.eq.s32.totalorder %v6114_v38, %v7201_v1  ;;  %vm8666_vm13 = vcmp.eq.s32.totalorder %v5969_v33, %v7243_v62 }
 0x2af   : > { %4096 = vmatpush.msk.msra.mxu3 %vm8662_vm6, %v4709_v61  ;;  %4049 = vmatpush.msk.msra.mxu0 %vm8664_vm15, %v4709_v61  ;;  %vm8665_vm6 = vcmp.eq.s32.totalorder %v6114_v38, %v7243_v62  ;;  %vm8668_vm15 = vcmp.eq.s32.totalorder %v6107_v40, %v7201_v1 }
 0x2b0   : > { %4065 = vmatpush.msk.msra.mxu1 %vm8663_vm9, %v4709_v61  ;;  %4081 = vmatpush.msk.msra.mxu2 %vm8666_vm13, %v4709_v61  ;;  %vm8667_vm9 = vcmp.eq.s32.totalorder %v8901_v14, %v7201_v1  ;;  %vm8670_vm13 = vcmp.eq.s32.totalorder %v6107_v40, %v7243_v62 }
 0x2b1   : > { %4097 = vmatpush.msk.msra.mxu3 %vm8665_vm6, %v4709_v61  ;;  %4263 = vmatmul.lmr.bf16.gmra.16.mxu0  ;;  %vm8669_vm6 = vcmp.eq.s32.totalorder %v8901_v14, %v7243_v62 }
 0x2b2   : > { %4318 = vmatmul.lmr.bf16.gmra.16.mxu1  ;;  %4373 = vmatmul.lmr.bf16.gmra.16.mxu2 }
 0x2b3   : > { %4428 = vmatmul.lmr.bf16.gmra.16.mxu3  ;;  %4050 = vmatpush.msk.msra.mxu0 %vm8667_vm9, %v4709_v61  ;;  %vm8671_vm9 = vcmp.eq.s32.totalorder %v5928_v17, %v7201_v1 }
 0x2b4   : > { %4066 = vmatpush.msk.msra.mxu1 %vm8668_vm15, %v4709_v61  ;;  %4082 = vmatpush.msk.msra.mxu2 %vm8669_vm6, %v4709_v61  ;;  %vm8672_vm15 = vcmp.eq.s32.totalorder %v6091_v36, %v7201_v1  ;;  %vm8673_vm6 = vcmp.eq.s32.totalorder %v5928_v17, %v7243_v62 }
 0x2b5   : > { %4098 = vmatpush.msk.msra.mxu3 %vm8670_vm13, %v4709_v61  ;;  %4051 = vmatpush.msk.msra.mxu0 %vm8671_vm9, %v4709_v61  ;;  %vm8674_vm13 = vcmp.eq.s32.totalorder %v6091_v36, %v7243_v62  ;;  %vm8675_vm9 = vcmp.eq.s32.totalorder %v5794_v30, %v7201_v1 }
 0x2b6   : > { %4067 = vmatpush.msk.msra.mxu1 %vm8672_vm15, %v4709_v61  ;;  %4083 = vmatpush.msk.msra.mxu2 %vm8673_vm6, %v4709_v61  ;;  %vm8676_vm15 = vcmp.eq.s32.totalorder %v6083_v53, %v7201_v1  ;;  %vm8677_vm6 = vcmp.eq.s32.totalorder %v5794_v30, %v7243_v62 }
 0x2b7   : > { %4099 = vmatpush.msk.msra.mxu3 %vm8674_vm13, %v4709_v61  ;;  %4052 = vmatpush.msk.msra.mxu0 %vm8675_vm9, %v4709_v61  ;;  %vm8678_vm13 = vcmp.eq.s32.totalorder %v6083_v53, %v7243_v62  ;;  %vm2084_vm9 = vcmp.eq.s32.totalorder %v5750_v15, %v7201_v1 }
 0x2b8   : > { %4068 = vmatpush.msk.msra.mxu1 %vm8676_vm15, %v4709_v61  ;;  %4084 = vmatpush.msk.msra.mxu2 %vm8677_vm6, %v4709_v61  ;;  %vm2148_vm15 = vcmp.eq.s32.totalorder %v6077_v26, %v7201_v1  ;;  %vm2085_vm6 = vcmp.eq.s32.totalorder %v5750_v15, %v7243_v62 }
 0x2b9   : > { %4100 = vmatpush.msk.msra.mxu3 %vm8678_vm13, %v4709_v61  ;;  %4053 = vmatpush.msk.msra.mxu0 %vm2084_vm9, %v4709_v61  ;;  %vm2149_vm13 = vcmp.eq.s32.totalorder %v6077_v26, %v7243_v62 }
 0x2ba   : > { %4069 = vmatpush.msk.msra.mxu1 %vm2148_vm15, %v4709_v61  ;;  %4085 = vmatpush.msk.msra.mxu2 %vm2085_vm6, %v4709_v61 }
 0x2bb   : > { %4101 = vmatpush.msk.msra.mxu3 %vm2149_vm13, %v4709_v61  ;;  %4264 = vmatmul.lmr.bf16.gmra.16.mxu0 }
 0x2bc   : > { %4319 = vmatmul.lmr.bf16.gmra.16.mxu1  ;;  %4374 = vmatmul.lmr.bf16.gmra.16.mxu2 }
 0x2bd   : > { %4429 = vmatmul.lmr.bf16.gmra.16.mxu3 }
 0x2c3   : > { %4265 = vmatmul.lmr.bf16.gmra.16.mxu0 }
 0x2c4   : > { %4320 = vmatmul.lmr.bf16.gmra.16.mxu1  ;;  %4375 = vmatmul.lmr.bf16.gmra.16.mxu2 }
 0x2c5   : > { %4430 = vmatmul.lmr.bf16.gmra.16.mxu3 }
 0x2cb   : > { %4266 = vmatmul.lmr.bf16.gmra.16.mxu0 }
 0x2cc   : > { %4321 = vmatmul.lmr.bf16.gmra.16.mxu1  ;;  %4376 = vmatmul.lmr.bf16.gmra.16.mxu2 }
 0x2cd   : > { %4431 = vmatmul.lmr.bf16.gmra.16.mxu3 }
 0x2d3   : > { %4267 = vmatmul.lmr.bf16.gmra.16.mxu0 }
 0x2d4   : > { %4322 = vmatmul.lmr.bf16.gmra.16.mxu1  ;;  %4377 = vmatmul.lmr.bf16.gmra.16.mxu2 }
 0x2d5   : > { %4432 = vmatmul.lmr.bf16.gmra.16.mxu3 }
 0x2db   : > { %4268 = vmatmul.lmr.bf16.gmra.16.mxu0 }
 0x2dc   : > { %4323 = vmatmul.lmr.bf16.gmra.16.mxu1  ;;  %4378 = vmatmul.lmr.bf16.gmra.16.mxu2 }
 0x2dd   : > { %4433 = vmatmul.lmr.bf16.gmra.16.mxu3 }
 0x2e3   : > { %4269 = vmatmul.lmr.bf16.gmra.16.mxu0 }
 0x2e4   : > { %4324 = vmatmul.lmr.bf16.gmra.16.mxu1  ;;  %4379 = vmatmul.lmr.bf16.gmra.16.mxu2 }
 0x2e5   : > { %4434 = vmatmul.lmr.bf16.gmra.16.mxu3 }
 0x2eb   : > { %4270 = vmatmul.lmr.bf16.gmra.16.mxu0 }
 0x2ec   : > { %4325 = vmatmul.lmr.bf16.gmra.16.mxu1  ;;  %4380 = vmatmul.lmr.bf16.gmra.16.mxu2 }
 0x2ed   : > { %4435 = vmatmul.lmr.bf16.gmra.16.mxu3 }
 0x2f3   : > { %4271 = vmatmul.lmr.bf16.gmra.16.mxu0 }
 0x2f4   : > { %4326 = vmatmul.lmr.bf16.gmra.16.mxu1  ;;  %4381 = vmatmul.lmr.bf16.gmra.16.mxu2 }
 0x2f5   : > { %4436 = vmatmul.lmr.bf16.gmra.16.mxu3 }
 0x2fb   : > { %4272 = vmatmul.lmr.bf16.gmra.16.mxu0 }
 0x2fc   : > { %4327 = vmatmul.lmr.bf16.gmra.16.mxu1  ;;  %4382 = vmatmul.lmr.bf16.gmra.16.mxu2 }
 0x2fd   : > { %4437 = vmatmul.lmr.bf16.gmra.16.mxu3 }
 0x303   : > { %4273 = vmatmul.lmr.bf16.gmra.16.mxu0 }
 0x304   : > { %4328 = vmatmul.lmr.bf16.gmra.16.mxu1  ;;  %4383 = vmatmul.lmr.bf16.gmra.16.mxu2 }
 0x305   : > { %4438 = vmatmul.lmr.bf16.gmra.16.mxu3 }
 0x30b   : > { %4274 = vmatmul.lmr.bf16.gmra.16.mxu0 }
 0x30c   : > { %4329 = vmatmul.lmr.bf16.gmra.16.mxu1  ;;  %4384 = vmatmul.lmr.bf16.gmra.16.mxu2 }
 0x30d   : > { %4439 = vmatmul.lmr.bf16.gmra.16.mxu3 }
 0x30e   : > { %v2547_v57 = vpop.f32.mrf.mxu0 }
 0x30f   : > { %v2612_v7 = vpop.f32.mrf.mxu1 }
 0x310   : > { %v2613_v43 = vadd.f32 %v2612_v7, %v2547_v57 }
 0x312   : > { %3050 = vst [vmem:[%s7635_s13] sm:$0xff] %v2613_v43  ;;  %v3128_v49 = vsub.f32 %v2613_v43, %v4529_v44 }
 0x313   : > { %4275 = vmatmul.lmr.bf16.gmra.16.mxu0 }
 0x314   : > { %4330 = vmatmul.lmr.bf16.gmra.16.mxu1  ;;  %4385 = vmatmul.lmr.bf16.gmra.16.mxu2  ;;  %v3192_v0 = vmul.f32 %v3128_v49, %v3128_v49 }
 0x315   : > { %4440 = vmatmul.lmr.bf16.gmra.16.mxu3  ;;  %v2677_v51 = vpop.f32.mrf.mxu2 }
 0x316   : > { %v2742_v41 = vpop.f32.mrf.mxu3 }
 0x317   : > { %v2743_v9 = vadd.f32 %v2742_v41, %v2677_v51 }
 0x318   : > { %v2550_v24 = vpop.f32.mrf.mxu0 }
 0x319   : > { %3051 = vst [vmem:[%s7635_s13 + $0x8] sm:$0xff] %v2743_v9  ;;  %v3129_v19 = vsub.f32 %v2743_v9, %v4528_v3 }
 0x31a   : > { %v2615_v18 = vpop.f32.mrf.mxu1 }
 0x31b   : > { %v2616_v2 = vadd.f32 %v2615_v18, %v2550_v24  ;;  %4276 = vmatmul.lmr.bf16.vlgmr.msra.gmra.16.mxu0  ;;  %v3193_v35 = vmul.f32 %v3129_v19, %v3129_v19  ;;  %v4533_v18 = vld [vmem:[%s4831_s7 + $0x40] sm:$0xff] }
 0x31c   : > { %4331 = vmatmul.lmr.bf16.vlgmr.msra.gmra.16.mxu1  ;;  %4386 = vmatmul.lmr.bf16.vlgmr.msra.gmra.16.mxu2 }
 0x31d   : > { %4441 = vmatmul.lmr.bf16.vlgmr.msra.gmra.16.mxu3  ;;  %3054 = vst [vmem:[%s7635_s13 + $0x20] sm:$0xff] %v2616_v2  ;;  %4102 = vmatpush.xpose.msk.msra.mxu0 %vm2142_vm12, %v4709_v61  ;;  %vm9035_vm12 = vcmp.eq.s32.totalorder %v8933_v4, %v6764_v48  ;;  %v7692_v11 = vadd.f32 %v3193_v35, %v3192_v0  ;;  %v3132_v22 = vsub.f32 %v2616_v2, %v4531_v31  ;;  %v4535_v35 = vld [vmem:[%s4831_s7 + $0x68] sm:$0xff]  ;;  %v4536_v31 = vld [vmem:[%s4831_s7 + $0x80] sm:$0xff] }
 0x31e   : > { %4118 = vmatpush.xpose.msk.msra.mxu1 %vm2143_vm7, %v4709_v61  ;;  %4134 = vmatpush.xpose.msk.msra.mxu2 %vm2144_vm10, %v4709_v61  ;;  %vm9036_vm7 = vcmp.eq.s32.totalorder %v8930_v42, %v6755_v47  ;;  %vm9039_vm10 = vcmp.eq.s32.totalorder %v8927_v10, %v6755_v47 }
 0x31f   : > { %4150 = vmatpush.xpose.msk.msra.mxu3 %vm2145_vm8, %v4709_v61  ;;  %vm9040_vm8 = vcmp.eq.s32.totalorder %v8927_v10, %v6764_v48  ;;  %v3196_v57 = vmul.f32 %v3132_v22, %v3132_v22 }
 0x320   : > { %v2680_v59 = vpop.f32.mrf.mxu2 }
 0x321   : > { %4103 = vmatpush.xpose.msk.msra.mxu0 %vm2138_vm1, %v4709_v61  ;;  %vm9037_vm1 = vcmp.eq.s32.totalorder %v8930_v42, %v6764_v48 }
 0x322   : > { %4119 = vmatpush.xpose.msk.msra.mxu1 %vm9035_vm12, %v4709_v61  ;;  %v2745_v46 = vpop.f32.mrf.mxu3  ;;  %4135 = vmatpush.xpose.msk.msra.mxu2 %vm2140_vm2, %v4709_v61  ;;  %vm9041_vm2 = vcmp.eq.s32.totalorder %v8927_v10, %v7201_v1  ;;  %vm9043_vm12 = vcmp.eq.s32.totalorder %v8922_v54, %v6755_v47 }
 0x323   : > { %4151 = vmatpush.xpose.msk.msra.mxu3 %vm2141_vm0, %v4709_v61  ;;  %v2746_v6 = vadd.f32 %v2745_v46, %v2680_v59  ;;  %4277 = vmatmul.lmr.bf16.gmra.16.mxu0  ;;  %vm9038_vm0 = vcmp.eq.s32.totalorder %v8930_v42, %v7243_v62  ;;  %v4534_v59 = vld [vmem:[%s4831_s7 + $0x60] sm:$0xff] }
 0x324   : > { %4332 = vmatmul.lmr.bf16.gmra.16.mxu1  ;;  %4387 = vmatmul.lmr.bf16.gmra.16.mxu2  ;;  %v2553_v25 = vpop.f32.mrf.mxu0 }
 0x325   : > { %4442 = vmatmul.lmr.bf16.gmra.16.mxu3  ;;  %3055 = vst [vmem:[%s7635_s13 + $0x28] sm:$0xff] %v2746_v6  ;;  %v2618_v58 = vpop.f32.mrf.mxu1  ;;  %4104 = vmatpush.xpose.msk.msra.mxu0 %vm9036_vm7, %v4709_v61  ;;  %v3133_v60 = vsub.f32 %v2746_v6, %v4530_v5  ;;  %vm9044_vm7 = vcmp.eq.s32.totalorder %v8922_v54, %v6764_v48 }
 0x326   : > { %4120 = vmatpush.xpose.msk.msra.mxu1 %vm9037_vm1, %v4709_v61  ;;  %v2619_v4 = vadd.f32 %v2618_v58, %v2553_v25  ;;  %4136 = vmatpush.xpose.msk.msra.mxu2 %vm2136_vm14, %v4709_v61  ;;  %vm9042_vm14 = vcmp.eq.s32.totalorder %v8927_v10, %v7243_v62  ;;  %vm9045_vm1 = vcmp.eq.s32.totalorder %v8922_v54, %v7201_v1  ;;  %v4532_v10 = vld [vmem:[%s4831_s7 + $0x48] sm:$0xff] }
 0x327   : > { %4152 = vmatpush.xpose.msk.msra.mxu3 %vm9038_vm0, %v4709_v61  ;;  %v3197_v42 = vmul.f32 %v3133_v60, %v3133_v60  ;;  %vm9046_vm0 = vcmp.eq.s32.totalorder %v8922_v54, %v7243_v62 }
 0x328   : > { %3058 = vst [vmem:[%s7635_s13 + $0x40] sm:$0xff] %v2619_v4  ;;  %v3136_v2 = vsub.f32 %v2619_v4, %v4533_v18 }
 0x329   : > { %4105 = vmatpush.xpose.msk.msra.mxu0 %vm9039_vm10, %v4709_v61  ;;  %v7730_v9 = vadd.f32 %v3197_v42, %v3196_v57  ;;  %vm9047_vm10 = vcmp.eq.s32.totalorder %v8919_v23, %v6755_v47  ;;  %v4537_v57 = vld [vmem:[%s4831_s7 + $0x88] sm:$0xff] }
 0x32a   : > { %4121 = vmatpush.xpose.msk.msra.mxu1 %vm9040_vm8, %v4709_v61  ;;  %4137 = vmatpush.xpose.msk.msra.mxu2 %vm9041_vm2, %v4709_v61  ;;  %vm9048_vm8 = vcmp.eq.s32.totalorder %v8919_v23, %v6764_v48  ;;  %vm9049_vm2 = vcmp.eq.s32.totalorder %v8919_v23, %v7201_v1  ;;  %v3200_v3 = vmul.f32 %v3136_v2, %v3136_v2 }
 0x32b   : > { %4153 = vmatpush.xpose.msk.msra.mxu3 %vm9042_vm14, %v4709_v61  ;;  %4278 = vmatmul.lmr.bf16.gmra.16.mxu0  ;;  %v2683_v63 = vpop.f32.mrf.mxu2  ;;  %vm9050_vm14 = vcmp.eq.s32.totalorder %v8919_v23, %v7243_v62 }
 0x32c   : > { %4333 = vmatmul.lmr.bf16.gmra.16.mxu1  ;;  %v2748_v12 = vpop.f32.mrf.mxu3  ;;  %4388 = vmatmul.lmr.bf16.gmra.16.mxu2 }
 0x32d   : > { %4443 = vmatmul.lmr.bf16.gmra.16.mxu3  ;;  %v2749_v7 = vadd.f32 %v2748_v12, %v2683_v63  ;;  %4106 = vmatpush.xpose.msk.msra.mxu0 %vm9043_vm12, %v4709_v61  ;;  %vm9051_vm12 = vcmp.eq.s32.totalorder %v8914_v20, %v6755_v47 }
 0x32e   : > { %4122 = vmatpush.xpose.msk.msra.mxu1 %vm9044_vm7, %v4709_v61  ;;  %4138 = vmatpush.xpose.msk.msra.mxu2 %vm9045_vm1, %v4709_v61  ;;  %v2556_v51 = vpop.f32.mrf.mxu0  ;;  %vm9052_vm7 = vcmp.eq.s32.totalorder %v8914_v20, %v6764_v48  ;;  %vm9053_vm1 = vcmp.eq.s32.totalorder %v8914_v20, %v7201_v1 }
 0x32f   : > { %4154 = vmatpush.xpose.msk.msra.mxu3 %vm9046_vm0, %v4709_v61  ;;  %3059 = vst [vmem:[%s7635_s13 + $0x48] sm:$0xff] %v2749_v7  ;;  %v3137_v43 = vsub.f32 %v2749_v7, %v4532_v10  ;;  %v2621_v41 = vpop.f32.mrf.mxu1  ;;  %vm9054_vm0 = vcmp.eq.s32.totalorder %v6014_v21, %v6755_v47 }
 0x330   : > { %v2622_v24 = vadd.f32 %v2621_v41, %v2556_v51 }
 0x331   : > { %4107 = vmatpush.xpose.msk.msra.mxu0 %vm9047_vm10, %v4709_v61  ;;  %v3201_v54 = vmul.f32 %v3137_v43, %v3137_v43  ;;  %vm9056_vm10 = vcmp.eq.s32.totalorder %v6006_v27, %v6755_v47 }
 0x332   : > { %4123 = vmatpush.xpose.msk.msra.mxu1 %vm9048_vm8, %v4709_v61  ;;  %3062 = vst [vmem:[%s7635_s13 + $0x60] sm:$0xff] %v2622_v24  ;;  %4139 = vmatpush.xpose.msk.msra.mxu2 %vm9049_vm2, %v4709_v61  ;;  %v3140_v46 = vsub.f32 %v2622_v24, %v4534_v59  ;;  %vm9059_vm8 = vcmp.eq.s32.totalorder %v5985_v28, %v6755_v47  ;;  %v4538_v24 = vld [vmem:[%s4831_s7 + $0xa0] sm:$0xff] }
 0x333   : > { %4155 = vmatpush.xpose.msk.msra.mxu3 %vm9050_vm14, %v4709_v61  ;;  %4279 = vmatmul.lmr.bf16.gmra.16.mxu0  ;;  %v7766_v49 = vadd.f32 %v3201_v54, %v3200_v3  ;;  %vm9061_vm2 = vcmp.eq.s32.totalorder %v5985_v28, %v7201_v1  ;;  %vm9062_vm14 = vcmp.eq.s32.totalorder %v5985_v28, %v7243_v62 }
 0x334   : > { %4334 = vmatmul.lmr.bf16.gmra.16.mxu1  ;;  %4389 = vmatmul.lmr.bf16.gmra.16.mxu2  ;;  %v3204_v4 = vmul.f32 %v3140_v46, %v3140_v46 }
 0x335   : > { %4444 = vmatmul.lmr.bf16.gmra.16.mxu3  ;;  %4108 = vmatpush.xpose.msk.msra.mxu0 %vm9051_vm12, %v4709_v61  ;;  %v2686_v19 = vpop.f32.mrf.mxu2  ;;  %vm9063_vm12 = vcmp.eq.s32.totalorder %v5977_v55, %v6755_v47 }
 0x336   : > { %4124 = vmatpush.xpose.msk.msra.mxu1 %vm9052_vm7, %v4709_v61  ;;  %v2751_v23 = vpop.f32.mrf.mxu3  ;;  %4140 = vmatpush.xpose.msk.msra.mxu2 %vm9053_vm1, %v4709_v61  ;;  %vm9064_vm7 = vcmp.eq.s32.totalorder %v5977_v55, %v6764_v48  ;;  %vm9065_vm1 = vcmp.eq.s32.totalorder %v5977_v55, %v7201_v1 }
 0x337   : > { %4156 = vmatpush.xpose.msk.msra.mxu3 %vm2121_vm3, %v4709_v61  ;;  %v2752_v44 = vadd.f32 %v2751_v23, %v2686_v19  ;;  %vm9055_vm3 = vcmp.eq.s32.totalorder %v6014_v21, %v6764_v48  ;;  %v4539_v19 = vld [vmem:[%s4831_s7 + $0xa8] sm:$0xff] }
 0x338   : > { %v2559_v0 = vpop.f32.mrf.mxu0 }
 0x339   : > { %3063 = vst [vmem:[%s7635_s13 + $0x68] sm:$0xff] %v2752_v44  ;;  %v3141_v6 = vsub.f32 %v2752_v44, %v4535_v35  ;;  %v2624_v25 = vpop.f32.mrf.mxu1  ;;  %4109 = vmatpush.xpose.msk.msra.mxu0 %vm9054_vm0, %v4709_v61  ;;  %vm9066_vm0 = vcmp.eq.s32.totalorder %v5977_v55, %v7243_v62 }
 0x33a   : > { %4125 = vmatpush.xpose.msk.msra.mxu1 %vm9055_vm3, %v4709_v61  ;;  %v2625_v20 = vadd.f32 %v2624_v25, %v2559_v0  ;;  %4141 = vmatpush.xpose.msk.msra.mxu2 %vm2116_vm11, %v4709_v61  ;;  %vm9057_vm11 = vcmp.eq.s32.totalorder %v6006_v27, %v6764_v48  ;;  %vm9067_vm3 = vcmp.eq.s32.totalorder %v5969_v33, %v6755_v47 }
 0x33b   : > { %v3205_v58 = vmul.f32 %v3141_v6, %v3141_v6  ;;  %4157 = vmatpush.xpose.msk.msra.mxu3 %vm2117_vm4, %v4709_v61  ;;  %4280 = vmatmul.lmr.bf16.gmra.16.mxu0  ;;  %vm9058_vm4 = vcmp.eq.s32.totalorder %v6006_v27, %v7243_v62  ;;  %v4540_v6 = vld [vmem:[%s4831_s7 + $0xc0] sm:$0xff] }
 0x33c   : > { %4335 = vmatmul.lmr.bf16.gmra.16.mxu1  ;;  %3066 = vst [vmem:[%s7635_s13 + $0x80] sm:$0xff] %v2625_v20  ;;  %4390 = vmatmul.lmr.bf16.gmra.16.mxu2  ;;  %v3144_v22 = vsub.f32 %v2625_v20, %v4536_v31 }
 0x33d   : > { %4445 = vmatmul.lmr.bf16.gmra.16.mxu3  ;;  %4110 = vmatpush.xpose.msk.msra.mxu0 %vm9056_vm10, %v4709_v61  ;;  %v7804_v21 = vadd.f32 %v3205_v58, %v3204_v4  ;;  %vm9068_vm10 = vcmp.eq.s32.totalorder %v5969_v33, %v6764_v48  ;;  %v4541_v4 = vld [vmem:[%s4831_s7 + $0xc8] sm:$0xff] }
 0x33e   : > { %4126 = vmatpush.xpose.msk.msra.mxu1 %vm9057_vm11, %v4709_v61  ;;  %4142 = vmatpush.xpose.msk.msra.mxu2 %vm2112_vm5, %v4709_v61  ;;  %vm9060_vm5 = vcmp.eq.s32.totalorder %v5985_v28, %v6764_v48  ;;  %v3208_v10 = vmul.f32 %v3144_v22, %v3144_v22  ;;  %vm9069_vm11 = vcmp.eq.s32.totalorder %v5969_v33, %v7201_v1 }
 0x33f   : > { %4158 = vmatpush.xpose.msk.msra.mxu3 %vm9058_vm4, %v4709_v61  ;;  %v2689_v5 = vpop.f32.mrf.mxu2  ;;  %vm9070_vm4 = vcmp.eq.s32.totalorder %v5969_v33, %v7243_v62 }
 0x340   : > { %v2754_v60 = vpop.f32.mrf.mxu3  ;;  %v2562_v63 = vpop.f32.mrf.mxu0 }
 0x341   : > { %v2755_v42 = vadd.f32 %v2754_v60, %v2689_v5  ;;  %v2627_v12 = vpop.f32.mrf.mxu1  ;;  %4111 = vmatpush.xpose.msk.msra.mxu0 %vm9059_vm8, %v4709_v61  ;;  %vm9071_vm8 = vcmp.eq.s32.totalorder %v8901_v14, %v6755_v47 }
 0x342   : > { %4127 = vmatpush.xpose.msk.msra.mxu1 %vm9060_vm5, %v4709_v61  ;;  %v2628_v27 = vadd.f32 %v2627_v12, %v2562_v63  ;;  %4143 = vmatpush.xpose.msk.msra.mxu2 %vm9061_vm2, %v4709_v61  ;;  %vm9072_vm5 = vcmp.eq.s32.totalorder %v8901_v14, %v6764_v48  ;;  %vm9073_vm2 = vcmp.eq.s32.totalorder %v8901_v14, %v7201_v1  ;;  %v4542_v63 = vld [vmem:[%s4831_s7 + $0xe0] sm:$0xff] }
 0x343   : > { %3067 = vst [vmem:[%s7635_s13 + $0x88] sm:$0xff] %v2755_v42  ;;  %v3145_v7 = vsub.f32 %v2755_v42, %v4537_v57  ;;  %4159 = vmatpush.xpose.msk.msra.mxu3 %vm9062_vm14, %v4709_v61  ;;  %4281 = vmatmul.lmr.bf16.gmra.16.mxu0  ;;  %vm9074_vm14 = vcmp.eq.s32.totalorder %v8901_v14, %v7243_v62 }
 0x344   : > { %4336 = vmatmul.lmr.bf16.gmra.16.mxu1  ;;  %3070 = vst [vmem:[%s7635_s13 + $0xa0] sm:$0xff] %v2628_v27  ;;  %4391 = vmatmul.lmr.bf16.gmra.16.mxu2  ;;  %v3148_v18 = vsub.f32 %v2628_v27, %v4538_v24 }
 0x345   : > { %v3209_v43 = vmul.f32 %v3145_v7, %v3145_v7  ;;  %4446 = vmatmul.lmr.bf16.gmra.16.mxu3  ;;  %4112 = vmatpush.xpose.msk.msra.mxu0 %vm9063_vm12, %v4709_v61  ;;  %vm9075_vm12 = vcmp.eq.s32.totalorder %v5928_v17, %v6755_v47 }
 0x346   : > { %4128 = vmatpush.xpose.msk.msra.mxu1 %vm9064_vm7, %v4709_v61  ;;  %4144 = vmatpush.xpose.msk.msra.mxu2 %vm9065_vm1, %v4709_v61  ;;  %v3212_v44 = vmul.f32 %v3148_v18, %v3148_v18  ;;  %vm9076_vm7 = vcmp.eq.s32.totalorder %v5928_v17, %v6764_v48  ;;  %vm9077_vm1 = vcmp.eq.s32.totalorder %v5928_v17, %v7201_v1 }
 0x347   : > { %4160 = vmatpush.xpose.msk.msra.mxu3 %vm9066_vm0, %v4709_v61  ;;  %v7842_v28 = vadd.f32 %v3209_v43, %v3208_v10  ;;  %v2692_v51 = vpop.f32.mrf.mxu2  ;;  %vm9078_vm0 = vcmp.eq.s32.totalorder %v5928_v17, %v7243_v62  ;;  %v4543_v10 = vld [vmem:[%s4831_s7 + $0xe8] sm:$0xff] }
 0x348   : > { %v2757_v41 = vpop.f32.mrf.mxu3  ;;  %v2565_v54 = vpop.f32.mrf.mxu0 }
 0x349   : > { %v2758_v2 = vadd.f32 %v2757_v41, %v2692_v51  ;;  %v2630_v3 = vpop.f32.mrf.mxu1  ;;  %4113 = vmatpush.xpose.msk.msra.mxu0 %vm9067_vm3, %v4709_v61  ;;  %vm9079_vm3 = vcmp.eq.s32.totalorder %v5794_v30, %v6755_v47 }
 0x34a   : > { %4129 = vmatpush.xpose.msk.msra.mxu1 %vm9068_vm10, %v4709_v61  ;;  %v2631_v55 = vadd.f32 %v2630_v3, %v2565_v54  ;;  %4145 = vmatpush.xpose.msk.msra.mxu2 %vm9069_vm11, %v4709_v61  ;;  %vm9080_vm10 = vcmp.eq.s32.totalorder %v5794_v30, %v6764_v48  ;;  %vm9081_vm11 = vcmp.eq.s32.totalorder %v5794_v30, %v7201_v1  ;;  %v4544_v54 = vld [vmem:[%s4831_s7 + $0x100] sm:$0xff] }
 0x34b   : > { %3071 = vst [vmem:[%s7635_s13 + $0xa8] sm:$0xff] %v2758_v2  ;;  %v3149_v23 = vsub.f32 %v2758_v2, %v4539_v19  ;;  %4161 = vmatpush.xpose.msk.msra.mxu3 %vm9070_vm4, %v4709_v61  ;;  %4282 = vmatmul.lmr.bf16.gmra.16.mxu0  ;;  %vm9082_vm4 = vcmp.eq.s32.totalorder %v5794_v30, %v7243_v62 }
 0x34c   : > { %4337 = vmatmul.lmr.bf16.gmra.16.mxu1  ;;  %3074 = vst [vmem:[%s7635_s13 + $0xc0] sm:$0xff] %v2631_v55  ;;  %4392 = vmatmul.lmr.bf16.gmra.16.mxu2  ;;  %v3152_v0 = vsub.f32 %v2631_v55, %v4540_v6 }
 0x34d   : > { %v3213_v59 = vmul.f32 %v3149_v23, %v3149_v23  ;;  %4447 = vmatmul.lmr.bf16.gmra.16.mxu3  ;;  %4114 = vmatpush.xpose.msk.msra.mxu0 %vm9071_vm8, %v4709_v61  ;;  %vm9083_vm8 = vcmp.eq.s32.totalorder %v5750_v15, %v6755_v47 }
 0x34e   : > { %4130 = vmatpush.xpose.msk.msra.mxu1 %vm9072_vm5, %v4709_v61  ;;  %4146 = vmatpush.xpose.msk.msra.mxu2 %vm9073_vm2, %v4709_v61  ;;  %v3216_v60 = vmul.f32 %v3152_v0, %v3152_v0  ;;  %vm9084_vm5 = vcmp.eq.s32.totalorder %v5750_v15, %v6764_v48  ;;  %vm9087_vm2 = vcmp.eq.s32.totalorder %v6287_v50, %v7201_v1 }
 0x34f   : > { %4162 = vmatpush.xpose.msk.msra.mxu3 %vm9074_vm14, %v4709_v61  ;;  %v7880_v33 = vadd.f32 %v3213_v59, %v3212_v44  ;;  %v2695_v46 = vpop.f32.mrf.mxu2  ;;  %v4545_v44 = vld [vmem:[%s4831_s7 + $0x108] sm:$0xff]  ;;  %vm9088_vm14 = vcmp.eq.s32.totalorder %v6287_v50, %v7243_v62 }
 0x350   : > { %v2760_v35 = vpop.f32.mrf.mxu3  ;;  %v2568_v20 = vpop.f32.mrf.mxu0 }
 0x351   : > { %v2761_v25 = vadd.f32 %v2760_v35, %v2695_v46  ;;  %v2633_v58 = vpop.f32.mrf.mxu1  ;;  %4115 = vmatpush.xpose.msk.msra.mxu0 %vm9075_vm12, %v4709_v61  ;;  %vm9089_vm12 = vcmp.eq.s32.totalorder %v6274_v45, %v6755_v47 }
 0x352   : > { %4131 = vmatpush.xpose.msk.msra.mxu1 %vm9076_vm7, %v4709_v61  ;;  %v2634_v14 = vadd.f32 %v2633_v58, %v2568_v20  ;;  %4147 = vmatpush.xpose.msk.msra.mxu2 %vm9077_vm1, %v4709_v61  ;;  %v4546_v20 = vld [vmem:[%s4831_s7 + $0x120] sm:$0xff]  ;;  %vm9090_vm7 = vcmp.eq.s32.totalorder %v6274_v45, %v6764_v48  ;;  %vm9091_vm1 = vcmp.eq.s32.totalorder %v6274_v45, %v7201_v1 }
 0x353   : > { %3075 = vst [vmem:[%s7635_s13 + $0xc8] sm:$0xff] %v2761_v25  ;;  %v3153_v5 = vsub.f32 %v2761_v25, %v4541_v4  ;;  %4163 = vmatpush.xpose.msk.msra.mxu3 %vm9078_vm0, %v4709_v61  ;;  %4283 = vmatmul.lmr.bf16.gmra.16.mxu0  ;;  %vm9092_vm0 = vcmp.eq.s32.totalorder %v6274_v45, %v7243_v62 }
 0x354   : > { %4338 = vmatmul.lmr.bf16.gmra.16.mxu1  ;;  %3078 = vst [vmem:[%s7635_s13 + $0xe0] sm:$0xff] %v2634_v14  ;;  %4393 = vmatmul.lmr.bf16.gmra.16.mxu2  ;;  %v3156_v12 = vsub.f32 %v2634_v14, %v4542_v63 }
 0x355   : > { %v3217_v31 = vmul.f32 %v3153_v5, %v3153_v5  ;;  %4448 = vmatmul.lmr.bf16.gmra.16.mxu3  ;;  %4116 = vmatpush.xpose.msk.msra.mxu0 %vm9079_vm3, %v4709_v61  ;;  %vm9093_vm3 = vcmp.eq.s32.totalorder %v6266_v37, %v6755_v47 }
 0x356   : > { %4132 = vmatpush.xpose.msk.msra.mxu1 %vm9080_vm10, %v4709_v61  ;;  %4148 = vmatpush.xpose.msk.msra.mxu2 %vm9081_vm11, %v4709_v61  ;;  %v3220_v51 = vmul.f32 %v3156_v12, %v3156_v12  ;;  %vm9094_vm10 = vcmp.eq.s32.totalorder %v6266_v37, %v6764_v48  ;;  %vm9095_vm11 = vcmp.eq.s32.totalorder %v6266_v37, %v7201_v1 }
 0x357   : > { %4164 = vmatpush.xpose.msk.msra.mxu3 %vm9082_vm4, %v4709_v61  ;;  %v7918_v17 = vadd.f32 %v3217_v31, %v3216_v60  ;;  %v2698_v22 = vpop.f32.mrf.mxu2  ;;  %v4547_v31 = vld [vmem:[%s4831_s7 + $0x128] sm:$0xff]  ;;  %vm9096_vm4 = vcmp.eq.s32.totalorder %v6266_v37, %v7243_v62 }
 0x358   : > { %v2763_v42 = vpop.f32.mrf.mxu3  ;;  %v2571_v57 = vpop.f32.mrf.mxu0 }
 0x359   : > { %v2764_v27 = vadd.f32 %v2763_v42, %v2698_v22  ;;  %v2636_v7 = vpop.f32.mrf.mxu1  ;;  %4117 = vmatpush.xpose.msk.msra.mxu0 %vm9083_vm8, %v4709_v61  ;;  %vm9097_vm8 = vcmp.eq.s32.totalorder %v6204_v29, %v6755_v47 }
 0x35a   : > { %4133 = vmatpush.xpose.msk.msra.mxu1 %vm9084_vm5, %v4709_v61  ;;  %v2637_v30 = vadd.f32 %v2636_v7, %v2571_v57  ;;  %4149 = vmatpush.xpose.msk.msra.mxu2 %vm2084_vm9, %v4709_v61  ;;  %v4548_v7 = vld [vmem:[%s4831_s7 + $0x140] sm:$0xff]  ;;  %vm9086_vm9 = vcmp.eq.s32.totalorder %v6287_v50, %v6764_v48  ;;  %vm9098_vm5 = vcmp.eq.s32.totalorder %v6204_v29, %v6764_v48 }
 0x35b   : > { %3079 = vst [vmem:[%s7635_s13 + $0xe8] sm:$0xff] %v2764_v27  ;;  %v3157_v43 = vsub.f32 %v2764_v27, %v4543_v10  ;;  %4165 = vmatpush.xpose.msk.msra.mxu3 %vm2085_vm6, %v4709_v61  ;;  %4284 = vmatmul.lmr.bf16.gmra.16.mxu0  ;;  %vm9085_vm6 = vcmp.eq.s32.totalorder %v6287_v50, %v6755_v47 }
 0x35c   : > { %4339 = vmatmul.lmr.bf16.gmra.16.mxu1  ;;  %3082 = vst [vmem:[%s7635_s13 + $0x100] sm:$0xff] %v2637_v30  ;;  %4394 = vmatmul.lmr.bf16.gmra.16.mxu2  ;;  %v3160_v3 = vsub.f32 %v2637_v30, %v4544_v54 }
 0x35d   : > { %v3221_v41 = vmul.f32 %v3157_v43, %v3157_v43  ;;  %4449 = vmatmul.lmr.bf16.gmra.16.mxu3 }
 0x35e   : > { %v3224_v46 = vmul.f32 %v3160_v3, %v3160_v3 }
 0x35f   : > { %v7940_v24 = vadd.f32 %v3221_v41, %v3220_v51  ;;  %v2701_v18 = vpop.f32.mrf.mxu2 }
 0x360   : > { %v2766_v2 = vpop.f32.mrf.mxu3  ;;  %v2574_v19 = vpop.f32.mrf.mxu0 }
 0x361   : > { %v2767_v55 = vadd.f32 %v2766_v2, %v2701_v18  ;;  %v2639_v15 = vpop.f32.mrf.mxu1  ;;  %v4549_v18 = vld [vmem:[%s4831_s7 + $0x148] sm:$0xff] }
 0x362   : > { %v2640_v23 = vadd.f32 %v2639_v15, %v2574_v19 }
 0x363   : > { %3083 = vst [vmem:[%s7635_s13 + $0x108] sm:$0xff] %v2767_v55  ;;  %v3161_v59 = vsub.f32 %v2767_v55, %v4545_v44  ;;  %4285 = vmatmul.lmr.bf16.gmra.16.mxu0 }
 0x364   : > { %4340 = vmatmul.lmr.bf16.gmra.16.mxu1  ;;  %3086 = vst [vmem:[%s7635_s13 + $0x120] sm:$0xff] %v2640_v23  ;;  %4395 = vmatmul.lmr.bf16.gmra.16.mxu2  ;;  %v3164_v58 = vsub.f32 %v2640_v23, %v4546_v20  ;;  %v4550_v23 = vld [vmem:[%s4831_s7 + $0x160] sm:$0xff] }
 0x365   : > { %v3225_v35 = vmul.f32 %v3161_v59, %v3161_v59  ;;  %4450 = vmatmul.lmr.bf16.gmra.16.mxu3 }
 0x366   : > { %v3228_v42 = vmul.f32 %v3164_v58, %v3164_v58 }
 0x367   : > { %v7946_v6 = vadd.f32 %v3225_v35, %v3224_v46  ;;  %v2704_v0 = vpop.f32.mrf.mxu2 }
 0x368   : > { %v2769_v25 = vpop.f32.mrf.mxu3  ;;  %v2577_v4 = vpop.f32.mrf.mxu0 }
 0x369   : > { %v2770_v14 = vadd.f32 %v2769_v25, %v2704_v0  ;;  %v2642_v5 = vpop.f32.mrf.mxu1  ;;  %v4551_v25 = vld [vmem:[%s4831_s7 + $0x168] sm:$0xff] }
 0x36a   : > { %v2643_v60 = vadd.f32 %v2642_v5, %v2577_v4 }
 0x36b   : > { %3087 = vst [vmem:[%s7635_s13 + $0x128] sm:$0xff] %v2770_v14  ;;  %v3165_v22 = vsub.f32 %v2770_v14, %v4547_v31  ;;  %4286 = vmatmul.lmr.bf16.gmra.16.mxu0  ;;  %v4552_v31 = vld [vmem:[%s4831_s7 + $0x180] sm:$0xff] }
 0x36c   : > { %4341 = vmatmul.lmr.bf16.gmra.16.mxu1  ;;  %3090 = vst [vmem:[%s7635_s13 + $0x140] sm:$0xff] %v2643_v60  ;;  %4396 = vmatmul.lmr.bf16.gmra.16.mxu2  ;;  %v3168_v30 = vsub.f32 %v2643_v60, %v4548_v7  ;;  %v4553_v7 = vld [vmem:[%s4831_s7 + $0x188] sm:$0xff] }
 0x36d   : > { %v3229_v63 = vmul.f32 %v3165_v22, %v3165_v22  ;;  %4451 = vmatmul.lmr.bf16.gmra.16.mxu3 }
 0x36e   : > { %v3232_v54 = vmul.f32 %v3168_v30, %v3168_v30 }
 0x36f   : > { %v7952_v12 = vadd.f32 %v3229_v63, %v3228_v42  ;;  %v2707_v27 = vpop.f32.mrf.mxu2 }
 0x370   : > { %v2772_v57 = vpop.f32.mrf.mxu3  ;;  %v2580_v43 = vpop.f32.mrf.mxu0 }
 0x371   : > { %v2773_v10 = vadd.f32 %v2772_v57, %v2707_v27  ;;  %v2645_v51 = vpop.f32.mrf.mxu1 }
 0x372   : > { %v2646_v41 = vadd.f32 %v2645_v51, %v2580_v43 }
 0x373   : > { %3091 = vst [vmem:[%s7635_s13 + $0x148] sm:$0xff] %v2773_v10  ;;  %v3169_v2 = vsub.f32 %v2773_v10, %v4549_v18  ;;  %4287 = vmatmul.lmr.bf16.gmra.16.mxu0 }
 0x374   : > { %4342 = vmatmul.lmr.bf16.gmra.16.mxu1  ;;  %3094 = vst [vmem:[%s7635_s13 + $0x160] sm:$0xff] %v2646_v41  ;;  %4397 = vmatmul.lmr.bf16.gmra.16.mxu2  ;;  %v3172_v44 = vsub.f32 %v2646_v41, %v4550_v23 }
 0x375   : > { %v3233_v3 = vmul.f32 %v3169_v2, %v3169_v2  ;;  %4452 = vmatmul.lmr.bf16.gmra.16.mxu3  ;;  %v4554_v2 = vld [vmem:[%s4831_s7 + $0x1a0] sm:$0xff] }
 0x376   : > { %v3236_v58 = vmul.f32 %v3172_v44, %v3172_v44  ;;  %v4555_v44 = vld [vmem:[%s4831_s7 + $0x1a8] sm:$0xff] }
 0x377   : > { %v7958_v55 = vadd.f32 %v3233_v3, %v3232_v54  ;;  %v2710_v19 = vpop.f32.mrf.mxu2 }
 0x378   : > { %v2775_v15 = vpop.f32.mrf.mxu3  ;;  %v2583_v46 = vpop.f32.mrf.mxu0 }
 0x379   : > { %v2776_v59 = vadd.f32 %v2775_v15, %v2710_v19  ;;  %v2648_v35 = vpop.f32.mrf.mxu1 }
 0x37a   : > { %v2649_v0 = vadd.f32 %v2648_v35, %v2583_v46 }
 0x37b   : > { %3095 = vst [vmem:[%s7635_s13 + $0x168] sm:$0xff] %v2776_v59  ;;  %v3173_v20 = vsub.f32 %v2776_v59, %v4551_v25  ;;  %4288 = vmatmul.lmr.bf16.gmra.16.mxu0 }
 0x37c   : > { %4343 = vmatmul.lmr.bf16.gmra.16.mxu1  ;;  %3098 = vst [vmem:[%s7635_s13 + $0x180] sm:$0xff] %v2649_v0  ;;  %4398 = vmatmul.lmr.bf16.gmra.16.mxu2  ;;  %v3176_v22 = vsub.f32 %v2649_v0, %v4552_v31 }
 0x37d   : > { %v3237_v14 = vmul.f32 %v3173_v20, %v3173_v20  ;;  %4453 = vmatmul.lmr.bf16.gmra.16.mxu3 }
 0x37e   : > { %v3240_v10 = vmul.f32 %v3176_v22, %v3176_v22 }
 0x37f   : > { %v7964_v4 = vadd.f32 %v3237_v14, %v3236_v58  ;;  %v2713_v5 = vpop.f32.mrf.mxu2  ;;  %v4556_v58 = vld [vmem:[%s4831_s7 + $0x1c0] sm:$0xff] }
 0x380   : > { %v2778_v60 = vpop.f32.mrf.mxu3  ;;  %v2586_v63 = vpop.f32.mrf.mxu0 }
 0x381   : > { %v2779_v42 = vadd.f32 %v2778_v60, %v2713_v5  ;;  %v2651_v27 = vpop.f32.mrf.mxu1 }
 0x382   : > { %v2652_v57 = vadd.f32 %v2651_v27, %v2586_v63 }
 0x383   : > { %3099 = vst [vmem:[%s7635_s13 + $0x188] sm:$0xff] %v2779_v42  ;;  %v3177_v30 = vsub.f32 %v2779_v42, %v4553_v7  ;;  %4289 = vmatmul.lmr.bf16.gmra.16.mxu0  ;;  %v4557_v42 = vld [vmem:[%s4831_s7 + $0x1c8] sm:$0xff] }
 0x384   : > { %4344 = vmatmul.lmr.bf16.gmra.16.mxu1  ;;  %3102 = vst [vmem:[%s7635_s13 + $0x1a0] sm:$0xff] %v2652_v57  ;;  %4399 = vmatmul.lmr.bf16.gmra.16.mxu2  ;;  %v3180_v54 = vsub.f32 %v2652_v57, %v4554_v2 }
 0x385   : > { %v3241_v43 = vmul.f32 %v3177_v30, %v3177_v30  ;;  %4454 = vmatmul.lmr.bf16.gmra.16.mxu3 }
 0x386   : > { %v3244_v46 = vmul.f32 %v3180_v54, %v3180_v54 }
 0x387   : > { %v7970_v51 = vadd.f32 %v3241_v43, %v3240_v10  ;;  %v2716_v41 = vpop.f32.mrf.mxu2  ;;  %v4558_v43 = vld [vmem:[%s4831_s7 + $0x1e0] sm:$0xff] }
 0x388   : > { %v2781_v18 = vpop.f32.mrf.mxu3  ;;  %v2589_v19 = vpop.f32.mrf.mxu0 }
 0x389   : > { %v2782_v3 = vadd.f32 %v2781_v18, %v2716_v41  ;;  %v2654_v15 = vpop.f32.mrf.mxu1 }
 0x38a   : > { %v2655_v23 = vadd.f32 %v2654_v15, %v2589_v19  ;;  %v4559_v19 = vld [vmem:[%s4831_s7 + $0x1e8] sm:$0xff] }
 0x38b   : > { %3103 = vst [vmem:[%s7635_s13 + $0x1a8] sm:$0xff] %v2782_v3  ;;  %v3181_v59 = vsub.f32 %v2782_v3, %v4555_v44  ;;  %4290 = vmatmul.lmr.bf16.gmra.16.mxu0 }
 0x38c   : > { %4345 = vmatmul.lmr.bf16.gmra.16.mxu1  ;;  %3106 = vst [vmem:[%s7635_s13 + $0x1c0] sm:$0xff] %v2655_v23  ;;  %4400 = vmatmul.lmr.bf16.gmra.16.mxu2  ;;  %v3184_v14 = vsub.f32 %v2655_v23, %v4556_v58 }
 0x38d   : > { %v3245_v35 = vmul.f32 %v3181_v59, %v3181_v59  ;;  %4455 = vmatmul.lmr.bf16.gmra.16.mxu3  ;;  %v4560_v59 = vld [vmem:[%s4831_s7 + $0x10] sm:$0xff] }
 0x38e   : > { %v3248_v27 = vmul.f32 %v3184_v14, %v3184_v14 }
 0x38f   : > { %v7976_v0 = vadd.f32 %v3245_v35, %v3244_v46  ;;  %v2719_v25 = vpop.f32.mrf.mxu2 }
 0x390   : > { %v2784_v20 = vpop.f32.mrf.mxu3  ;;  %v2592_v60 = vpop.f32.mrf.mxu0 }
 0x391   : > { %v2785_v5 = vadd.f32 %v2784_v20, %v2719_v25  ;;  %v2657_v31 = vpop.f32.mrf.mxu1 }
 0x392   : > { %v2658_v22 = vadd.f32 %v2657_v31, %v2592_v60  ;;  %v4561_v31 = vld [vmem:[%s4831_s7 + $0x18] sm:$0xff] }
 0x393   : > { %3107 = vst [vmem:[%s7635_s13 + $0x1c8] sm:$0xff] %v2785_v5  ;;  %v3185_v63 = vsub.f32 %v2785_v5, %v4557_v42  ;;  %4291 = vmatmul.lmr.bf16.gmra.16.mxu0 }
 0x394   : > { %4346 = vmatmul.lmr.bf16.gmra.16.mxu1  ;;  %3110 = vst [vmem:[%s7635_s13 + $0x1e0] sm:$0xff] %v2658_v22  ;;  %4401 = vmatmul.lmr.bf16.gmra.16.mxu2  ;;  %v3188_v41 = vsub.f32 %v2658_v22, %v4558_v43 }
 0x395   : > { %v3249_v57 = vmul.f32 %v3185_v63, %v3185_v63  ;;  %4456 = vmatmul.lmr.bf16.gmra.16.mxu3  ;;  %v4562_v63 = vld [vmem:[%s4831_s7 + $0x30] sm:$0xff] }
 0x396   : > { %v3252_v23 = vmul.f32 %v3188_v41, %v3188_v41 }
 0x397   : > { %v7982_v7 = vadd.f32 %v3249_v57, %v3248_v27  ;;  %v2722_v30 = vpop.f32.mrf.mxu2 }
 0x398   : > { %v2787_v10 = vpop.f32.mrf.mxu3  ;;  %v2807_v2 = vpop.f32.mrf.mxu0 }
 0x399   : > { %v2788_v18 = vadd.f32 %v2787_v10, %v2722_v30  ;;  %v2872_v54 = vpop.f32.mrf.mxu1 }
 0x39a   : > { %v2873_v3 = vadd.f32 %v2872_v54, %v2807_v2  ;;  %v4563_v2 = vld [vmem:[%s4831_s7 + $0x38] sm:$0xff] }
 0x39b   : > { %3111 = vst [vmem:[%s7635_s13 + $0x1e8] sm:$0xff] %v2788_v18  ;;  %v3189_v15 = vsub.f32 %v2788_v18, %v4559_v19  ;;  %3451 = vmatmul.f32.vlgmr.msra.gmra.mxu0 %v4709_v61  ;;  %v4564_v19 = vld [vmem:[%s4831_s7 + $0x50] sm:$0xff] }
 0x39c   : > { %3471 = vmatmul.f32.vlgmr.msra.gmra.mxu1 %v4709_v61  ;;  %3052 = vst [vmem:[%s7635_s13 + $0x10] sm:$0xff] %v2873_v3  ;;  %3491 = vmatmul.f32.vlgmr.msra.gmra.mxu2 %v4709_v61  ;;  %v3130_v46 = vsub.f32 %v2873_v3, %v4560_v59 }
 0x39d   : > { %v3253_v44 = vmul.f32 %v3189_v15, %v3189_v15  ;;  %3511 = vmatmul.f32.vlgmr.msra.gmra.mxu3 %v4709_v61  ;;  %4166 = vmatpush.xpose.msk.msra.mxu0 %vm9085_vm6, %v4709_v61  ;;  %vm9099_vm6 = vcmp.eq.s32.totalorder %v6204_v29, %v7201_v1 }
 0x39e   : > { %4182 = vmatpush.xpose.msk.msra.mxu1 %vm9086_vm9, %v4709_v61  ;;  %4198 = vmatpush.xpose.msk.msra.mxu2 %vm9087_vm2, %v4709_v61  ;;  %v3194_v58 = vmul.f32 %v3130_v46, %v3130_v46  ;;  %vm9100_vm9 = vcmp.eq.s32.totalorder %v6204_v29, %v7243_v62  ;;  %vm9101_vm2 = vcmp.eq.s32.totalorder %v6201_v34, %v6755_v47 }
 0x39f   : > { %v8001_v35 = vadd.f32 %v3253_v44, %v3252_v23  ;;  %4214 = vmatpush.xpose.msk.msra.mxu3 %vm9088_vm14, %v4709_v61  ;;  %v2937_v25 = vpop.f32.mrf.mxu2  ;;  %vm9102_vm14 = vcmp.eq.s32.totalorder %v6201_v34, %v6764_v48 }
 0x3a0   : > { %v3002_v20 = vpop.f32.mrf.mxu3  ;;  %v2810_v5 = vpop.f32.mrf.mxu0  ;;  %v3329_v57 = vadd.f32 %v7692_v11, %v3194_v58  ;;  %v4565_v58 = vld [vmem:[%s4831_s7 + $0x58] sm:$0xff] }
 0x3a1   : > { %v3003_v14 = vadd.f32 %v3002_v20, %v2937_v25  ;;  %v2875_v60 = vpop.f32.mrf.mxu1  ;;  %4167 = vmatpush.xpose.msk.msra.mxu0 %vm9089_vm12, %v4709_v61  ;;  %vm9103_vm12 = vcmp.eq.s32.totalorder %v6201_v34, %v7201_v1 }
 0x3a2   : > { %4183 = vmatpush.xpose.msk.msra.mxu1 %vm9090_vm7, %v4709_v61  ;;  %v2876_v50 = vadd.f32 %v2875_v60, %v2810_v5  ;;  %4199 = vmatpush.xpose.msk.msra.mxu2 %vm9091_vm1, %v4709_v61  ;;  %vm9104_vm7 = vcmp.eq.s32.totalorder %v6201_v34, %v7243_v62  ;;  %vm9105_vm1 = vcmp.eq.s32.totalorder %v6182_v8, %v6755_v47  ;;  %v4566_v60 = vld [vmem:[%s4831_s7 + $0x70] sm:$0xff] }
 0x3a3   : > { %3053 = vst [vmem:[%s7635_s13 + $0x18] sm:$0xff] %v3003_v14  ;;  %v3131_v22 = vsub.f32 %v3003_v14, %v4561_v31  ;;  %4215 = vmatpush.xpose.msk.msra.mxu3 %vm9092_vm0, %v4709_v61  ;;  %vm9106_vm0 = vcmp.eq.s32.totalorder %v6182_v8, %v6764_v48 }
 0x3a4   : > { %3056 = vst [vmem:[%s7635_s13 + $0x30] sm:$0xff] %v2876_v50  ;;  %v3134_v27 = vsub.f32 %v2876_v50, %v4562_v63 }
 0x3a5   : > { %v3195_v42 = vmul.f32 %v3131_v22, %v3131_v22  ;;  %4168 = vmatpush.xpose.msk.msra.mxu0 %vm9093_vm3, %v4709_v61  ;;  %vm9107_vm3 = vcmp.eq.s32.totalorder %v6182_v8, %v7201_v1 }
 0x3a6   : > { %4184 = vmatpush.xpose.msk.msra.mxu1 %vm9094_vm10, %v4709_v61  ;;  %4200 = vmatpush.xpose.msk.msra.mxu2 %vm9095_vm11, %v4709_v61  ;;  %v3198_v10 = vmul.f32 %v3134_v27, %v3134_v27  ;;  %vm9108_vm10 = vcmp.eq.s32.totalorder %v6182_v8, %v7243_v62  ;;  %vm9109_vm11 = vcmp.eq.s32.totalorder %v6175_v56, %v6755_v47 }
 0x3a7   : > { %4216 = vmatpush.xpose.msk.msra.mxu3 %vm9096_vm4, %v4709_v61  ;;  %v3330_v45 = vadd.f32 %v3329_v57, %v3195_v42  ;;  %v2940_v11 = vpop.f32.mrf.mxu2  ;;  %vm9110_vm4 = vcmp.eq.s32.totalorder %v6175_v56, %v6764_v48 }
 0x3a8   : > { %v3005_v30 = vpop.f32.mrf.mxu3  ;;  %v2813_v41 = vpop.f32.mrf.mxu0  ;;  %v3334_v23 = vadd.f32 %v7730_v9, %v3198_v10  ;;  %v4568_v10 = vld [vmem:[%s4831_s7 + $0x90] sm:$0xff] }
 0x3a9   : > { %v3006_v43 = vadd.f32 %v3005_v30, %v2940_v11  ;;  %v2878_v18 = vpop.f32.mrf.mxu1  ;;  %3331 = vadd.xlane.f32.xlu2 %v3330_v45  ;;  %4169 = vmatpush.xpose.msk.msra.mxu0 %vm9097_vm8, %v4709_v61  ;;  %vm9111_vm8 = vcmp.eq.s32.totalorder %v6175_v56, %v7201_v1  ;;  %v4567_v45 = vld [vmem:[%s4831_s7 + $0x78] sm:$0xff] }
 0x3aa   : > { %4185 = vmatpush.xpose.msk.msra.mxu1 %vm9098_vm5, %v4709_v61  ;;  %v2879_v37 = vadd.f32 %v2878_v18, %v2813_v41  ;;  %4201 = vmatpush.xpose.msk.msra.mxu2 %vm9099_vm6, %v4709_v61  ;;  %vm9112_vm5 = vcmp.eq.s32.totalorder %v6175_v56, %v7243_v62  ;;  %vm9113_vm6 = vcmp.eq.s32.totalorder %v6159_v16, %v6755_v47 }
 0x3ab   : > { %3057 = vst [vmem:[%s7635_s13 + $0x38] sm:$0xff] %v3006_v43  ;;  %v3135_v54 = vsub.f32 %v3006_v43, %v4563_v2  ;;  %4217 = vmatpush.xpose.msk.msra.mxu3 %vm9100_vm9, %v4709_v61  ;;  %vm9114_vm9 = vcmp.eq.s32.totalorder %v6159_v16, %v6764_v48 }
 0x3ac   : > { %3060 = vst [vmem:[%s7635_s13 + $0x50] sm:$0xff] %v2879_v37  ;;  %v3138_v15 = vsub.f32 %v2879_v37, %v4564_v19  ;;  %v4569_v19 = vld [vmem:[%s4831_s7 + $0x98] sm:$0xff] }
 0x3ad   : > { %v3199_v3 = vmul.f32 %v3135_v54, %v3135_v54  ;;  %4170 = vmatpush.xpose.msk.msra.mxu0 %vm9101_vm2, %v4709_v61  ;;  %vm9115_vm2 = vcmp.eq.s32.totalorder %v6159_v16, %v7201_v1 }
 0x3ae   : > { %4186 = vmatpush.xpose.msk.msra.mxu1 %vm9102_vm14, %v4709_v61  ;;  %4202 = vmatpush.xpose.msk.msra.mxu2 %vm9103_vm12, %v4709_v61  ;;  %v3202_v59 = vmul.f32 %v3138_v15, %v3138_v15  ;;  %vm9116_vm14 = vcmp.eq.s32.totalorder %v6159_v16, %v7243_v62  ;;  %vm9117_vm12 = vcmp.eq.s32.totalorder %v6151_v13, %v6755_v47 }
 0x3af   : > { %4218 = vmatpush.xpose.msk.msra.mxu3 %vm9104_vm7, %v4709_v61  ;;  %v3335_v29 = vadd.f32 %v3334_v23, %v3199_v3  ;;  %v2943_v9 = vpop.f32.mrf.mxu2  ;;  %vm9118_vm7 = vcmp.eq.s32.totalorder %v6151_v13, %v6764_v48 }
 0x3b0   : > { %v3008_v44 = vpop.f32.mrf.mxu3  ;;  %v2816_v25 = vpop.f32.mrf.mxu0  ;;  %v3339_v31 = vadd.f32 %v7766_v49, %v3202_v59 }
 0x3b1   : > { %v3009_v46 = vadd.f32 %v3008_v44, %v2943_v9  ;;  %v2881_v20 = vpop.f32.mrf.mxu1  ;;  %3336 = vadd.xlane.f32.xlu0 %v3335_v29  ;;  %4171 = vmatpush.xpose.msk.msra.mxu0 %vm9105_vm1, %v4709_v61  ;;  %vm9119_vm1 = vcmp.eq.s32.totalorder %v6151_v13, %v7201_v1  ;;  %v4570_v29 = vld [vmem:[%s4831_s7 + $0xb0] sm:$0xff] }
 0x3b2   : > { %4187 = vmatpush.xpose.msk.msra.mxu1 %vm9106_vm0, %v4709_v61  ;;  %v2882_v34 = vadd.f32 %v2881_v20, %v2816_v25  ;;  %4203 = vmatpush.xpose.msk.msra.mxu2 %vm9107_vm3, %v4709_v61  ;;  %vm9120_vm0 = vcmp.eq.s32.totalorder %v6151_v13, %v7243_v62  ;;  %vm9121_vm3 = vcmp.eq.s32.totalorder %v6131_v32, %v6755_v47 }
 0x3b3   : > { %3061 = vst [vmem:[%s7635_s13 + $0x58] sm:$0xff] %v3009_v46  ;;  %v3139_v14 = vsub.f32 %v3009_v46, %v4565_v58  ;;  %4219 = vmatpush.xpose.msk.msra.mxu3 %vm9108_vm10, %v4709_v61  ;;  %vm9122_vm10 = vcmp.eq.s32.totalorder %v6131_v32, %v6764_v48  ;;  %v4571_v58 = vld [vmem:[%s4831_s7 + $0xb8] sm:$0xff] }
 0x3b4   : > { %3064 = vst [vmem:[%s7635_s13 + $0x70] sm:$0xff] %v2882_v34  ;;  %v3142_v50 = vsub.f32 %v2882_v34, %v4566_v60  ;;  %v4572_v60 = vld [vmem:[%s4831_s7 + $0xd0] sm:$0xff] }
 0x3b5   : > { %v3203_v5 = vmul.f32 %v3139_v14, %v3139_v14  ;;  %4172 = vmatpush.xpose.msk.msra.mxu0 %vm9109_vm11, %v4709_v61  ;;  %vm9123_vm11 = vcmp.eq.s32.totalorder %v6131_v32, %v7201_v1 }
 0x3b6   : > { %4188 = vmatpush.xpose.msk.msra.mxu1 %vm9110_vm4, %v4709_v61  ;;  %4204 = vmatpush.xpose.msk.msra.mxu2 %vm9111_vm8, %v4709_v61  ;;  %v3206_v42 = vmul.f32 %v3142_v50, %v3142_v50  ;;  %vm9124_vm4 = vcmp.eq.s32.totalorder %v6131_v32, %v7243_v62  ;;  %vm9125_vm8 = vcmp.eq.s32.totalorder %v6123_v39, %v6755_v47 }
 0x3b7   : > { %4220 = vmatpush.xpose.msk.msra.mxu3 %vm9112_vm5, %v4709_v61  ;;  %v3340_v8 = vadd.f32 %v3339_v31, %v3203_v5  ;;  %v2946_v49 = vpop.f32.mrf.mxu2  ;;  %vm9126_vm5 = vcmp.eq.s32.totalorder %v6123_v39, %v6764_v48 }
 0x3b8   : > { %v3011_v22 = vpop.f32.mrf.mxu3  ;;  %v2819_v27 = vpop.f32.mrf.mxu0  ;;  %v3344_v41 = vadd.f32 %v7804_v21, %v3206_v42 }
 0x3b9   : > { %v3012_v63 = vadd.f32 %v3011_v22, %v2946_v49  ;;  %v2884_v57 = vpop.f32.mrf.mxu1  ;;  %3341 = vadd.xlane.f32.xlu1 %v3340_v8  ;;  %4173 = vmatpush.xpose.msk.msra.mxu0 %vm9113_vm6, %v4709_v61  ;;  %vm9127_vm6 = vcmp.eq.s32.totalorder %v6123_v39, %v7201_v1 }
 0x3ba   : > { %4189 = vmatpush.xpose.msk.msra.mxu1 %vm9114_vm9, %v4709_v61  ;;  %v2885_v56 = vadd.f32 %v2884_v57, %v2819_v27  ;;  %4205 = vmatpush.xpose.msk.msra.mxu2 %vm9115_vm2, %v4709_v61  ;;  %vm9128_vm9 = vcmp.eq.s32.totalorder %v6123_v39, %v7243_v62  ;;  %vm9129_vm2 = vcmp.eq.s32.totalorder %v6114_v38, %v6755_v47  ;;  %v4573_v27 = vld [vmem:[%s4831_s7 + $0xd8] sm:$0xff] }
 0x3bb   : > { %3065 = vst [vmem:[%s7635_s13 + $0x78] sm:$0xff] %v3012_v63  ;;  %v3143_v11 = vsub.f32 %v3012_v63, %v4567_v45  ;;  %4221 = vmatpush.xpose.msk.msra.mxu3 %vm9116_vm14, %v4709_v61  ;;  %vm9130_vm14 = vcmp.eq.s32.totalorder %v6114_v38, %v6764_v48  ;;  %v4574_v45 = vld [vmem:[%s4831_s7 + $0xf0] sm:$0xff] }
 0x3bc   : > { %3068 = vst [vmem:[%s7635_s13 + $0x90] sm:$0xff] %v2885_v56  ;;  %v3146_v43 = vsub.f32 %v2885_v56, %v4568_v10 }
 0x3bd   : > { %v3207_v30 = vmul.f32 %v3143_v11, %v3143_v11  ;;  %4174 = vmatpush.xpose.msk.msra.mxu0 %vm9117_vm12, %v4709_v61  ;;  %vm9131_vm12 = vcmp.eq.s32.totalorder %v6114_v38, %v7201_v1 }
 0x3be   : > { %4190 = vmatpush.xpose.msk.msra.mxu1 %vm9118_vm7, %v4709_v61  ;;  %4206 = vmatpush.xpose.msk.msra.mxu2 %vm9119_vm1, %v4709_v61  ;;  %v3210_v37 = vmul.f32 %v3146_v43, %v3146_v43  ;;  %vm9132_vm7 = vcmp.eq.s32.totalorder %v6114_v38, %v7243_v62  ;;  %vm9133_vm1 = vcmp.eq.s32.totalorder %v6107_v40, %v6755_v47 }
 0x3bf   : > { %4222 = vmatpush.xpose.msk.msra.mxu3 %vm9120_vm0, %v4709_v61  ;;  %v3345_v16 = vadd.f32 %v3344_v41, %v3207_v30  ;;  %v2949_v21 = vpop.f32.mrf.mxu2  ;;  %vm9134_vm0 = vcmp.eq.s32.totalorder %v6107_v40, %v6764_v48 }
 0x3c0   : > { %v3014_v18 = vpop.f32.mrf.mxu3  ;;  %v2822_v54 = vpop.f32.mrf.mxu0  ;;  %v3349_v44 = vadd.f32 %v7842_v28, %v3210_v37 }
 0x3c1   : > { %v3015_v2 = vadd.f32 %v3014_v18, %v2949_v21  ;;  %v2887_v3 = vpop.f32.mrf.mxu1  ;;  %3346 = vadd.xlane.f32.xlu2 %v3345_v16  ;;  %4175 = vmatpush.xpose.msk.msra.mxu0 %vm9121_vm3, %v4709_v61  ;;  %vm9135_vm3 = vcmp.eq.s32.totalorder %v6107_v40, %v7201_v1  ;;  %v4575_v18 = vld [vmem:[%s4831_s7 + $0xf8] sm:$0xff] }
 0x3c2   : > { %4191 = vmatpush.xpose.msk.msra.mxu1 %vm9122_vm10, %v4709_v61  ;;  %v2888_v13 = vadd.f32 %v2887_v3, %v2822_v54  ;;  %4207 = vmatpush.xpose.msk.msra.mxu2 %vm9123_vm11, %v4709_v61  ;;  %vm9136_vm10 = vcmp.eq.s32.totalorder %v6107_v40, %v7243_v62  ;;  %vm9137_vm11 = vcmp.eq.s32.totalorder %v6091_v36, %v6755_v47 }
 0x3c3   : > { %3069 = vst [vmem:[%s7635_s13 + $0x98] sm:$0xff] %v3015_v2  ;;  %v3147_v15 = vsub.f32 %v3015_v2, %v4569_v19  ;;  %4223 = vmatpush.xpose.msk.msra.mxu3 %vm9124_vm4, %v4709_v61  ;;  %vm9138_vm4 = vcmp.eq.s32.totalorder %v6091_v36, %v6764_v48  ;;  %v4576_v2 = vld [vmem:[%s4831_s7 + $0x110] sm:$0xff] }
 0x3c4   : > { %3072 = vst [vmem:[%s7635_s13 + $0xb0] sm:$0xff] %v2888_v13  ;;  %v3150_v9 = vsub.f32 %v2888_v13, %v4570_v29 }
 0x3c5   : > { %v3211_v23 = vmul.f32 %v3147_v15, %v3147_v15  ;;  %4176 = vmatpush.xpose.msk.msra.mxu0 %vm9125_vm8, %v4709_v61  ;;  %vm9139_vm8 = vcmp.eq.s32.totalorder %v6091_v36, %v7201_v1 }
 0x3c6   : > { %4192 = vmatpush.xpose.msk.msra.mxu1 %vm9126_vm5, %v4709_v61  ;;  %4208 = vmatpush.xpose.msk.msra.mxu2 %vm9127_vm6, %v4709_v61  ;;  %v3214_v46 = vmul.f32 %v3150_v9, %v3150_v9  ;;  %vm9140_vm5 = vcmp.eq.s32.totalorder %v6091_v36, %v7243_v62  ;;  %vm9141_vm6 = vcmp.eq.s32.totalorder %v6083_v53, %v6755_v47 }
 0x3c7   : > { %4224 = vmatpush.xpose.msk.msra.mxu3 %vm9128_vm9, %v4709_v61  ;;  %v3350_v32 = vadd.f32 %v3349_v44, %v3211_v23  ;;  %v2952_v28 = vpop.f32.mrf.mxu2  ;;  %vm9142_vm9 = vcmp.eq.s32.totalorder %v6083_v53, %v6764_v48  ;;  %v4578_v44 = vld [vmem:[%s4831_s7 + $0x130] sm:$0xff] }
 0x3c8   : > { %v3017_v59 = vpop.f32.mrf.mxu3  ;;  %v2825_v20 = vpop.f32.mrf.mxu0  ;;  %v3354_v31 = vadd.f32 %v7880_v33, %v3214_v46 }
 0x3c9   : > { %v3018_v25 = vadd.f32 %v3017_v59, %v2952_v28  ;;  %v2890_v34 = vpop.f32.mrf.mxu1  ;;  %3351 = vadd.xlane.f32.xlu2 %v3350_v32  ;;  %4177 = vmatpush.xpose.msk.msra.mxu0 %vm9129_vm2, %v4709_v61  ;;  %vm9143_vm2 = vcmp.eq.s32.totalorder %v6083_v53, %v7201_v1 }
 0x3ca   : > { %4193 = vmatpush.xpose.msk.msra.mxu1 %vm9130_vm14, %v4709_v61  ;;  %v2891_v39 = vadd.f32 %v2890_v34, %v2825_v20  ;;  %4209 = vmatpush.xpose.msk.msra.mxu2 %vm9131_vm12, %v4709_v61  ;;  %vm9144_vm14 = vcmp.eq.s32.totalorder %v6083_v53, %v7243_v62  ;;  %vm9145_vm12 = vcmp.eq.s32.totalorder %v6077_v26, %v6755_v47 }
 0x3cb   : > { %3073 = vst [vmem:[%s7635_s13 + $0xb8] sm:$0xff] %v3018_v25  ;;  %v3151_v14 = vsub.f32 %v3018_v25, %v4571_v58  ;;  %4225 = vmatpush.xpose.msk.msra.mxu3 %vm9132_vm7, %v4709_v61  ;;  %vm9146_vm7 = vcmp.eq.s32.totalorder %v6077_v26, %v6764_v48 }
 0x3cc   : > { %3076 = vst [vmem:[%s7635_s13 + $0xd0] sm:$0xff] %v2891_v39  ;;  %v3154_v50 = vsub.f32 %v2891_v39, %v4572_v60 }
 0x3cd   : > { %v3215_v5 = vmul.f32 %v3151_v14, %v3151_v14  ;;  %4178 = vmatpush.xpose.msk.msra.mxu0 %vm9133_vm1, %v4709_v61  ;;  %v4579_v14 = vld [vmem:[%s4831_s7 + $0x138] sm:$0xff] }
 0x3ce   : > { %4194 = vmatpush.xpose.msk.msra.mxu1 %vm9134_vm0, %v4709_v61  ;;  %4210 = vmatpush.xpose.msk.msra.mxu2 %vm9135_vm3, %v4709_v61  ;;  %v3218_v49 = vmul.f32 %v3154_v50, %v3154_v50  ;;  %v4580_v50 = vld [vmem:[%s4831_s7 + $0x150] sm:$0xff] }
 0x3cf   : > { %4226 = vmatpush.xpose.msk.msra.mxu3 %vm9136_vm10, %v4709_v61  ;;  %v3355_v38 = vadd.f32 %v3354_v31, %v3215_v5  ;;  %v2955_v33 = vpop.f32.mrf.mxu2 }
 0x3d0   : > { %v3020_v8 = vpop.f32.mrf.mxu3  ;;  %v2828_v42 = vpop.f32.mrf.mxu0  ;;  %v3359_v30 = vadd.f32 %v7918_v17, %v3218_v49 }
 0x3d1   : > { %v3021_v22 = vadd.f32 %v3020_v8, %v2955_v33  ;;  %v2893_v63 = vpop.f32.mrf.mxu1  ;;  %3356 = vadd.xlane.f32.xlu0 %v3355_v38  ;;  %4179 = vmatpush.xpose.msk.msra.mxu0 %vm9137_vm11, %v4709_v61 }
 0x3d2   : > { %4195 = vmatpush.xpose.msk.msra.mxu1 %vm9138_vm4, %v4709_v61  ;;  %v2894_v40 = vadd.f32 %v2893_v63, %v2828_v42  ;;  %4211 = vmatpush.xpose.msk.msra.mxu2 %vm9139_vm8, %v4709_v61 }
 0x3d3   : > { %3077 = vst [vmem:[%s7635_s13 + $0xd8] sm:$0xff] %v3021_v22  ;;  %v3155_v57 = vsub.f32 %v3021_v22, %v4573_v27  ;;  %4227 = vmatpush.xpose.msk.msra.mxu3 %vm9140_vm5, %v4709_v61  ;;  %v4581_v27 = vld [vmem:[%s4831_s7 + $0x158] sm:$0xff] }
 0x3d4   : > { %3080 = vst [vmem:[%s7635_s13 + $0xf0] sm:$0xff] %v2894_v40  ;;  %v3158_v11 = vsub.f32 %v2894_v40, %v4574_v45  ;;  %v4582_v45 = vld [vmem:[%s4831_s7 + $0x170] sm:$0xff] }
 0x3d5   : > { %v3219_v56 = vmul.f32 %v3155_v57, %v3155_v57  ;;  %4180 = vmatpush.xpose.msk.msra.mxu0 %vm9141_vm6, %v4709_v61 }
 0x3d6   : > { %4196 = vmatpush.xpose.msk.msra.mxu1 %vm9142_vm9, %v4709_v61  ;;  %4212 = vmatpush.xpose.msk.msra.mxu2 %vm9143_vm2, %v4709_v61  ;;  %v3222_v43 = vmul.f32 %v3158_v11, %v3158_v11 }
 0x3d7   : > { %4228 = vmatpush.xpose.msk.msra.mxu3 %vm9144_vm14, %v4709_v61  ;;  %v3360_v36 = vadd.f32 %v3359_v30, %v3219_v56  ;;  %v2958_v17 = vpop.f32.mrf.mxu2 }
 0x3d8   : > { %v3023_v10 = vpop.f32.mrf.mxu3  ;;  %v2831_v16 = vpop.f32.mrf.mxu0  ;;  %v3364_v54 = vadd.f32 %v7940_v24, %v3222_v43  ;;  %v4577_v24 = vld [vmem:[%s4831_s7 + $0x118] sm:$0xff] }
 0x3d9   : > { %v3024_v41 = vadd.f32 %v3023_v10, %v2958_v17  ;;  %v2896_v21 = vpop.f32.mrf.mxu1  ;;  %3361 = vadd.xlane.f32.xlu1 %v3360_v36  ;;  %4181 = vmatpush.xpose.msk.msra.mxu0 %vm9145_vm12, %v4709_v61 }
 0x3da   : > { %4197 = vmatpush.xpose.msk.msra.mxu1 %vm9146_vm7, %v4709_v61  ;;  %v2897_v53 = vadd.f32 %v2896_v21, %v2831_v16  ;;  %4213 = vmatpush.xpose.msk.msra.mxu2 %vm2148_vm15, %v4709_v61 }
 0x3db   : > { %3081 = vst [vmem:[%s7635_s13 + $0xf8] sm:$0xff] %v3024_v41  ;;  %v3159_v37 = vsub.f32 %v3024_v41, %v4575_v18  ;;  %4229 = vmatpush.xpose.msk.msra.mxu3 %vm2149_vm13, %v4709_v61 }
 0x3dc   : > { %3084 = vst [vmem:[%s7635_s13 + $0x110] sm:$0xff] %v2897_v53  ;;  %v3162_v48 = vsub.f32 %v2897_v53, %v4576_v2  ;;  %3531 = vmatmul.f32.vlgmr.msra.gmra.mxu0 %v4709_v61  ;;  %v4583_v53 = vld [vmem:[%s4831_s7 + $0x178] sm:$0xff] }
 0x3dd   : > { %v3223_v47 = vmul.f32 %v3159_v37, %v3159_v37  ;;  %3551 = vmatmul.f32.vlgmr.msra.gmra.mxu1 %v4709_v61  ;;  %3571 = vmatmul.f32.vlgmr.msra.gmra.mxu2 %v4709_v61 }
 0x3de   : > { %3591 = vmatmul.f32.vlgmr.msra.gmra.mxu3 %v4709_v61  ;;  %v3226_v3 = vmul.f32 %v3162_v48, %v3162_v48 }
 0x3df   : > { %v3365_v26 = vadd.f32 %v3364_v54, %v3223_v47  ;;  %v2961_v1 = vpop.f32.mrf.mxu2  ;;  %v4584_v47 = vld [vmem:[%s4831_s7 + $0x190] sm:$0xff] }
 0x3e0   : > { %v3026_v62 = vpop.f32.mrf.mxu3  ;;  %v2834_v19 = vpop.f32.mrf.mxu0  ;;  %v3369_v61 = vadd.f32 %v7946_v6, %v3226_v3 }
 0x3e1   : > { %v3027_v13 = vadd.f32 %v3026_v62, %v2961_v1  ;;  %v2899_v15 = vpop.f32.mrf.mxu1  ;;  %3366 = vadd.xlane.f32.xlu2 %v3365_v26 }
 0x3e2   : > { %v2900_v23 = vadd.f32 %v2899_v15, %v2834_v19  ;;  %v4585_v15 = vld [vmem:[%s4831_s7 + $0x198] sm:$0xff] }
 0x3e3   : > { %3085 = vst [vmem:[%s7635_s13 + $0x118] sm:$0xff] %v3027_v13  ;;  %v3163_v29 = vsub.f32 %v3027_v13, %v4577_v24 }
 0x3e4   : > { %3088 = vst [vmem:[%s7635_s13 + $0x130] sm:$0xff] %v2900_v23  ;;  %v3166_v32 = vsub.f32 %v2900_v23, %v4578_v44 }
 0x3e5   : > { %v3227_v9 = vmul.f32 %v3163_v29, %v3163_v29  ;;  %v4586_v29 = vld [vmem:[%s4831_s7 + $0x1b0] sm:$0xff] }
 0x3e6   : > { %v3230_v25 = vmul.f32 %v3166_v32, %v3166_v32 }
 0x3e7   : > { %v3370_v28 = vadd.f32 %v3369_v61, %v3227_v9  ;;  %v2964_v59 = vpop.f32.mrf.mxu2 }
 0x3e8   : > { %v3029_v46 = vpop.f32.mrf.mxu3  ;;  %v2837_v34 = vpop.f32.mrf.mxu0  ;;  %v3374_v6 = vadd.f32 %v7952_v12, %v3230_v25 }
 0x3e9   : > { %v3030_v20 = vadd.f32 %v3029_v46, %v2964_v59  ;;  %v2902_v39 = vpop.f32.mrf.mxu1  ;;  %3371 = vadd.xlane.f32.xlu0 %v3370_v28 }
 0x3ea   : > { %v2903_v58 = vadd.f32 %v2902_v39, %v2837_v34  ;;  %v4587_v34 = vld [vmem:[%s4831_s7 + $0x1b8] sm:$0xff] }
 0x3eb   : > { %3089 = vst [vmem:[%s7635_s13 + $0x138] sm:$0xff] %v3030_v20  ;;  %v3167_v5 = vsub.f32 %v3030_v20, %v4579_v14  ;;  %v4588_v14 = vld [vmem:[%s4831_s7 + $0x1d0] sm:$0xff] }
 0x3ec   : > { %3092 = vst [vmem:[%s7635_s13 + $0x150] sm:$0xff] %v2903_v58  ;;  %v3170_v31 = vsub.f32 %v2903_v58, %v4580_v50 }
 0x3ed   : > { %v3231_v60 = vmul.f32 %v3167_v5, %v3167_v5 }
 0x3ee   : > { %v3234_v49 = vmul.f32 %v3170_v31, %v3170_v31 }
 0x3ef   : > { %v3375_v38 = vadd.f32 %v3374_v6, %v3231_v60  ;;  %v2967_v33 = vpop.f32.mrf.mxu2 }
 0x3f0   : > { %v3032_v8 = vpop.f32.mrf.mxu3  ;;  %v2840_v42 = vpop.f32.mrf.mxu0  ;;  %v3379_v12 = vadd.f32 %v7958_v55, %v3234_v49 }
 0x3f1   : > { %v3033_v22 = vadd.f32 %v3032_v8, %v2967_v33  ;;  %v2905_v63 = vpop.f32.mrf.mxu1  ;;  %3376 = vadd.xlane.f32.xlu1 %v3375_v38 }
 0x3f2   : > { %v2906_v40 = vadd.f32 %v2905_v63, %v2840_v42 }
 0x3f3   : > { %3093 = vst [vmem:[%s7635_s13 + $0x158] sm:$0xff] %v3033_v22  ;;  %v3171_v57 = vsub.f32 %v3033_v22, %v4581_v27  ;;  %v4589_v22 = vld [vmem:[%s4831_s7 + $0x1d8] sm:$0xff] }
 0x3f4   : > { %3096 = vst [vmem:[%s7635_s13 + $0x170] sm:$0xff] %v2906_v40  ;;  %v3174_v11 = vsub.f32 %v2906_v40, %v4582_v45  ;;  %v4590_v40 = vld [vmem:[%s4831_s7 + $0x1f0] sm:$0xff] }
 0x3f5   : > { %v3235_v56 = vmul.f32 %v3171_v57, %v3171_v57 }
 0x3f6   : > { %v3238_v10 = vmul.f32 %v3174_v11, %v3174_v11 }
 0x3f7   : > { %v3380_v30 = vadd.f32 %v3379_v12, %v3235_v56  ;;  %v2970_v36 = vpop.f32.mrf.mxu2 }
 0x3f8   : > { %v3035_v17 = vpop.f32.mrf.mxu3  ;;  %v2843_v41 = vpop.f32.mrf.mxu0  ;;  %v3384_v55 = vadd.f32 %v7964_v4, %v3238_v10 }
 0x3f9   : > { %v3036_v43 = vadd.f32 %v3035_v17, %v2970_v36  ;;  %v2908_v16 = vpop.f32.mrf.mxu1  ;;  %3381 = vadd.xlane.f32.xlu2 %v3380_v30  ;;  %v4591_v30 = vld [vmem:[%s4831_s7 + $0x1f8] sm:$0xff]  ;;  %s4638_s7 = scalar_lea.hbm %s4637_s30, 512 }
 0x3fa   : > { %v2909_v21 = vadd.f32 %v2908_v16, %v2843_v41  ;;  %p4639_p5 = scmp.ne.s32.totalorder %s4637_s30, %s4638_s7  ;;  %p4644_p10 = scmp.lt.s32.totalorder %s4642_s24, %s4638_s7 }
 0x3fb   : > { %3097 = vst [vmem:[%s7635_s13 + $0x178] sm:$0xff] %v3036_v43  ;;  %v3175_v18 = vsub.f32 %v3036_v43, %v4583_v53 }
 0x3fc   : > { %3100 = vst [vmem:[%s7635_s13 + $0x190] sm:$0xff] %v2909_v21  ;;  %v3178_v2 = vsub.f32 %v2909_v21, %v4584_v47  ;;  %p4640_p6 = pnand %p4639_p5, %p4802_p9  ;;  %p4645_p13 = por %p4644_p10, %p4643_p8 }
 0x3fd   : > { %v3239_v37 = vmul.f32 %v3175_v18, %v3175_v18 }
 0x3fe   : > { %v3242_v1 = vmul.f32 %v3178_v2, %v3178_v2  ;;  %p4641_p7 = pneg %p4640_p6 }
 0x3ff   : > { %v3385_v48 = vadd.f32 %v3384_v55, %v3239_v37  ;;  %v2973_v54 = vpop.f32.mrf.mxu2 }
 0x400   : > { %v3038_v26 = vpop.f32.mrf.mxu3  ;;  %v2846_v3 = vpop.f32.mrf.mxu0  ;;  %v3389_v4 = vadd.f32 %v7970_v51, %v3242_v1  ;;  %p4646_p0 = pnand %p4645_p13, %p4641_p7 }
 0x401   : > { %v3039_v62 = vadd.f32 %v3038_v26, %v2973_v54  ;;  %v2911_v13 = vpop.f32.mrf.mxu1  ;;  %3386 = vadd.xlane.f32.xlu0 %v3385_v48 }
 0x402   : > { %v2912_v19 = vadd.f32 %v2911_v13, %v2846_v3 }
 0x403   : > { %3101 = vst [vmem:[%s7635_s13 + $0x198] sm:$0xff] %v3039_v62  ;;  %v3179_v23 = vsub.f32 %v3039_v62, %v4585_v15 }
 0x404   : > { %3104 = vst [vmem:[%s7635_s13 + $0x1b0] sm:$0xff] %v2912_v19  ;;  %v3182_v9 = vsub.f32 %v2912_v19, %v4586_v29 }
 0x405   : > { %v3243_v24 = vmul.f32 %v3179_v23, %v3179_v23 }
 0x406   : > { %v3246_v28 = vmul.f32 %v3182_v9, %v3182_v9 }
 0x407   : > { %v3390_v44 = vadd.f32 %v3389_v4, %v3243_v24  ;;  %v2976_v32 = vpop.f32.mrf.mxu2 }
 0x408   : > { %v3041_v61 = vpop.f32.mrf.mxu3  ;;  %v2849_v46 = vpop.f32.mrf.mxu0  ;;  %v3394_v51 = vadd.f32 %v7976_v0, %v3246_v28 }
 0x409   : > { %v3042_v59 = vadd.f32 %v3041_v61, %v2976_v32  ;;  %v2914_v25 = vpop.f32.mrf.mxu1  ;;  %3391 = vadd.xlane.f32.xlu1 %v3390_v44 }
 0x40a   : > { %v2915_v20 = vadd.f32 %v2914_v25, %v2849_v46 }
 0x40b   : > { %3105 = vst [vmem:[%s7635_s13 + $0x1b8] sm:$0xff] %v3042_v59  ;;  %v3183_v39 = vsub.f32 %v3042_v59, %v4587_v34 }
 0x40c   : > { %3108 = vst [vmem:[%s7635_s13 + $0x1d0] sm:$0xff] %v2915_v20  ;;  %v3186_v5 = vsub.f32 %v2915_v20, %v4588_v14 }
 0x40d   : > { %v3247_v58 = vmul.f32 %v3183_v39, %v3183_v39 }
 0x40e   : > { %v3250_v6 = vmul.f32 %v3186_v5, %v3186_v5 }
 0x40f   : > { %v3395_v60 = vadd.f32 %v3394_v51, %v3247_v58  ;;  %v2979_v50 = vpop.f32.mrf.mxu2 }
 0x410   : > { %v3044_v31 = vpop.f32.mrf.mxu3  ;;  %v2852_v33 = vpop.f32.mrf.mxu0  ;;  %v3399_v0 = vadd.f32 %v7982_v7, %v3250_v6 }
 0x411   : > { %v3045_v38 = vadd.f32 %v3044_v31, %v2979_v50  ;;  %v2917_v8 = vpop.f32.mrf.mxu1  ;;  %3396 = vadd.xlane.f32.xlu2 %v3395_v60 }
 0x412   : > { %v2918_v49 = vadd.f32 %v2917_v8, %v2852_v33 }
 0x413   : > { %3109 = vst [vmem:[%s7635_s13 + $0x1d8] sm:$0xff] %v3045_v38  ;;  %v3187_v42 = vsub.f32 %v3045_v38, %v4589_v22 }
 0x414   : > { %3112 = vst [vmem:[%s7635_s13 + $0x1f0] sm:$0xff] %v2918_v49  ;;  %v3190_v27 = vsub.f32 %v2918_v49, %v4590_v40 }
 0x415   : > { %v3251_v63 = vmul.f32 %v3187_v42, %v3187_v42 }
 0x416   : > { %v3254_v11 = vmul.f32 %v3190_v27, %v3190_v27 }
 0x417   : > { %v3400_v57 = vadd.f32 %v3399_v0, %v3251_v63  ;;  %v2982_v56 = vpop.f32.mrf.mxu2 }
 0x418   : > { %v3047_v45 = vpop.f32.mrf.mxu3  ;;  %v3404_v10 = vadd.f32 %v8001_v35, %v3254_v11 }
 0x419   : > { %v3048_v12 = vadd.f32 %v3047_v45, %v2982_v56  ;;  %3401 = vadd.xlane.f32.xlu0 %v3400_v57 }
 0x41b   : > { %3113 = vst [vmem:[%s7635_s13 + $0x1f8] sm:$0xff] %v3048_v12  ;;  %v3191_v36 = vsub.f32 %v3048_v12, %v4591_v30 }
 0x41d   : > { %v3255_v17 = vmul.f32 %v3191_v36, %v3191_v36 }
 0x41f   : > { %v3405_v43 = vadd.f32 %v3404_v10, %v3255_v17 }
 0x421   : > { %3406 = vadd.xlane.f32.xlu1 %v3405_v43 }
 0x422   : > { %4649 = shalt.err (!%p4646_p0)
}
 0x423   : > { %s4710_s29 = smov 512   ;;  %s4711_s13 = smov 32   ;;  %v3452_v7 = vpop.f32.mrf.mxu0  ;;  %v3472_v35 = vpop.f32.mrf.mxu1  ;;  %vm9147_vm15 = vcmask 1040384   ;;  %vm3600_vm13 = vcmp.lt.s32.totalorder %v9034_v52, 256  ;;  %vm3429_vm1 = vcmask 0  }
 0x424   : > { %4459 = dma.vmem_to_hbm [thread:$0]  (%p4802_p9), %s3641_s19, 8192, %s3643_s20, %s3604_s27, %s4710_s29, %s4710_s29, %s4711_s13   ;;  %v3492_v41 = vpop.f32.mrf.mxu2  ;;  %v3512_v16 = vpop.f32.mrf.mxu3  ;;  %v3473_v37 = vadd.f32 %v3472_v35, %v3452_v7 }
 0x425   : > { %v3332_v55 = vpop.xlane.xlu2 %3331  ;;  %s3845_s0 = sshll.u32 %s7319_s28, 1  ;;  %v3337_v19 = vpop.xlane.xlu0 %3336  ;;  %s341_s19 = scalar_lea.vmem %s8387_s5, %s7319_s28 }
 0x426   : > { %v3493_v48 = vadd.f32 %v3492_v41, %v3473_v37  ;;  %s349_s10 = scalar_lea.vmem %s8388_s6, %s3845_s0  ;;  %v3408_v29 = vadd.f32 %v3337_v19, %v3332_v55 }
 0x428   : > { %v3513_v1 = vadd.f32 %v3512_v16, %v3493_v48 }
 0x42c   : > { %v3342_v15 = vpop.xlane.xlu1 %3341 }
 0x42d   : > { %v3409_v9 = vadd.f32 %v3408_v29, %v3342_v15 }
 0x434   : > { %v3347_v13 = vpop.xlane.xlu2 %3346 }
 0x435   : > { %v3410_v44 = vadd.f32 %v3409_v9, %v3347_v13 }
 0x43c   : > { %v3352_v23 = vpop.xlane.xlu2 %3351 }
 0x43d   : > { %v3411_v61 = vadd.f32 %v3410_v44, %v3352_v23 }
 0x444   : > { %v3357_v24 = vpop.xlane.xlu0 %3356 }
 0x445   : > { %v3412_v59 = vadd.f32 %v3411_v61, %v3357_v24 }
 0x44c   : > { %v3362_v4 = vpop.xlane.xlu1 %3361 }
 0x44d   : > { %v3413_v46 = vadd.f32 %v3412_v59, %v3362_v4 }
 0x454   : > { %v3367_v32 = vpop.xlane.xlu2 %3366 }
 0x455   : > { %v3414_v20 = vadd.f32 %v3413_v46, %v3367_v32 }
 0x459   : > { %v3532_v21 = vpop.f32.mrf.mxu0 }
 0x45a   : > { %v3552_v53 = vpop.f32.mrf.mxu1 }
 0x45b   : > { %v3553_v18 = vadd.f32 %v3552_v53, %v3532_v21 }
 0x45c   : > { %v3372_v28 = vpop.xlane.xlu0 %3371 }
 0x45d   : > { %v3415_v39 = vadd.f32 %v3414_v20, %v3372_v28 }
 0x460   : > { %v3572_v47 = vpop.f32.mrf.mxu2 }
 0x461   : > { %v3573_v2 = vadd.f32 %v3572_v47, %v3553_v18  ;;  %v3592_v54 = vpop.f32.mrf.mxu3 }
 0x463   : > { %v3593_v26 = vadd.f32 %v3592_v54, %v3573_v2 }
 0x464   : > { %v3377_v25 = vpop.xlane.xlu1 %3376 }
 0x465   : > { %v3597_v62 = vrot.slane %v3593_v26, 7  ;;  %v3416_v58 = vadd.f32 %v3415_v39, %v3377_v25 }
 0x467   : > { %v3598_v3 = vsel %vm9147_vm15, %v3513_v1, %v3597_v62 }
 0x468   : > { %3602 = vst.msk [vmem:[%s349_s10] sm:$0x3] %vm3600_vm13, %v3598_v3 }
 0x46c   : > { %v3382_v34 = vpop.xlane.xlu2 %3381 }
 0x46d   : > { %v3417_v14 = vadd.f32 %v3416_v58, %v3382_v34 }
 0x474   : > { %v3387_v52 = vpop.xlane.xlu0 %3386 }
 0x475   : > { %v3418_v51 = vadd.f32 %v3417_v14, %v3387_v52 }
 0x47c   : > { %v3392_v5 = vpop.xlane.xlu1 %3391 }
 0x47d   : > { %v3419_v50 = vadd.f32 %v3418_v51, %v3392_v5 }
 0x484   : > { %v3397_v60 = vpop.xlane.xlu2 %3396 }
 0x485   : > { %v3420_v6 = vadd.f32 %v3419_v50, %v3397_v60 }
 0x48c   : > { %v3402_v31 = vpop.xlane.xlu0 %3401 }
 0x48d   : > { %v3421_v38 = vadd.f32 %v3420_v6, %v3402_v31 }
 0x494   : > { %v3407_v33 = vpop.xlane.xlu1 %3406 }
 0x495   : > { %v3422_v8 = vadd.f32 %v3421_v38, %v3407_v33 }
 0x497   : > { %v3423_v49 = vrot.slane %v3422_v8, 4 }
 0x499   : > { %v3424_v22 = vadd.f32 %v3423_v49, %v3422_v8 }
 0x49b   : > { %v3425_v42 = vrot.slane %v3424_v22, 2 }
 0x49d   : > { %v3426_v63 = vadd.f32 %v3425_v42, %v3424_v22 }
 0x49f   : > { %v3427_v40 = vrot.slane %v3426_v63, 1 }
 0x4a1   : > { %v3428_v27 = vadd.f32 %v3427_v40, %v3426_v63 }
 0x4a3   : > { %3430 = vst.msk [vmem:[%s341_s19] sm:$0x1] %vm3429_vm1, %v3428_v27 }
 0x4a4 PF: > { %s3667_s20 = sand.u32 1, %s4684_s21   ;;  %p4466_p9 = pnand %p3837_p12, %p4809_p11 }
 0x4a5   : > { %s3668_s27 = scalar_lea.sflag [#allocation4], %s3667_s20 }
 0x4a6   : > { %p4467_p1 = pneg %p4466_p9 }
 0x4a8   : > { %4679 = dma.done.wait (%p4467_p1), %s3668_s27, 8192  }
 0x4a9   : > { %4681 = vsyncadd (%p4467_p1), %s3668_s27, 4294959104  ;;  %s23_s26 = sadd.s32 1, %s4704_s26   ;;  %s9148_s28 = sld [smem:[#allocation8_spill]] }
 0x4aa   : > { %p20_p2 = scmp.ge.s32.totalorder %s23_s26, 4   ;;  %s9149_s21 = smov %s4688_s22 }
 0x4ab   : > { %s9150_s22 = smov %s4692_s23  ;;  %s9151_s23 = smov %s4807_s11 }
 0x4ac   : > { %s9152_s24 = smov %s4700_s25  ;;  %22 = sbr.rel (!%p20_p2) target bundleno = 8 (0x8), region = 113 }
 0x4af   : > { %s9153_s25 = smov %s9148_s28 }
 0x4b1   :  { %3705 = vsyncpa [#allocation3], 1 }
 0x4b2   :  { %3707 = vsyncpa [#allocation3 + $0x1], 1 }
 0x4b3   :  { %3708 = vsyncpa [#allocation4], 1 }
 0x4b4   :  { %3710 = vsyncpa [#allocation4 + $0x1], 1 }

</bundles_post_ra>
